<compile_context>
chip_gen: v6e
topology: v6e:2x2x1
jax: 0.10.0
libtpu: 0.0.40
codegen_flags: <defaults>
</compile_context>

<pallas_src>
import math

import jax
import jax.numpy as jnp
from jax.experimental import pallas as pl
from jax.experimental.pallas import tpu as pltpu

# ---------------- model configuration (small, TPU-tile friendly) -------------
D_MODEL   = 256          # embed_dim == d_model
NUM_HEADS = 2
HEAD_DIM  = D_MODEL // NUM_HEADS   # 128 -> lane aligned
HIDDEN    = 512          # ffn hidden_dim
N_BLOCKS  = 2            # decoder blocks
VOCAB     = 128          # op_vocab_size
MAX_LEN   = 128
BATCH     = 2
SEQ       = 8

_SCALE = 1.0 / math.sqrt(HEAD_DIM)

# packed weight-slab indices (axis 1 of the (NB, 9, D, D) bf16 tensor)
W_MQ, W_MK, W_MV, W_MO = 0, 1, 2, 3        # masked self-attention
W_CQ, W_CK, W_CV, W_CO = 4, 5, 6, 7        # cross attention
W_FFN = 8                                  # precomposed fc1 @ fc2
# packed vector-slab row indices (axis 1 of the (NB, 16, D) f32 tensor)
V_MBQ, V_MBK, V_MBV, V_MBO = 0, 1, 2, 3
V_CBQ, V_CBK, V_CBV, V_CBO = 4, 5, 6, 7
V_FFNB = 8
V_LN1G, V_LN1B, V_LN2G, V_LN2B, V_LN3G, V_LN3B = 9, 10, 11, 12, 13, 14
# row 15 is zero padding (keeps the slab sublane-aligned at 16 rows)


# ============================ fused Pallas kernel ============================

def _decoder_kernel(x_ref, enc_ref, mask_ref, wm_ref, vec_ref, ow_ref, ob_ref,
                    o_ref, x_sc):
    """One decoder block per grid step; carried activation lives in VMEM scratch."""
    f32, bf16 = jnp.float32, jnp.bfloat16
    blk = pl.program_id(0)
    G = NUM_HEADS * BATCH

    @pl.when(blk == 0)
    def _():
        x_sc[...] = x_ref[...]          # seed the carried residual stream

    x = x_sc[...]                       # (B*S, D) f32
    enc_bf = enc_ref[...]               # (B*S, D) bf16 (Q and K of cross attention)
    mask_g = mask_ref[...]              # (H*B, S) additive key-padding mask
    vecs = vec_ref[...]                 # (16, D) f32 biases / LN params of this block

    def row(i):                         # (1, D) broadcastable bias / gain row
        return vecs[i:i + 1, :]

    def heads_stack(M):                 # (B*S, D) -> (G, S, HD), group order (h, b)
        cols = [M[:, h * HEAD_DIM:(h + 1) * HEAD_DIM] for h in range(NUM_HEADS)]
        return jnp.concatenate(cols, axis=0).reshape(G, SEQ, HEAD_DIM)

    def mha(q_bf, k_bf, v_bf, wbase, vbase, mask):
        # dense projections with batch folded into the matmul M dim (M = B*S)
        Q = jnp.dot(q_bf, wm_ref[wbase + 0], preferred_element_type=f32) + row(vbase + 0)
        K = jnp.dot(k_bf, wm_ref[wbase + 1], preferred_element_type=f32) + row(vbase + 1)
        V = jnp.dot(v_bf, wm_ref[wbase + 2], preferred_element_type=f32) + row(vbase + 2)
        Q3 = heads_stack(Q).astype(bf16)            # (G, S, HD)
        K3 = heads_stack(K).astype(bf16)
        V3 = heads_stack(V).astype(bf16)
        # scores for ALL (head, batch) groups in one batched matmul;
        # the 1/sqrt(HD) scale is folded into wq/bq at init time.
        s = jnp.einsum('gqd,gkd->gqk', Q3, K3, preferred_element_type=f32)  # (G,S,S)
        if mask is not None:
            s = s + mask[:, None, :]
        # one batched softmax over the stacked slab (single max/exp/sum/recip chain)
        s = s - jnp.max(s, axis=-1, keepdims=True)
        e = jnp.exp(s)
        p = e * pl.reciprocal(jnp.sum(e, axis=-1, keepdims=True), approx=True)
        heads = jnp.einsum('gqk,gkd->gqd', p.astype(bf16), V3,
                           preferred_element_type=f32)                      # (G,S,HD)
        flat = heads.reshape(G * SEQ, HEAD_DIM)
        # lane-aligned "concat": head h lands in columns [h*HD, (h+1)*HD)
        cat = jnp.concatenate(
            [flat[h * BATCH * SEQ:(h + 1) * BATCH * SEQ, :] for h in range(NUM_HEADS)],
            axis=1)                                                         # (B*S, D)
        # single full-width Wo matmul (no per-head partial accumulation)
        return jnp.dot(cat.astype(bf16), wm_ref[wbase + 3],
                       preferred_element_type=f32) + row(vbase + 3)

    def add_ln(a, y, gi, bi):
        z = a + y
        mean = jnp.mean(z, axis=-1, keepdims=True)
        zc = z - mean
        var = jnp.mean(zc * zc, axis=-1, keepdims=True)
        return zc * jax.lax.rsqrt(var + 1e-5) * row(gi) + row(bi)

    # --- masked self-attention (key_padding_mask) + add & LayerNorm ----------
    x_bf = x.astype(bf16)
    y = mha(x_bf, x_bf, x_bf, W_MQ, V_MBQ, mask_g)
    x = add_ln(x, y, V_LN1G, V_LN1B)

    # --- cross attention: Q = enc, K = enc, V = decoder state (as in ref) ----
    y = mha(enc_bf, enc_bf, x.astype(bf16), W_CQ, V_CBQ, None)
    x = add_ln(x, y, V_LN2G, V_LN2B)

    # --- FFN: fc2(fc1(x)) has no nonlinearity -> precomposed single matmul ---
    y = jnp.dot(x.astype(bf16), wm_ref[W_FFN], preferred_element_type=f32) + row(V_FFNB)
    x = add_ln(x, y, V_LN3G, V_LN3B)

    x_sc[...] = x                       # carry to the next block

    @pl.when(blk == N_BLOCKS - 1)
    def _():
        # final Linear + softmax over the vocab axis.
        # TODO(synk): torch.softmax(...) in the reference omits `dim`; interpreted as last dim.
        logits = jnp.dot(x.astype(bf16), ow_ref[...],
                         preferred_element_type=f32) + ob_ref[...]
        m = jnp.max(logits, axis=-1, keepdims=True)
        e = jnp.exp(logits - m)
        # exact divide for the FINAL probabilities (approx recip only in attention)
        o_ref[...] = (e / jnp.sum(e, axis=-1, keepdims=True)).astype(o_ref.dtype)


# ============================ wrapper ========================================

def decoder_forward(tokens, enc_op, key_pad_mask, params):
    B, S = tokens.shape
    assert B == BATCH and S == SEQ, "kernel is specialized to (BATCH, SEQ)"

    # embedding gather kept in plain JAX glue
    x = (params['word_emb'][tokens]
         + params['pos_emb'][jnp.arange(S)][None, :, :]).astype(jnp.float32)
    x2d = x.reshape(B * S, D_MODEL)                          # wrapper-side layout plumbing
    enc2d = enc_op.reshape(B * S, D_MODEL).astype(jnp.bfloat16)
    # additive key-padding mask in (head, batch) group order: (H*B, S)
    mask_add = jnp.where(key_pad_mask, -1e9, 0.0).astype(jnp.float32)   # (B, S)
    mask_g = jnp.tile(mask_add, (NUM_HEADS, 1))                          # (H*B, S)

    kp = params['kernel']

    out2d = pl.pallas_call(
        _decoder_kernel,
        out_shape=jax.ShapeDtypeStruct((B * S, VOCAB), jnp.float32),
        grid_spec=pltpu.PrefetchScalarGridSpec(
            num_scalar_prefetch=0,
            grid=(N_BLOCKS,),
            in_specs=[
                pl.BlockSpec((B * S, D_MODEL), lambda blk: (0, 0)),            # x (f32)
                pl.BlockSpec((B * S, D_MODEL), lambda blk: (0, 0)),            # enc (bf16)
                pl.BlockSpec((NUM_HEADS * B, S), lambda blk: (0, 0)),          # mask
                pl.BlockSpec((None, 9, D_MODEL, D_MODEL),
                             lambda blk: (blk, 0, 0, 0)),                      # per-block weights
                pl.BlockSpec((None, 16, D_MODEL), lambda blk: (blk, 0, 0)),    # per-block biases/LN
                pl.BlockSpec((D_MODEL, VOCAB), lambda blk: (0, 0)),            # out_w (bf16)
                pl.BlockSpec((1, VOCAB), lambda blk: (0, 0)),                  # out_b (f32)
            ],
            out_specs=pl.BlockSpec((B * S, VOCAB), lambda blk: (0, 0)),
            scratch_shapes=[pltpu.VMEM((B * S, D_MODEL), jnp.float32)],        # carried x
        ),
        compiler_params=pltpu.CompilerParams(
            dimension_semantics=("arbitrary",),
            vmem_limit_bytes=32 * 1024 * 1024,
        ),
    )(x2d, enc2d, mask_g, kp['wmats'], kp['vecs'], kp['out_w'], kp['out_b'])
    return out2d.reshape(B, S, VOCAB)


# ============================ parameter setup ================================

def init_params(key):
    keys = iter(jax.random.split(key, 64))
    nrm = lambda shape, s=0.02: jax.random.normal(next(keys), shape, jnp.float32) * s

    NB = N_BLOCKS
    master = {}                                        # f32 masters (reference path)
    for pre in ('m_', 'c_'):
        for nm in ('wq', 'wk', 'wv', 'wo'):
            master[pre + nm] = nrm((NB, D_MODEL, D_MODEL))
        for nm in ('bq', 'bk', 'bv', 'bo'):
            master[pre + nm] = nrm((NB, 1, D_MODEL), 0.01)
    master['fc1_w'] = nrm((NB, D_MODEL, HIDDEN))
    master['fc1_b'] = nrm((NB, 1, HIDDEN), 0.01)
    master['fc2_w'] = nrm((NB, HIDDEN, D_MODEL))
    master['fc2_b'] = nrm((NB, 1, D_MODEL), 0.01)
    for i in (1, 2, 3):
        master[f'ln{i}_g'] = jnp.ones((NB, 1, D_MODEL), jnp.float32)
        master[f'ln{i}_b'] = jnp.zeros((NB, 1, D_MODEL), jnp.float32)
    master['out_w'] = nrm((D_MODEL, VOCAB))
    master['out_b'] = nrm((1, VOCAB), 0.01)

    # ---- packed kernel weights ----------------------------------------------
    # FFN precompose (valid because the module has no activation between fc1/fc2)
    ffn_w = jnp.einsum('bdh,bhe->bde', master['fc1_w'], master['fc2_w'])            # (NB,D,D)
    ffn_b = jnp.einsum('boh,bhe->boe', master['fc1_b'], master['fc2_w']) + master['fc2_b']
    wmats = jnp.stack([
        master['m_wq'] * _SCALE, master['m_wk'], master['m_wv'], master['m_wo'],
        master['c_wq'] * _SCALE, master['c_wk'], master['c_wv'], master['c_wo'],
        ffn_w,
    ], axis=1).astype(jnp.bfloat16)                                                 # (NB,9,D,D)
    vec_rows = [
        master['m_bq'] * _SCALE, master['m_bk'], master['m_bv'], master['m_bo'],
        master['c_bq'] * _SCALE, master['c_bk'], master['c_bv'], master['c_bo'],
        ffn_b,
        master['ln1_g'], master['ln1_b'], master['ln2_g'], master['ln2_b'],
        master['ln3_g'], master['ln3_b'],
        jnp.zeros((NB, 1, D_MODEL), jnp.float32),        # pad to 16 rows
    ]
    vecs = jnp.concatenate(vec_rows, axis=1).astype(jnp.float32)                    # (NB,16,D)

    kernel_p = {
        'wmats': wmats,
        'vecs': vecs,
        'out_w': master['out_w'].astype(jnp.bfloat16),
        'out_b': master['out_b'],
    }
    return {
        'word_emb': nrm((VOCAB, D_MODEL), 1.0),
        'pos_emb': nrm((MAX_LEN, D_MODEL), 1.0),
        'master': master,
        'kernel': kernel_p,
    }


# ============================ pure-JAX reference =============================

def _mha_ref(q, k, v, m, pre, blk, mask_add):
    Q = q @ m[pre + 'wq'][blk] + m[pre + 'bq'][blk]
    K = k @ m[pre + 'wk'][blk] + m[pre + 'bk'][blk]
    V = v @ m[pre + 'wv'][blk] + m[pre + 'bv'][blk]
    B, Sq, _ = q.shape
    Sk = k.shape[1]
    Qh = Q.reshape(B, Sq, NUM_HEADS, HEAD_DIM).transpose(0, 2, 1, 3)
    Kh = K.reshape(B, Sk, NUM_HEADS, HEAD_DIM).transpose(0, 2, 1, 3)
    Vh = V.reshape(B, Sk, NUM_HEADS, HEAD_DIM).transpose(0, 2, 1, 3)
    s = jnp.einsum('bhqd,bhkd->bhqk', Qh, Kh) / math.sqrt(HEAD_DIM)
    if mask_add is not None:
        s = s + mask_add[:, None, :, :]
    a = jax.nn.softmax(s, axis=-1)
    o = jnp.einsum('bhqk,bhkd->bhqd', a, Vh).transpose(0, 2, 1, 3).reshape(B, Sq, D_MODEL)
    return o @ m[pre + 'wo'][blk] + m[pre + 'bo'][blk]


def _add_ln_ref(x, y, g, b):
    z = x + y
    mean = jnp.mean(z, axis=-1, keepdims=True)
    var = jnp.mean((z - mean) ** 2, axis=-1, keepdims=True)
    return (z - mean) * jax.lax.rsqrt(var + 1e-5) * g + b


def reference_forward(tokens, enc_op, key_pad_mask, params):
    m = params['master']
    B, S = tokens.shape
    x = params['word_emb'][tokens] + params['pos_emb'][jnp.arange(S)][None, :, :]
    mask_add = jnp.where(key_pad_mask, -1e9, 0.0).astype(jnp.float32)[:, None, :]
    for blk in range(N_BLOCKS):
        x = _add_ln_ref(x, _mha_ref(x, x, x, m, 'm_', blk, mask_add),
                        m['ln1_g'][blk], m['ln1_b'][blk])
        x = _add_ln_ref(x, _mha_ref(enc_op, enc_op, x, m, 'c_', blk, None),
                        m['ln2_g'][blk], m['ln2_b'][blk])
        y = (x @ m['fc1_w'][blk] + m['fc1_b'][blk]) @ m['fc2_w'][blk] + m['fc2_b'][blk]
        x = _add_ln_ref(x, y, m['ln3_g'][blk], m['ln3_b'][blk])
    logits = x @ m['out_w'] + m['out_b']
    return jax.nn.softmax(logits, axis=-1)


# =================================== main ====================================

if __name__ == "__main__":
    key = jax.random.PRNGKey(0)
    k_params, k_tok, k_enc = jax.random.split(key, 3)

    params = init_params(k_params)
    tokens = jax.random.randint(k_tok, (BATCH, SEQ), 0, VOCAB, dtype=jnp.int32)
    enc_op = jax.random.normal(k_enc, (BATCH, SEQ, D_MODEL), jnp.float32)
    # key_padding_mask: True = ignore that key position (pad last 2 positions)
    key_pad_mask = jnp.broadcast_to(jnp.arange(SEQ)[None, :] >= (SEQ - 2), (BATCH, SEQ))

    out = decoder_forward(tokens, enc_op, key_pad_mask, params)
    out = jax.block_until_ready(out)

    ref = reference_forward(tokens, enc_op, key_pad_mask, params)
    assert out.shape == (BATCH, SEQ, VOCAB), out.shape
    max_err = float(jnp.max(jnp.abs(out - ref)))
    # bf16 matmul operands (f32 accumulation) + precomposed FFN vs. f32 reference
    assert jnp.allclose(out, ref, rtol=2e-2, atol=2e-3), f"max abs err {max_err}"

    print("KERNEL_OK")
</pallas_src>

<mosaic_0001>
module attributes {stable_mosaic.version = 11 : i64} {
  func.func @_decoder_kernel(%arg0: i32, %arg1: memref<16x256xf32, #tpu.memory_space<vmem>>, %arg2: memref<16x256xbf16, #tpu.memory_space<vmem>>, %arg3: memref<4x8xf32, #tpu.memory_space<vmem>>, %arg4: memref<1x9x256x256xbf16, #tpu.memory_space<vmem>>, %arg5: memref<1x16x256xf32, #tpu.memory_space<vmem>>, %arg6: memref<256x128xbf16, #tpu.memory_space<vmem>>, %arg7: memref<1x128xf32, #tpu.memory_space<vmem>>, %arg8: memref<16x128xf32, #tpu.memory_space<vmem>>, %arg9: memref<16x256xf32, #tpu.memory_space<vmem>>) attributes {dimension_semantics = [#tpu.dimension_semantics<arbitrary>], iteration_bounds = array<i64: 2>, scalar_prefetch = 0 : i64, scratch_operands = 1 : i64, tpu.core_type = #tpu.core_type<tc>, window_params = [{pipeline_mode = #tpu.pipeline_mode<synchronous>, transform_indices = @transform_0, window_bounds = array<i64: 16, 256>}, {pipeline_mode = #tpu.pipeline_mode<synchronous>, transform_indices = @transform_1, window_bounds = array<i64: 16, 256>}, {pipeline_mode = #tpu.pipeline_mode<synchronous>, transform_indices = @transform_2, window_bounds = array<i64: 4, 8>}, {transform_indices = @transform_3, window_bounds = array<i64: 1, 9, 256, 256>}, {transform_indices = @transform_4, window_bounds = array<i64: 1, 16, 256>}, {pipeline_mode = #tpu.pipeline_mode<synchronous>, transform_indices = @transform_5, window_bounds = array<i64: 256, 128>}, {pipeline_mode = #tpu.pipeline_mode<synchronous>, transform_indices = @transform_6, window_bounds = array<i64: 1, 128>}, {pipeline_mode = #tpu.pipeline_mode<synchronous>, transform_indices = @transform_7, window_bounds = array<i64: 16, 128>}]} {
    %c0_i32 = arith.constant 0 : i32
    %0 = arith.cmpi eq, %arg0, %c0_i32 : i32
    %1 = arith.extui %0 : i1 to i32
    %c0_i32_0 = arith.constant 0 : i32
    %2 = arith.cmpi ne, %1, %c0_i32_0 : i32
    scf.if %2 {
      %c0_71 = arith.constant 0 : index
      %c0_72 = arith.constant 0 : index
      %207 = vector.load %arg1[%c0_71, %c0_72] : memref<16x256xf32, #tpu.memory_space<vmem>>, vector<16x256xf32>
      %c0_73 = arith.constant 0 : index
      %c0_74 = arith.constant 0 : index
      %208 = vector.load %arg9[%c0_73, %c0_74] : memref<16x256xf32, #tpu.memory_space<vmem>>, vector<16x256xf32>
      tpu.vector_store %arg9[%c0_73, %c0_74], %207 {strides = array<i32>} : memref<16x256xf32, #tpu.memory_space<vmem>>, vector<16x256xf32>,
    } else {
    }
    %c0 = arith.constant 0 : index
    %c0_1 = arith.constant 0 : index
    %3 = vector.load %arg9[%c0, %c0_1] : memref<16x256xf32, #tpu.memory_space<vmem>>, vector<16x256xf32>
    %c0_2 = arith.constant 0 : index
    %c0_3 = arith.constant 0 : index
    %4 = vector.load %arg2[%c0_2, %c0_3] : memref<16x256xbf16, #tpu.memory_space<vmem>>, vector<16x256xbf16>
    %c0_4 = arith.constant 0 : index
    %c0_5 = arith.constant 0 : index
    %5 = vector.load %arg3[%c0_4, %c0_5] : memref<4x8xf32, #tpu.memory_space<vmem>>, vector<4x8xf32>
    %c0_6 = arith.constant 0 : index
    %c0_7 = arith.constant 0 : index
    %c0_8 = arith.constant 0 : index
    %6 = vector.load %arg5[%c0_6, %c0_7, %c0_8] : memref<1x16x256xf32, #tpu.memory_space<vmem>>, vector<1x16x256xf32>
    %7 = vector.shape_cast %6 : vector<1x16x256xf32> to vector<16x256xf32>
    %8 = arith.truncf %3 : vector<16x256xf32> to vector<16x256xbf16>
    %c0_9 = arith.constant 0 : index
    %c0_10 = arith.constant 0 : index
    %c0_11 = arith.constant 0 : index
    %c0_12 = arith.constant 0 : index
    %9 = vector.load %arg4[%c0_9, %c0_10, %c0_11, %c0_12] : memref<1x9x256x256xbf16, #tpu.memory_space<vmem>>, vector<1x1x256x256xbf16>
    %10 = vector.shape_cast %9 : vector<1x1x256x256xbf16> to vector<256x256xbf16>
    %cst = arith.constant dense<0.000000e+00> : vector<16x256xf32>
    %11 = tpu.matmul %8, %10, %cst {dimension_numbers = #tpu.dot_dimension_numbers<[1], [0], [0], [1], [0, 0, 1, 1], [], []>} : vector<16x256xbf16>, vector<256x256xbf16>, vector<16x256xf32> -> vector<16x256xf32>
    %12 = vector.extract_strided_slice %7 {offsets = [0, 0], sizes = [1, 256], strides = [1, 1]} : vector<16x256xf32> to vector<1x256xf32>
    %13 = vector.broadcast %12 : vector<1x256xf32> to vector<16x256xf32>
    %14 = arith.addf %11, %13 : vector<16x256xf32>
    %c0_13 = arith.constant 0 : index
    %c1 = arith.constant 1 : index
    %c0_14 = arith.constant 0 : index
    %c0_15 = arith.constant 0 : index
    %15 = vector.load %arg4[%c0_13, %c1, %c0_14, %c0_15] : memref<1x9x256x256xbf16, #tpu.memory_space<vmem>>, vector<1x1x256x256xbf16>
    %16 = vector.shape_cast %15 : vector<1x1x256x256xbf16> to vector<256x256xbf16>
    %cst_16 = arith.constant dense<0.000000e+00> : vector<16x256xf32>
    %17 = tpu.matmul %8, %16, %cst_16 {dimension_numbers = #tpu.dot_dimension_numbers<[1], [0], [0], [1], [0, 0, 1, 1], [], []>} : vector<16x256xbf16>, vector<256x256xbf16>, vector<16x256xf32> -> vector<16x256xf32>
    %18 = vector.extract_strided_slice %7 {offsets = [1, 0], sizes = [1, 256], strides = [1, 1]} : vector<16x256xf32> to vector<1x256xf32>
    %19 = vector.broadcast %18 : vector<1x256xf32> to vector<16x256xf32>
    %20 = arith.addf %17, %19 : vector<16x256xf32>
    %c0_17 = arith.constant 0 : index
    %c2 = arith.constant 2 : index
    %c0_18 = arith.constant 0 : index
    %c0_19 = arith.constant 0 : index
    %21 = vector.load %arg4[%c0_17, %c2, %c0_18, %c0_19] : memref<1x9x256x256xbf16, #tpu.memory_space<vmem>>, vector<1x1x256x256xbf16>
    %22 = vector.shape_cast %21 : vector<1x1x256x256xbf16> to vector<256x256xbf16>
    %cst_20 = arith.constant dense<0.000000e+00> : vector<16x256xf32>
    %23 = tpu.matmul %8, %22, %cst_20 {dimension_numbers = #tpu.dot_dimension_numbers<[1], [0], [0], [1], [0, 0, 1, 1], [], []>} : vector<16x256xbf16>, vector<256x256xbf16>, vector<16x256xf32> -> vector<16x256xf32>
    %24 = vector.extract_strided_slice %7 {offsets = [2, 0], sizes = [1, 256], strides = [1, 1]} : vector<16x256xf32> to vector<1x256xf32>
    %25 = vector.broadcast %24 : vector<1x256xf32> to vector<16x256xf32>
    %26 = arith.addf %23, %25 : vector<16x256xf32>
    %27 = vector.extract_strided_slice %14 {offsets = [0, 0], sizes = [16, 128], strides = [1, 1]} : vector<16x256xf32> to vector<16x128xf32>
    %28 = vector.extract_strided_slice %14 {offsets = [0, 128], sizes = [16, 128], strides = [1, 1]} : vector<16x256xf32> to vector<16x128xf32>
    %29 = tpu.concatenate %27, %28 in 0 : vector<16x128xf32>, vector<16x128xf32> -> vector<32x128xf32>
    %30 = vector.shape_cast %29 : vector<32x128xf32> to vector<4x8x128xf32>
    %31 = arith.truncf %30 : vector<4x8x128xf32> to vector<4x8x128xbf16>
    %32 = vector.extract_strided_slice %20 {offsets = [0, 0], sizes = [16, 128], strides = [1, 1]} : vector<16x256xf32> to vector<16x128xf32>
    %33 = vector.extract_strided_slice %20 {offsets = [0, 128], sizes = [16, 128], strides = [1, 1]} : vector<16x256xf32> to vector<16x128xf32>
    %34 = tpu.concatenate %32, %33 in 0 : vector<16x128xf32>, vector<16x128xf32> -> vector<32x128xf32>
    %35 = vector.shape_cast %34 : vector<32x128xf32> to vector<4x8x128xf32>
    %36 = arith.truncf %35 : vector<4x8x128xf32> to vector<4x8x128xbf16>
    %37 = vector.extract_strided_slice %26 {offsets = [0, 0], sizes = [16, 128], strides = [1, 1]} : vector<16x256xf32> to vector<16x128xf32>
    %38 = vector.extract_strided_slice %26 {offsets = [0, 128], sizes = [16, 128], strides = [1, 1]} : vector<16x256xf32> to vector<16x128xf32>
    %39 = tpu.concatenate %37, %38 in 0 : vector<16x128xf32>, vector<16x128xf32> -> vector<32x128xf32>
    %40 = vector.shape_cast %39 : vector<32x128xf32> to vector<4x8x128xf32>
    %41 = arith.truncf %40 : vector<4x8x128xf32> to vector<4x8x128xbf16>
    "tpu.trace_start"() <{level = 10 : i32, message = "gqd,gkd->gqk"}> : () -> ()
    %cst_21 = arith.constant dense<0.000000e+00> : vector<4x8x8xf32>
    %42 = tpu.matmul %31, %36, %cst_21 {dimension_numbers = #tpu.dot_dimension_numbers<[2], [2], [1], [1], [0, 0, 0, 1, 1, 1], [0], [0]>} : vector<4x8x128xbf16>, vector<4x8x128xbf16>, vector<4x8x8xf32> -> vector<4x8x8xf32>
    "tpu.trace_stop"() : () -> ()
    %43 = vector.shape_cast %5 : vector<4x8xf32> to vector<4x1x8xf32>
    %44 = vector.broadcast %43 : vector<4x1x8xf32> to vector<4x8x8xf32>
    %45 = arith.addf %42, %44 : vector<4x8x8xf32>
    %cst_22 = arith.constant dense<0xFF800000> : vector<4x8xf32>
    %46 = vector.multi_reduction <maximumf>, %45, %cst_22 [2] : vector<4x8x8xf32> to vector<4x8xf32>
    %47 = vector.shape_cast %46 : vector<4x8xf32> to vector<4x8x1xf32>
    %48 = vector.broadcast %47 : vector<4x8x1xf32> to vector<4x8x8xf32>
    %49 = arith.subf %45, %48 : vector<4x8x8xf32>
    %50 = math.exp %49 : vector<4x8x8xf32>
    %cst_23 = arith.constant dense<0.000000e+00> : vector<4x8xf32>
    %51 = vector.multi_reduction <add>, %50, %cst_23 [2] : vector<4x8x8xf32> to vector<4x8xf32>
    %52 = vector.shape_cast %51 : vector<4x8xf32> to vector<4x8x1xf32>
    %53 = tpu.reciprocal %52 {approx = true} : vector<4x8x1xf32> -> vector<4x8x1xf32>
    %54 = vector.broadcast %53 : vector<4x8x1xf32> to vector<4x8x8xf32>
    %55 = arith.mulf %50, %54 : vector<4x8x8xf32>
    %56 = arith.truncf %55 : vector<4x8x8xf32> to vector<4x8x8xbf16>
    "tpu.trace_start"() <{level = 10 : i32, message = "gqk,gkd->gqd"}> : () -> ()
    %cst_24 = arith.constant dense<0.000000e+00> : vector<4x8x128xf32>
    %57 = tpu.matmul %56, %41, %cst_24 {dimension_numbers = #tpu.dot_dimension_numbers<[2], [1], [1], [2], [0, 0, 0, 1, 1, 2], [0], [0]>} : vector<4x8x8xbf16>, vector<4x8x128xbf16>, vector<4x8x128xf32> -> vector<4x8x128xf32>
    "tpu.trace_stop"() : () -> ()
    %58 = vector.shape_cast %57 : vector<4x8x128xf32> to vector<32x128xf32>
    %59 = vector.extract_strided_slice %58 {offsets = [0, 0], sizes = [16, 128], strides = [1, 1]} : vector<32x128xf32> to vector<16x128xf32>
    %60 = vector.extract_strided_slice %58 {offsets = [16, 0], sizes = [16, 128], strides = [1, 1]} : vector<32x128xf32> to vector<16x128xf32>
    %61 = tpu.concatenate %59, %60 in 1 : vector<16x128xf32>, vector<16x128xf32> -> vector<16x256xf32>
    %62 = arith.truncf %61 : vector<16x256xf32> to vector<16x256xbf16>
    %c0_25 = arith.constant 0 : index
    %c3 = arith.constant 3 : index
    %c0_26 = arith.constant 0 : index
    %c0_27 = arith.constant 0 : index
    %63 = vector.load %arg4[%c0_25, %c3, %c0_26, %c0_27] : memref<1x9x256x256xbf16, #tpu.memory_space<vmem>>, vector<1x1x256x256xbf16>
    %64 = vector.shape_cast %63 : vector<1x1x256x256xbf16> to vector<256x256xbf16>
    %cst_28 = arith.constant dense<0.000000e+00> : vector<16x256xf32>
    %65 = tpu.matmul %62, %64, %cst_28 {dimension_numbers = #tpu.dot_dimension_numbers<[1], [0], [0], [1], [0, 0, 1, 1], [], []>} : vector<16x256xbf16>, vector<256x256xbf16>, vector<16x256xf32> -> vector<16x256xf32>
    %66 = vector.extract_strided_slice %7 {offsets = [3, 0], sizes = [1, 256], strides = [1, 1]} : vector<16x256xf32> to vector<1x256xf32>
    %67 = vector.broadcast %66 : vector<1x256xf32> to vector<16x256xf32>
    %68 = arith.addf %65, %67 : vector<16x256xf32>
    %69 = arith.addf %3, %68 : vector<16x256xf32>
    %cst_29 = arith.constant dense<0.000000e+00> : vector<16xf32>
    %70 = vector.multi_reduction <add>, %69, %cst_29 [1] : vector<16x256xf32> to vector<16xf32>
    %71 = vector.shape_cast %70 : vector<16xf32> to vector<16x1xf32>
    %cst_30 = arith.constant 2.560000e+02 : f32
    %72 = vector.broadcast %cst_30 : f32 to vector<16x1xf32>
    %73 = arith.divf %71, %72 : vector<16x1xf32>
    %74 = vector.broadcast %73 : vector<16x1xf32> to vector<16x256xf32>
    %75 = arith.subf %69, %74 : vector<16x256xf32>
    %76 = arith.mulf %75, %75 : vector<16x256xf32>
    %cst_31 = arith.constant dense<0.000000e+00> : vector<16xf32>
    %77 = vector.multi_reduction <add>, %76, %cst_31 [1] : vector<16x256xf32> to vector<16xf32>
    %78 = vector.shape_cast %77 : vector<16xf32> to vector<16x1xf32>
    %cst_32 = arith.constant 2.560000e+02 : f32
    %79 = vector.broadcast %cst_32 : f32 to vector<16x1xf32>
    %80 = arith.divf %78, %79 : vector<16x1xf32>
    %cst_33 = arith.constant 9.99999974E-6 : f32
    %81 = vector.broadcast %cst_33 : f32 to vector<16x1xf32>
    %82 = arith.addf %80, %81 : vector<16x1xf32>
    %83 = math.rsqrt %82 : vector<16x1xf32>
    %84 = vector.broadcast %83 : vector<16x1xf32> to vector<16x256xf32>
    %85 = arith.mulf %75, %84 : vector<16x256xf32>
    %86 = vector.extract_strided_slice %7 {offsets = [9, 0], sizes = [1, 256], strides = [1, 1]} : vector<16x256xf32> to vector<1x256xf32>
    %87 = vector.broadcast %86 : vector<1x256xf32> to vector<16x256xf32>
    %88 = arith.mulf %85, %87 : vector<16x256xf32>
    %89 = vector.extract_strided_slice %7 {offsets = [10, 0], sizes = [1, 256], strides = [1, 1]} : vector<16x256xf32> to vector<1x256xf32>
    %90 = vector.broadcast %89 : vector<1x256xf32> to vector<16x256xf32>
    %91 = arith.addf %88, %90 : vector<16x256xf32>
    %92 = arith.truncf %91 : vector<16x256xf32> to vector<16x256xbf16>
    %c0_34 = arith.constant 0 : index
    %c4 = arith.constant 4 : index
    %c0_35 = arith.constant 0 : index
    %c0_36 = arith.constant 0 : index
    %93 = vector.load %arg4[%c0_34, %c4, %c0_35, %c0_36] : memref<1x9x256x256xbf16, #tpu.memory_space<vmem>>, vector<1x1x256x256xbf16>
    %94 = vector.shape_cast %93 : vector<1x1x256x256xbf16> to vector<256x256xbf16>
    %cst_37 = arith.constant dense<0.000000e+00> : vector<16x256xf32>
    %95 = tpu.matmul %4, %94, %cst_37 {dimension_numbers = #tpu.dot_dimension_numbers<[1], [0], [0], [1], [0, 0, 1, 1], [], []>} : vector<16x256xbf16>, vector<256x256xbf16>, vector<16x256xf32> -> vector<16x256xf32>
    %96 = vector.extract_strided_slice %7 {offsets = [4, 0], sizes = [1, 256], strides = [1, 1]} : vector<16x256xf32> to vector<1x256xf32>
    %97 = vector.broadcast %96 : vector<1x256xf32> to vector<16x256xf32>
    %98 = arith.addf %95, %97 : vector<16x256xf32>
    %c0_38 = arith.constant 0 : index
    %c5 = arith.constant 5 : index
    %c0_39 = arith.constant 0 : index
    %c0_40 = arith.constant 0 : index
    %99 = vector.load %arg4[%c0_38, %c5, %c0_39, %c0_40] : memref<1x9x256x256xbf16, #tpu.memory_space<vmem>>, vector<1x1x256x256xbf16>
    %100 = vector.shape_cast %99 : vector<1x1x256x256xbf16> to vector<256x256xbf16>
    %cst_41 = arith.constant dense<0.000000e+00> : vector<16x256xf32>
    %101 = tpu.matmul %4, %100, %cst_41 {dimension_numbers = #tpu.dot_dimension_numbers<[1], [0], [0], [1], [0, 0, 1, 1], [], []>} : vector<16x256xbf16>, vector<256x256xbf16>, vector<16x256xf32> -> vector<16x256xf32>
    %102 = vector.extract_strided_slice %7 {offsets = [5, 0], sizes = [1, 256], strides = [1, 1]} : vector<16x256xf32> to vector<1x256xf32>
    %103 = vector.broadcast %102 : vector<1x256xf32> to vector<16x256xf32>
    %104 = arith.addf %101, %103 : vector<16x256xf32>
    %c0_42 = arith.constant 0 : index
    %c6 = arith.constant 6 : index
    %c0_43 = arith.constant 0 : index
    %c0_44 = arith.constant 0 : index
    %105 = vector.load %arg4[%c0_42, %c6, %c0_43, %c0_44] : memref<1x9x256x256xbf16, #tpu.memory_space<vmem>>, vector<1x1x256x256xbf16>
    %106 = vector.shape_cast %105 : vector<1x1x256x256xbf16> to vector<256x256xbf16>
    %cst_45 = arith.constant dense<0.000000e+00> : vector<16x256xf32>
    %107 = tpu.matmul %92, %106, %cst_45 {dimension_numbers = #tpu.dot_dimension_numbers<[1], [0], [0], [1], [0, 0, 1, 1], [], []>} : vector<16x256xbf16>, vector<256x256xbf16>, vector<16x256xf32> -> vector<16x256xf32>
    %108 = vector.extract_strided_slice %7 {offsets = [6, 0], sizes = [1, 256], strides = [1, 1]} : vector<16x256xf32> to vector<1x256xf32>
    %109 = vector.broadcast %108 : vector<1x256xf32> to vector<16x256xf32>
    %110 = arith.addf %107, %109 : vector<16x256xf32>
    %111 = vector.extract_strided_slice %98 {offsets = [0, 0], sizes = [16, 128], strides = [1, 1]} : vector<16x256xf32> to vector<16x128xf32>
    %112 = vector.extract_strided_slice %98 {offsets = [0, 128], sizes = [16, 128], strides = [1, 1]} : vector<16x256xf32> to vector<16x128xf32>
    %113 = tpu.concatenate %111, %112 in 0 : vector<16x128xf32>, vector<16x128xf32> -> vector<32x128xf32>
    %114 = vector.shape_cast %113 : vector<32x128xf32> to vector<4x8x128xf32>
    %115 = arith.truncf %114 : vector<4x8x128xf32> to vector<4x8x128xbf16>
    %116 = vector.extract_strided_slice %104 {offsets = [0, 0], sizes = [16, 128], strides = [1, 1]} : vector<16x256xf32> to vector<16x128xf32>
    %117 = vector.extract_strided_slice %104 {offsets = [0, 128], sizes = [16, 128], strides = [1, 1]} : vector<16x256xf32> to vector<16x128xf32>
    %118 = tpu.concatenate %116, %117 in 0 : vector<16x128xf32>, vector<16x128xf32> -> vector<32x128xf32>
    %119 = vector.shape_cast %118 : vector<32x128xf32> to vector<4x8x128xf32>
    %120 = arith.truncf %119 : vector<4x8x128xf32> to vector<4x8x128xbf16>
    %121 = vector.extract_strided_slice %110 {offsets = [0, 0], sizes = [16, 128], strides = [1, 1]} : vector<16x256xf32> to vector<16x128xf32>
    %122 = vector.extract_strided_slice %110 {offsets = [0, 128], sizes = [16, 128], strides = [1, 1]} : vector<16x256xf32> to vector<16x128xf32>
    %123 = tpu.concatenate %121, %122 in 0 : vector<16x128xf32>, vector<16x128xf32> -> vector<32x128xf32>
    %124 = vector.shape_cast %123 : vector<32x128xf32> to vector<4x8x128xf32>
    %125 = arith.truncf %124 : vector<4x8x128xf32> to vector<4x8x128xbf16>
    "tpu.trace_start"() <{level = 10 : i32, message = "gqd,gkd->gqk"}> : () -> ()
    %cst_46 = arith.constant dense<0.000000e+00> : vector<4x8x8xf32>
    %126 = tpu.matmul %115, %120, %cst_46 {dimension_numbers = #tpu.dot_dimension_numbers<[2], [2], [1], [1], [0, 0, 0, 1, 1, 1], [0], [0]>} : vector<4x8x128xbf16>, vector<4x8x128xbf16>, vector<4x8x8xf32> -> vector<4x8x8xf32>
    "tpu.trace_stop"() : () -> ()
    %cst_47 = arith.constant dense<0xFF800000> : vector<4x8xf32>
    %127 = vector.multi_reduction <maximumf>, %126, %cst_47 [2] : vector<4x8x8xf32> to vector<4x8xf32>
    %128 = vector.shape_cast %127 : vector<4x8xf32> to vector<4x8x1xf32>
    %129 = vector.broadcast %128 : vector<4x8x1xf32> to vector<4x8x8xf32>
    %130 = arith.subf %126, %129 : vector<4x8x8xf32>
    %131 = math.exp %130 : vector<4x8x8xf32>
    %cst_48 = arith.constant dense<0.000000e+00> : vector<4x8xf32>
    %132 = vector.multi_reduction <add>, %131, %cst_48 [2] : vector<4x8x8xf32> to vector<4x8xf32>
    %133 = vector.shape_cast %132 : vector<4x8xf32> to vector<4x8x1xf32>
    %134 = tpu.reciprocal %133 {approx = true} : vector<4x8x1xf32> -> vector<4x8x1xf32>
    %135 = vector.broadcast %134 : vector<4x8x1xf32> to vector<4x8x8xf32>
    %136 = arith.mulf %131, %135 : vector<4x8x8xf32>
    %137 = arith.truncf %136 : vector<4x8x8xf32> to vector<4x8x8xbf16>
    "tpu.trace_start"() <{level = 10 : i32, message = "gqk,gkd->gqd"}> : () -> ()
    %cst_49 = arith.constant dense<0.000000e+00> : vector<4x8x128xf32>
    %138 = tpu.matmul %137, %125, %cst_49 {dimension_numbers = #tpu.dot_dimension_numbers<[2], [1], [1], [2], [0, 0, 0, 1, 1, 2], [0], [0]>} : vector<4x8x8xbf16>, vector<4x8x128xbf16>, vector<4x8x128xf32> -> vector<4x8x128xf32>
    "tpu.trace_stop"() : () -> ()
    %139 = vector.shape_cast %138 : vector<4x8x128xf32> to vector<32x128xf32>
    %140 = vector.extract_strided_slice %139 {offsets = [0, 0], sizes = [16, 128], strides = [1, 1]} : vector<32x128xf32> to vector<16x128xf32>
    %141 = vector.extract_strided_slice %139 {offsets = [16, 0], sizes = [16, 128], strides = [1, 1]} : vector<32x128xf32> to vector<16x128xf32>
    %142 = tpu.concatenate %140, %141 in 1 : vector<16x128xf32>, vector<16x128xf32> -> vector<16x256xf32>
    %143 = arith.truncf %142 : vector<16x256xf32> to vector<16x256xbf16>
    %c0_50 = arith.constant 0 : index
    %c7 = arith.constant 7 : index
    %c0_51 = arith.constant 0 : index
    %c0_52 = arith.constant 0 : index
    %144 = vector.load %arg4[%c0_50, %c7, %c0_51, %c0_52] : memref<1x9x256x256xbf16, #tpu.memory_space<vmem>>, vector<1x1x256x256xbf16>
    %145 = vector.shape_cast %144 : vector<1x1x256x256xbf16> to vector<256x256xbf16>
    %cst_53 = arith.constant dense<0.000000e+00> : vector<16x256xf32>
    %146 = tpu.matmul %143, %145, %cst_53 {dimension_numbers = #tpu.dot_dimension_numbers<[1], [0], [0], [1], [0, 0, 1, 1], [], []>} : vector<16x256xbf16>, vector<256x256xbf16>, vector<16x256xf32> -> vector<16x256xf32>
    %147 = vector.extract_strided_slice %7 {offsets = [7, 0], sizes = [1, 256], strides = [1, 1]} : vector<16x256xf32> to vector<1x256xf32>
    %148 = vector.broadcast %147 : vector<1x256xf32> to vector<16x256xf32>
    %149 = arith.addf %146, %148 : vector<16x256xf32>
    %150 = arith.addf %91, %149 : vector<16x256xf32>
    %cst_54 = arith.constant dense<0.000000e+00> : vector<16xf32>
    %151 = vector.multi_reduction <add>, %150, %cst_54 [1] : vector<16x256xf32> to vector<16xf32>
    %152 = vector.shape_cast %151 : vector<16xf32> to vector<16x1xf32>
    %cst_55 = arith.constant 2.560000e+02 : f32
    %153 = vector.broadcast %cst_55 : f32 to vector<16x1xf32>
    %154 = arith.divf %152, %153 : vector<16x1xf32>
    %155 = vector.broadcast %154 : vector<16x1xf32> to vector<16x256xf32>
    %156 = arith.subf %150, %155 : vector<16x256xf32>
    %157 = arith.mulf %156, %156 : vector<16x256xf32>
    %cst_56 = arith.constant dense<0.000000e+00> : vector<16xf32>
    %158 = vector.multi_reduction <add>, %157, %cst_56 [1] : vector<16x256xf32> to vector<16xf32>
    %159 = vector.shape_cast %158 : vector<16xf32> to vector<16x1xf32>
    %cst_57 = arith.constant 2.560000e+02 : f32
    %160 = vector.broadcast %cst_57 : f32 to vector<16x1xf32>
    %161 = arith.divf %159, %160 : vector<16x1xf32>
    %cst_58 = arith.constant 9.99999974E-6 : f32
    %162 = vector.broadcast %cst_58 : f32 to vector<16x1xf32>
    %163 = arith.addf %161, %162 : vector<16x1xf32>
    %164 = math.rsqrt %163 : vector<16x1xf32>
    %165 = vector.broadcast %164 : vector<16x1xf32> to vector<16x256xf32>
    %166 = arith.mulf %156, %165 : vector<16x256xf32>
    %167 = vector.extract_strided_slice %7 {offsets = [11, 0], sizes = [1, 256], strides = [1, 1]} : vector<16x256xf32> to vector<1x256xf32>
    %168 = vector.broadcast %167 : vector<1x256xf32> to vector<16x256xf32>
    %169 = arith.mulf %166, %168 : vector<16x256xf32>
    %170 = vector.extract_strided_slice %7 {offsets = [12, 0], sizes = [1, 256], strides = [1, 1]} : vector<16x256xf32> to vector<1x256xf32>
    %171 = vector.broadcast %170 : vector<1x256xf32> to vector<16x256xf32>
    %172 = arith.addf %169, %171 : vector<16x256xf32>
    %173 = arith.truncf %172 : vector<16x256xf32> to vector<16x256xbf16>
    %c0_59 = arith.constant 0 : index
    %c8 = arith.constant 8 : index
    %c0_60 = arith.constant 0 : index
    %c0_61 = arith.constant 0 : index
    %174 = vector.load %arg4[%c0_59, %c8, %c0_60, %c0_61] : memref<1x9x256x256xbf16, #tpu.memory_space<vmem>>, vector<1x1x256x256xbf16>
    %175 = vector.shape_cast %174 : vector<1x1x256x256xbf16> to vector<256x256xbf16>
    %cst_62 = arith.constant dense<0.000000e+00> : vector<16x256xf32>
    %176 = tpu.matmul %173, %175, %cst_62 {dimension_numbers = #tpu.dot_dimension_numbers<[1], [0], [0], [1], [0, 0, 1, 1], [], []>} : vector<16x256xbf16>, vector<256x256xbf16>, vector<16x256xf32> -> vector<16x256xf32>
    %177 = vector.extract_strided_slice %7 {offsets = [8, 0], sizes = [1, 256], strides = [1, 1]} : vector<16x256xf32> to vector<1x256xf32>
    %178 = vector.broadcast %177 : vector<1x256xf32> to vector<16x256xf32>
    %179 = arith.addf %176, %178 : vector<16x256xf32>
    %180 = arith.addf %172, %179 : vector<16x256xf32>
    %cst_63 = arith.constant dense<0.000000e+00> : vector<16xf32>
    %181 = vector.multi_reduction <add>, %180, %cst_63 [1] : vector<16x256xf32> to vector<16xf32>
    %182 = vector.shape_cast %181 : vector<16xf32> to vector<16x1xf32>
    %cst_64 = arith.constant 2.560000e+02 : f32
    %183 = vector.broadcast %cst_64 : f32 to vector<16x1xf32>
    %184 = arith.divf %182, %183 : vector<16x1xf32>
    %185 = vector.broadcast %184 : vector<16x1xf32> to vector<16x256xf32>
    %186 = arith.subf %180, %185 : vector<16x256xf32>
    %187 = arith.mulf %186, %186 : vector<16x256xf32>
    %cst_65 = arith.constant dense<0.000000e+00> : vector<16xf32>
    %188 = vector.multi_reduction <add>, %187, %cst_65 [1] : vector<16x256xf32> to vector<16xf32>
    %189 = vector.shape_cast %188 : vector<16xf32> to vector<16x1xf32>
    %cst_66 = arith.constant 2.560000e+02 : f32
    %190 = vector.broadcast %cst_66 : f32 to vector<16x1xf32>
    %191 = arith.divf %189, %190 : vector<16x1xf32>
    %cst_67 = arith.constant 9.99999974E-6 : f32
    %192 = vector.broadcast %cst_67 : f32 to vector<16x1xf32>
    %193 = arith.addf %191, %192 : vector<16x1xf32>
    %194 = math.rsqrt %193 : vector<16x1xf32>
    %195 = vector.broadcast %194 : vector<16x1xf32> to vector<16x256xf32>
    %196 = arith.mulf %186, %195 : vector<16x256xf32>
    %197 = vector.extract_strided_slice %7 {offsets = [13, 0], sizes = [1, 256], strides = [1, 1]} : vector<16x256xf32> to vector<1x256xf32>
    %198 = vector.broadcast %197 : vector<1x256xf32> to vector<16x256xf32>
    %199 = arith.mulf %196, %198 : vector<16x256xf32>
    %200 = vector.extract_strided_slice %7 {offsets = [14, 0], sizes = [1, 256], strides = [1, 1]} : vector<16x256xf32> to vector<1x256xf32>
    %201 = vector.broadcast %200 : vector<1x256xf32> to vector<16x256xf32>
    %202 = arith.addf %199, %201 : vector<16x256xf32>
    %c0_68 = arith.constant 0 : index
    %c0_69 = arith.constant 0 : index
    %203 = vector.load %arg9[%c0_68, %c0_69] : memref<16x256xf32, #tpu.memory_space<vmem>>, vector<16x256xf32>
    tpu.vector_store %arg9[%c0_68, %c0_69], %202 {strides = array<i32>} : memref<16x256xf32, #tpu.memory_space<vmem>>, vector<16x256xf32>,
    %c1_i32 = arith.constant 1 : i32
    %204 = arith.cmpi eq, %arg0, %c1_i32 : i32
    %205 = arith.extui %204 : i1 to i32
    %c0_i32_70 = arith.constant 0 : i32
    %206 = arith.cmpi ne, %205, %c0_i32_70 : i32
    scf.if %206 {
      %207 = arith.truncf %202 : vector<16x256xf32> to vector<16x256xbf16>
      %c0_71 = arith.constant 0 : index
      %c0_72 = arith.constant 0 : index
      %208 = vector.load %arg6[%c0_71, %c0_72] : memref<256x128xbf16, #tpu.memory_space<vmem>>, vector<256x128xbf16>
      %cst_73 = arith.constant dense<0.000000e+00> : vector<16x128xf32>
      %209 = tpu.matmul %207, %208, %cst_73 {dimension_numbers = #tpu.dot_dimension_numbers<[1], [0], [0], [1], [0, 0, 1, 1], [], []>} : vector<16x256xbf16>, vector<256x128xbf16>, vector<16x128xf32> -> vector<16x128xf32>
      %c0_74 = arith.constant 0 : index
      %c0_75 = arith.constant 0 : index
      %210 = vector.load %arg7[%c0_74, %c0_75] : memref<1x128xf32, #tpu.memory_space<vmem>>, vector<1x128xf32>
      %211 = vector.broadcast %210 : vector<1x128xf32> to vector<16x128xf32>
      %212 = arith.addf %209, %211 : vector<16x128xf32>
      %cst_76 = arith.constant dense<0xFF800000> : vector<16xf32>
      %213 = vector.multi_reduction <maximumf>, %212, %cst_76 [1] : vector<16x128xf32> to vector<16xf32>
      %214 = vector.shape_cast %213 : vector<16xf32> to vector<16x1xf32>
      %215 = vector.broadcast %214 : vector<16x1xf32> to vector<16x128xf32>
      %216 = arith.subf %212, %215 : vector<16x128xf32>
      %217 = math.exp %216 : vector<16x128xf32>
      %cst_77 = arith.constant dense<0.000000e+00> : vector<16xf32>
      %218 = vector.multi_reduction <add>, %217, %cst_77 [1] : vector<16x128xf32> to vector<16xf32>
      %219 = vector.shape_cast %218 : vector<16xf32> to vector<16x1xf32>
      %220 = vector.broadcast %219 : vector<16x1xf32> to vector<16x128xf32>
      %221 = arith.divf %217, %220 : vector<16x128xf32>
      %c0_78 = arith.constant 0 : index
      %c0_79 = arith.constant 0 : index
      %222 = vector.load %arg8[%c0_78, %c0_79] : memref<16x128xf32, #tpu.memory_space<vmem>>, vector<16x128xf32>
      tpu.vector_store %arg8[%c0_78, %c0_79], %221 {strides = array<i32>} : memref<16x128xf32, #tpu.memory_space<vmem>>, vector<16x128xf32>,
    } else {
    }
    return
  }
  func.func @transform_0(%arg0: i32) -> (i32, i32) {
    %c0_i32 = arith.constant 0 : i32
    %c0_i32_0 = arith.constant 0 : i32
    %c0_i32_1 = arith.constant 0 : i32
    return %c0_i32, %c0_i32_0 : i32, i32
  }
  func.func @transform_1(%arg0: i32) -> (i32, i32) {
    %c0_i32 = arith.constant 0 : i32
    %c0_i32_0 = arith.constant 0 : i32
    %c0_i32_1 = arith.constant 0 : i32
    return %c0_i32, %c0_i32_0 : i32, i32
  }
  func.func @transform_2(%arg0: i32) -> (i32, i32) {
    %c0_i32 = arith.constant 0 : i32
    %c0_i32_0 = arith.constant 0 : i32
    %c0_i32_1 = arith.constant 0 : i32
    return %c0_i32, %c0_i32_0 : i32, i32
  }
  func.func @transform_3(%arg0: i32) -> (i32, i32, i32, i32) {
    %c0_i32 = arith.constant 0 : i32
    %c0_i32_0 = arith.constant 0 : i32
    %c0_i32_1 = arith.constant 0 : i32
    %c0_i32_2 = arith.constant 0 : i32
    return %arg0, %c0_i32, %c0_i32_0, %c0_i32_1 : i32, i32, i32, i32
  }
  func.func @transform_4(%arg0: i32) -> (i32, i32, i32) {
    %c0_i32 = arith.constant 0 : i32
    %c0_i32_0 = arith.constant 0 : i32
    %c0_i32_1 = arith.constant 0 : i32
    return %arg0, %c0_i32, %c0_i32_0 : i32, i32, i32
  }
  func.func @transform_5(%arg0: i32) -> (i32, i32) {
    %c0_i32 = arith.constant 0 : i32
    %c0_i32_0 = arith.constant 0 : i32
    %c0_i32_1 = arith.constant 0 : i32
    return %c0_i32, %c0_i32_0 : i32, i32
  }
  func.func @transform_6(%arg0: i32) -> (i32, i32) {
    %c0_i32 = arith.constant 0 : i32
    %c0_i32_0 = arith.constant 0 : i32
    %c0_i32_1 = arith.constant 0 : i32
    return %c0_i32, %c0_i32_0 : i32, i32
  }
  func.func @transform_7(%arg0: i32) -> (i32, i32) {
    %c0_i32 = arith.constant 0 : i32
    %c0_i32_0 = arith.constant 0 : i32
    %c0_i32_1 = arith.constant 0 : i32
    return %c0_i32, %c0_i32_0 : i32, i32
  }
}

</mosaic_0001>

<bundles_post_ra>
// kernel: tpu_custom_call.1
= control target key start
LH: loop header
LB: loop body
LE: loop exit
PB: predicated region body
PF: predicated region fallthrough
CT: control target
= control target key end

     0   :  { %s6511_s0 = inlined_call_operand.hbm [shape: f32[16,256], index: 0, kind: input, shape index: {}]   ;;  %s6512_s1 = inlined_call_operand.hbm [shape: bf16[16,256], index: 1, kind: input, shape index: {}]   ;;  %s6513_s2 = inlined_call_operand.hbm [shape: f32[4,8], index: 2, kind: input, shape index: {}]   ;;  %s6514_s3 = inlined_call_operand.hbm [shape: bf16[2,9,256,256], index: 3, kind: input, shape index: {}]   ;;  %s6515_s4 = inlined_call_operand.hbm [shape: f32[2,16,256], index: 4, kind: input, shape index: {}]   ;;  %s6516_s5 = inlined_call_operand.hbm [shape: bf16[256,128], index: 5, kind: input, shape index: {}]   ;;  %s6517_s6 = inlined_call_operand.hbm [shape: f32[1,128], index: 6, kind: input, shape index: {}]   ;;  %s6518_s7 = inlined_call_operand.hbm [shape: f32[16,128], index: 7, kind: output, shape index: {}]  }
   0x1   :  { %6530 = sst [smem:[#allocation21_spill]] %s6512_s1 }
   0x2   :  { %12 = vsyncpa [#allocation4], 0 }
   0x3   :  { %13 = vsyncpa [#allocation7], 0 }
   0x4   :  { %14 = vsyncpa [#allocation10], 0 }
   0x5   :  { %16 = vsyncpa [#allocation10 + $0x1], 0 }
   0x6   :  { %17 = vsyncpa [#allocation13], 0 }
   0x7   :  { %18 = vsyncpa [#allocation5], 0  ;;  %s5695_s24 = smov 0   ;;  %s5697_s25 = smov 0  }
   0x8   :  { %s5699_s26 = smov 0   ;;  %s5701_s27 = smov 0  }
   0x9 LB: > { %s5636_s28 = smov [#allocation6]   ;;  %s5716_s30 = sadd.s32 4294967295, %s5634_s27   ;;  %s5634_s27 = sphi %s5701_s27, %s6556_s27   ;;  %s5630_s26 = sphi %s5699_s26, %s6555_s26   ;;  %s5626_s25 = sphi %s5697_s25, %s6554_s25   ;;  %s5622_s24 = sphi %s5695_s24, %s6553_s24  }
   0xa   : > { %s232_s29 = sshll.u32 %s5636_s28, 4  ;;  %p4002_p0 = scmp.ge.s32.totalorder %s5634_s27, 1  ;;  %s233_s29 = int_to_ptr.vmem [resolvable:$true] %s232_s29 }
   0xb   : > { %p6521_p1 = scmp.eq.s32.totalorder %s5716_s30, 0  ;;  %p207_p2 = scmp.lt.s32.totalorder %s5634_s27, 3 }
   0xc   : > { %s5637_s9 = smov [#allocation12]   ;;  %s5385_s13 = scalar_lea.vmem %s233_s29, 256 }
   0xd   : > { %p5722_p4 = pnand %p4002_p0, %p207_p2  ;;  %s256_s10 = sshll.u32 %s5637_s9, 4  ;;  %s257_s10 = int_to_ptr.vmem [resolvable:$true] %s256_s10 }
   0xe   : > { %p5386_p8 = scmp.ne.s32.totalorder %s233_s29, %s5385_s13  ;;  %p5393_p11 = scmp.lt.s32.totalorder %s233_s29, %s233_s29 }
   0xf   : > { %s6531_s8 = scalar_select %p5722_p4, 1, 0 }
  0x10   : > { %p4780_p5 = pneg %p5722_p4  ;;  %p5394_p12 = scmp.lt.s32.totalorder %s5385_s13, %s5385_s13 }
  0x12   : > { %p5730_p6 = pnand %p4780_p5, %p6521_p1  ;;  %p5395_p13 = por %p5394_p12, %p5393_p11 }
  0x14   : > { %s6532_s11 = scalar_select %p5730_p6, 1, 0 }
  0x15   : > { %p5736_p7 = pneg %p5730_p6 }
  0x17   : > { %p5388_p9 = pnand %p5386_p8, %p5736_p7 }
  0x19   : > { %p5389_p10 = pneg %p5388_p9 }
  0x1b   : > { %p5396_p0 = pnand %p5395_p13, %p5389_p10 }
  0x1d   : > { %5399 = shalt.err (!%p5396_p0)
}
  0x1e   : > { %s6519_s14 = smov 128   ;;  %s6520_s15 = smov 8  }
  0x1f   : > { %s6534_s1 = sld [smem:[#allocation21_spill]]  ;;  %s5411_s18 = scalar_lea.vmem %s257_s10, 2048 }
  0x20   : > { %p5412_p2 = scmp.ne.s32.totalorder %s257_s10, %s5411_s18  ;;  %p5419_p9 = scmp.lt.s32.totalorder %s257_s10, %s257_s10 }
  0x21   : > { %p5420_p10 = scmp.lt.s32.totalorder %s5411_s18, %s5411_s18 }
  0x22   : > { %p5414_p5 = pnand %p5412_p2, %p5736_p7 }
  0x23   : > { %p5421_p11 = por %p5420_p10, %p5419_p9 }
  0x24   : > { %p5415_p8 = pneg %p5414_p5 }
  0x25   : > { %4786 = dma.hbm_to_vmem [thread:$0]  (!%p5730_p6), %s6534_s1, 256, %s233_s29, [#allocation7], %s6519_s14, %s6519_s14, %s6520_s15  }
  0x26   : > { %p5422_p12 = pnand %p5421_p11, %p5415_p8 }
  0x28   : > { %5425 = shalt.err (!%p5422_p12)
}
  0x29   : > { %s5640_s19 = smov 64   ;;  %s5641_s20 = smov 4  }
  0x2a   : > { %4792 = dma.hbm_to_vmem [thread:$0]  (!%p5730_p6), %s6516_s5, 2048, %s257_s10, [#allocation13], %s5640_s19, %s5640_s19, %s5641_s20  }
  0x2b   : > { %s5758_s23 = sadd.s32 1, %s5634_s27   ;;  %s94_s28 = sadd.s32 1, %s5630_s26 }
  0x2c   : > { %s91_s29 = ssub.s32 %s5634_s27, %s5758_s23  ;;  %p101_p13 = scmp.ne.s32.totalorder %s5630_s26, %s5626_s25 }
  0x2d   : > { %p92_p0 = scmp.eq.s32.totalorder %s91_s29, 0  ;;  %p102_p2 = scmp.eq.s32.totalorder %s5634_s27, 0 }
  0x2e   : > { %p107_p5 = scmp.ne.s32.totalorder %s5626_s25, %s5622_s24  ;;  %p4808_p8 = scmp.lt.s32.totalorder %s5634_s27, 2 }
  0x2f   : > { %s5770_s9 = scalar_select %p92_p0, %s5630_s26, %s94_s28  }
  0x30   : > { %p103_p9 = por %p102_p2, %p101_p13  ;;  %p5774_p10 = por %p6521_p1, %p107_p5 }
  0x31   : > { %s281_s16 = sand.u32 1, %s5634_s27   ;;  %s283_s10 = sand.u32 1, %s5630_s26  }
  0x32   : > { %s6535_s13 = scalar_select %p5774_p10, 1, 0 }
  0x33   : > { %s4749_s17 = smul.u32 2304, %s283_s10  ;;  %p5781_p11 = pnand %p4808_p8, %p103_p9 }
  0x34   : > { %s4750_s18 = smul.u32 36864, %s5634_s27  ;;  %s5785_s24 = sshll.u32 %s283_s10, 5 }
  0x35   : > { %s6536_s19 = scalar_select %p5781_p11, 1, 0 }
  0x36   : > { %s5790_s22 = scalar_lea.hbm %s6514_s3, %s4750_s18  ;;  %s285_s28 = scalar_lea.vmem [#allocation9], %s4749_s17 }
  0x37   : > { %s292_s29 = sshll.u32 %s285_s28, 4  ;;  %s5794_s14 = scalar_lea.sflag [#allocation10], %s281_s16  ;;  %s5792_s29 = int_to_ptr.vmem [resolvable:$true] %s292_s29 }
  0x38   : > { %s5426_s15 = scalar_lea.hbm %s5790_s22, 36864  ;;  %p6526_p13 = pneg %p5781_p11 }
  0x39   : > { %p5427_p12 = scmp.ne.s32.totalorder %s5790_s22, %s5426_s15  ;;  %s5431_s20 = scalar_lea.hbm %s6514_s3, 73728 }
  0x3a   : > { %p5432_p5 = scmp.lt.s32.totalorder %s5790_s22, %s6514_s3  ;;  %p5433_p8 = scmp.lt.s32.totalorder %s5431_s20, %s5426_s15 }
  0x3b   : > { %p5429_p0 = pnand %p6526_p13, %p5427_p12 }
  0x3c   : > { %p5434_p9 = por %p5433_p8, %p5432_p5 }
  0x3d   : > { %p5430_p2 = pneg %p5429_p0 }
  0x3f   : > { %p5435_p3 = pnand %p5434_p9, %p5430_p2 }
  0x41   : > { %5438 = shalt.err (!%p5435_p3)
}
  0x42   : > { %s5439_s16 = scalar_lea.vmem %s5792_s29, 36864  ;;  %s5642_s17 = smov [#allocation9]  }
  0x43   : > { %p5440_p1 = scmp.ne.s32.totalorder %s5792_s29, %s5439_s16  ;;  %s5444_s28 = sshll.u32 %s5642_s17, 4  ;;  %s5445_s28 = int_to_ptr.vmem [resolvable:$false] %s5444_s28 }
  0x44   : > { %s5446_s10 = scalar_lea.vmem %s5445_s28, 73728  ;;  %p5447_p10 = scmp.lt.s32.totalorder %s5792_s29, %s5445_s28 }
  0x45   : > { %p5442_p12 = pnand %p5440_p1, %p6526_p13  ;;  %p5448_p4 = scmp.lt.s32.totalorder %s5446_s10, %s5439_s16 }
  0x47   : > { %p5443_p0 = pneg %p5442_p12  ;;  %p5449_p6 = por %p5448_p4, %p5447_p10 }
  0x49   : > { %p5450_p5 = pnand %p5449_p6, %p5443_p0 }
  0x4b   : > { %5453 = shalt.err (!%p5450_p5)
}
  0x4c   : > { %s6537_s1 = smov 8   ;;  %s6538_s15 = smov 128  }
  0x4d   : > { %4799 = dma.hbm_to_vmem [thread:$0]  (!%p5781_p11), %s5790_s22, 36864, %s5792_s29, %s5794_s14, %s6538_s15, %s6538_s15, %s6537_s1  }
  0x4e   : > { %s5643_s18 = smov [#allocation3]  }
  0x4f   : > { %s219_s20 = sshll.u32 %s5643_s18, 4  ;;  %s220_s20 = int_to_ptr.vmem [resolvable:$true] %s219_s20 }
  0x50   : > { %s5465_s21 = scalar_lea.vmem %s220_s20, 512  ;;  %p5473_p6 = scmp.lt.s32.totalorder %s220_s20, %s220_s20 }
  0x51   : > { %p5466_p1 = scmp.ne.s32.totalorder %s220_s20, %s5465_s21  ;;  %p5474_p10 = scmp.lt.s32.totalorder %s5465_s21, %s5465_s21 }
  0x53   : > { %p5468_p3 = pnand %p5466_p1, %p5736_p7  ;;  %p5475_p2 = por %p5474_p10, %p5473_p6 }
  0x55   : > { %p5469_p4 = pneg %p5468_p3 }
  0x57   : > { %p5476_p8 = pnand %p5475_p2, %p5469_p4 }
  0x59   : > { %5479 = shalt.err (!%p5476_p8)
}
  0x5a   : > { %s6529_s16 = smov 256   ;;  %s5645_s17 = smov 16  }
  0x5b   : > { %p6539_p9 = scmp.ne.s32.totalorder %s6532_s11, 0  ;;  %s5646_s28 = smov [#allocation8]  }
  0x5c   : > { %s246_s10 = sshll.u32 %s5646_s28, 4  ;;  %s5647_s1 = smov [#allocation14]   ;;  %s247_s10 = int_to_ptr.vmem [resolvable:$true] %s246_s10 }
  0x5d   : > { %4783 = dma.hbm_to_vmem [thread:$0]  (!%p6539_p9), %s6511_s0, 512, %s220_s20, [#allocation4], %s6529_s16, %s6529_s16, %s5645_s17  }
  0x5e   : > { %s270_s15 = sshll.u32 %s5647_s1, 4  ;;  %s5491_s18 = scalar_lea.vmem %s247_s10, 64  ;;  %s271_s15 = int_to_ptr.vmem [resolvable:$true] %s270_s15 }
  0x5f   : > { %p5492_p12 = scmp.ne.s32.totalorder %s247_s10, %s5491_s18  ;;  %p5499_p1 = scmp.lt.s32.totalorder %s247_s10, %s247_s10 }
  0x60   : > { %p5500_p3 = scmp.lt.s32.totalorder %s5491_s18, %s5491_s18 }
  0x61   : > { %p5494_p0 = pnand %p5492_p12, %p5736_p7 }
  0x62   : > { %p5501_p4 = por %p5500_p3, %p5499_p1 }
  0x63   : > { %p5495_p5 = pneg %p5494_p0 }
  0x65   : > { %p5502_p6 = pnand %p5501_p4, %p5495_p5 }
  0x67   : > { %5505 = shalt.err (!%p5502_p6)
}
  0x68   : > { %4789 = dma.hbm_to_vmem [thread:$0]  (!%p6539_p9), %s6513_s2, 64, %s247_s10, [#allocation7]  }
  0x69   : > { %s5517_s22 = scalar_lea.vmem %s271_s15, 16  ;;  %s5524_s29 = scalar_lea.vmem %s271_s15, 32 }
  0x6a   : > { %p5518_p10 = scmp.ne.s32.totalorder %s271_s15, %s5517_s22  ;;  %p5525_p12 = scmp.lt.s32.totalorder %s271_s15, %s271_s15 }
  0x6b   : > { %p5526_p0 = scmp.lt.s32.totalorder %s5524_s29, %s5517_s22 }
  0x6c   : > { %p5520_p2 = pnand %p5518_p10, %p5736_p7 }
  0x6d   : > { %p5527_p13 = por %p5526_p0, %p5525_p12 }
  0x6e   : > { %p5521_p8 = pneg %p5520_p2 }
  0x70   : > { %p5528_p11 = pnand %p5527_p13, %p5521_p8 }
  0x72   : > { %5531 = shalt.err (!%p5528_p11)
}
  0x73   : > { %4795 = dma.hbm_to_vmem [thread:$0]  (!%p6539_p9), %s6517_s6, 16, %s271_s15, [#allocation13]  }
  0x74   : > { %s4598_s10 = sshll.u32 %s5634_s27, 9  ;;  %s306_s18 = scalar_lea.vmem [#allocation11], %s5785_s24 }
  0x75   : > { %s313_s12 = sshll.u32 %s306_s18, 4  ;;  %s5853_s16 = scalar_lea.hbm %s6515_s4, %s4598_s10  ;;  %s314_s12 = int_to_ptr.vmem [resolvable:$true] %s313_s12 }
  0x76   : > { %s5532_s11 = scalar_lea.hbm %s5853_s16, 512  ;;  %p6540_p11 = scmp.ne.s32.totalorder %s6536_s19, 0 }
  0x77   : > { %p5533_p7 = scmp.ne.s32.totalorder %s5853_s16, %s5532_s11  ;;  %s5537_s27 = scalar_lea.hbm %s6515_s4, 1024 }
  0x78   : > { %p6541_p13 = pneg %p6540_p11  ;;  %p5538_p9 = scmp.lt.s32.totalorder %s5853_s16, %s6515_s4 }
  0x79   : > { %p5539_p3 = scmp.lt.s32.totalorder %s5537_s27, %s5532_s11 }
  0x7a   : > { %p5535_p5 = pnand %p5533_p7, %p6541_p13 }
  0x7b   : > { %p5540_p4 = por %p5539_p3, %p5538_p9 }
  0x7c   : > { %p5536_p1 = pneg %p5535_p5 }
  0x7e   : > { %p5541_p6 = pnand %p5540_p4, %p5536_p1 }
  0x80   : > { %5544 = shalt.err (!%p5541_p6)
}
  0x81   : > { %s5545_s28 = scalar_lea.vmem %s314_s12, 512  ;;  %p6542_p2 = pmov %p6541_p13 }
  0x82   : > { %p5546_p10 = scmp.ne.s32.totalorder %s314_s12, %s5545_s28  ;;  %s5648_s1 = smov [#allocation11]  }
  0x83   : > { %s5550_s10 = sshll.u32 %s5648_s1, 4  ;;  %s5551_s10 = int_to_ptr.vmem [resolvable:$false] %s5550_s10 }
  0x84   : > { %p5548_p8 = pnand %p5546_p10, %p6542_p2  ;;  %s5552_s18 = scalar_lea.vmem %s5551_s10, 1024 }
  0x85   : > { %p5553_p0 = scmp.lt.s32.totalorder %s314_s12, %s5551_s10  ;;  %p5554_p7 = scmp.lt.s32.totalorder %s5552_s18, %s5545_s28 }
  0x86   : > { %p5549_p12 = pneg %p5548_p8 }
  0x87   : > { %p5555_p13 = por %p5554_p7, %p5553_p0 }
  0x89   : > { %p5556_p5 = pnand %p5555_p13, %p5549_p12 }
  0x8b   : > { %5559 = shalt.err (!%p5556_p5)
}
  0x8c   : > { %s6543_s21 = smov 256   ;;  %p6544_p1 = scmp.ne.s32.totalorder %s6531_s8, 0 }
  0x8d   : > { %4802 = dma.hbm_to_vmem [thread:$0]  (!%p6540_p11), %s5853_s16, 512, %s314_s12, %s5794_s14, %s6543_s21, %s6543_s21, %s5645_s17  }
  0x8e   : > { %325 = sbr.rel (%p6544_p1) target bundleno = 3996 (0xf9c), region = 48  ;;  %p6545_p9 = scmp.eq.s32.totalorder (!%p6544_p1), %s5716_s30, 0 }
  0x93   : > { %5601 = dma.done.wait (%p6545_p9), [#allocation4], 512   ;;  %p6546_p3 = pmov %p6545_p9 }
  0x95   : > { %5603 = vsyncadd (%p6546_p3), [#allocation4], 4294966784  ;;  %p6547_p4 = pmov %p6546_p3 }
  0x96   : > { %p6548_p6 = pmov %p6546_p3 }
  0x97   : > { %5605 = dma.done.wait (%p6547_p4), [#allocation7], 320  }
  0x98   : > { %5607 = vsyncadd (%p6548_p6), [#allocation7], 4294966976  ;;  %s339_s19 = sand.u32 1, %s5716_s30   ;;  %s341_s14 = sand.u32 1, %s5626_s25  }
  0x99   : > { %s4751_s16 = smul.u32 2304, %s341_s14  ;;  %s340_s8 = scalar_lea.sflag [#allocation10], %s339_s19 }
  0x9a   : > { %p6549_p11 = scmp.ne.s32.totalorder %s6535_s13, 0 }
  0x9b   : > { %s5889_s17 = scalar_lea.vmem [#allocation9], %s4751_s16 }
  0x9c   : > { %5609 = dma.done.wait (%p6549_p11), %s340_s8, 37376  }
  0x9d   : > { %5611 = vsyncadd (%p6549_p11), %s340_s8, 4294929920  ;;  %s4017_s12 = sshll.u32 %s341_s14, 5  ;;  %p6550_p10 = pmov %p6546_p3 }
  0x9e   : > { %s5895_s20 = scalar_lea.vmem [#allocation11], %s4017_s12 }
  0x9f   : > { %5613 = dma.done.wait (%p6550_p10), [#allocation13], 2064   ;;  %p6551_p2 = pmov %p6546_p3 }
  0xa0   : > { %p6552_p8 = scmp.ne.s32.totalorder %s5716_s30, 0 }
  0xa1   : > { %5615 = vsyncadd (%p6551_p2), [#allocation13], 4294965232 }
  0xa2   : > { %395 = sbr.rel (%p6552_p8) target bundleno = 170 (0xaa), region = 80 }
  0xa7   : > { %v396_v0 = vld [vmem:[#allocation3] sm:$0xff]  ;;  %v397_v1 = vld [vmem:[#allocation3 + $0x8] sm:$0xff]  ;;  %v398_v2 = vld [vmem:[#allocation3 + $0x10] sm:$0xff] }
  0xa8   : > { %400 = vst [vmem:[#allocation2 + $0x10] sm:$0xff] %v396_v0  ;;  %401 = vst [vmem:[#allocation2] sm:$0xff] %v397_v1  ;;  %v399_v3 = vld [vmem:[#allocation3 + $0x18] sm:$0xff] }
  0xa9   : > { %402 = vst [vmem:[#allocation2 + $0x18] sm:$0xff] %v398_v2  ;;  %403 = vst [vmem:[#allocation2 + $0x8] sm:$0xff] %v399_v3 }
  0xaa PF: > { %v4865_v4 = vld [vmem:[%s5889_s17 + $0x174] ss:$8 sps:$4 sm:$0xff]   ;;  %v4867_v5 = vld [vmem:[%s5889_s17 + $0x170] ss:$8 sps:$4 sm:$0xff]   ;;  %v4871_v8 = vld [vmem:[%s5889_s17 + $0x164] ss:$8 sps:$4 sm:$0xff]  }
  0xab   : > { %861 = vmatprep.subr.bf16.mxu1 %v4865_v4  ;;  %v4868_v6 = vld [vmem:[%s5889_s17 + $0x74] ss:$8 sps:$4 sm:$0xff]   ;;  %v4870_v7 = vld [vmem:[%s5889_s17 + $0x70] ss:$8 sps:$4 sm:$0xff]   ;;  %v4873_v9 = vld [vmem:[%s5889_s17 + $0x160] ss:$8 sps:$4 sm:$0xff]  }
  0xac   : > { %862 = vmatpush1.bf16.msra.mxu1 %v4867_v5  ;;  %617 = vmatprep.subr.bf16.mxu0 %v4868_v6  ;;  %v4874_v10 = vld [vmem:[%s5889_s17 + $0x64] ss:$8 sps:$4 sm:$0xff]   ;;  %v4876_v11 = vld [vmem:[%s5889_s17 + $0x60] ss:$8 sps:$4 sm:$0xff]   ;;  %v4877_v12 = vld [vmem:[%s5889_s17 + $0x154] ss:$8 sps:$4 sm:$0xff]  }
  0xad   : > { %618 = vmatpush1.bf16.msra.mxu0 %v4870_v7  ;;  %863 = vmatprep.subr.bf16.mxu1 %v4871_v8  ;;  %v4879_v13 = vld [vmem:[%s5889_s17 + $0x150] ss:$8 sps:$4 sm:$0xff]   ;;  %v4880_v14 = vld [vmem:[%s5889_s17 + $0x54] ss:$8 sps:$4 sm:$0xff]   ;;  %v4883_v15 = vld [vmem:[%s5889_s17 + $0x144] ss:$8 sps:$4 sm:$0xff]  }
  0xae   : > { %619 = vmatprep.subr.bf16.mxu0 %v4874_v10  ;;  %v4882_v16 = vld [vmem:[%s5889_s17 + $0x50] ss:$8 sps:$4 sm:$0xff]   ;;  %v4886_v17 = vld [vmem:[%s5889_s17 + $0x44] ss:$8 sps:$4 sm:$0xff]   ;;  %v4885_v18 = vld [vmem:[%s5889_s17 + $0x140] ss:$8 sps:$4 sm:$0xff]  }
  0xaf   : > { %v4889_v19 = vld [vmem:[%s5889_s17 + $0x134] ss:$8 sps:$4 sm:$0xff]   ;;  %v4888_v20 = vld [vmem:[%s5889_s17 + $0x40] ss:$8 sps:$4 sm:$0xff]   ;;  %v4891_v22 = vld [vmem:[%s5889_s17 + $0x130] ss:$8 sps:$4 sm:$0xff]  }
  0xb0   : > { %864 = vmatpush1.bf16.msra.mxu1 %v4873_v9  ;;  %v4892_v21 = vld [vmem:[%s5889_s17 + $0x34] ss:$8 sps:$4 sm:$0xff]   ;;  %v4895_v23 = vld [vmem:[%s5889_s17 + $0x124] ss:$8 sps:$4 sm:$0xff]   ;;  %v4894_v24 = vld [vmem:[%s5889_s17 + $0x30] ss:$8 sps:$4 sm:$0xff]  }
  0xb1   : > { %865 = vmatprep.subr.bf16.mxu1 %v4877_v12  ;;  %620 = vmatpush1.bf16.msra.mxu0 %v4876_v11  ;;  %v4898_v25 = vld [vmem:[%s5889_s17 + $0x24] ss:$8 sps:$4 sm:$0xff]   ;;  %v4897_v26 = vld [vmem:[%s5889_s17 + $0x120] ss:$8 sps:$4 sm:$0xff]   ;;  %v4901_v27 = vld [vmem:[%s5889_s17 + $0x114] ss:$8 sps:$4 sm:$0xff]   ;;  %v449_v11 = vlaneseq }
  0xb2   : > { %621 = vmatprep.subr.bf16.mxu0 %v4880_v14  ;;  %v4900_v28 = vld [vmem:[%s5889_s17 + $0x20] ss:$8 sps:$4 sm:$0xff]   ;;  %v4904_v29 = vld [vmem:[%s5889_s17 + $0x14] ss:$8 sps:$4 sm:$0xff]   ;;  %v4903_v30 = vld [vmem:[%s5889_s17 + $0x110] ss:$8 sps:$4 sm:$0xff]  }
  0xb3   : > { %v4907_v31 = vld [vmem:[%s5889_s17 + $0x104] ss:$8 sps:$4 sm:$0xff]   ;;  %v4906_v32 = vld [vmem:[%s5889_s17 + $0x10] ss:$8 sps:$4 sm:$0xff]   ;;  %v4909_v34 = vld [vmem:[%s5889_s17 + $0x100] ss:$8 sps:$4 sm:$0xff]  }
  0xb4   : > { %866 = vmatpush1.bf16.msra.mxu1 %v4879_v13  ;;  %v4910_v33 = vld [vmem:[%s5889_s17 + $0x4] ss:$8 sps:$4 sm:$0xff]   ;;  %v4913_v35 = vld [vmem:[%s5889_s17 + $0x1f4] ss:$8 sps:$4 sm:$0xff]   ;;  %v4912_v36 = vld [vmem:[%s5889_s17] ss:$8 sps:$4 sm:$0xff]  }
  0xb5   : > { %867 = vmatprep.subr.bf16.mxu1 %v4883_v15  ;;  %622 = vmatpush1.bf16.msra.mxu0 %v4882_v16  ;;  %v4916_v37 = vld [vmem:[%s5889_s17 + $0xf4] ss:$8 sps:$4 sm:$0xff]   ;;  %v4915_v38 = vld [vmem:[%s5889_s17 + $0x1f0] ss:$8 sps:$4 sm:$0xff]   ;;  %v4919_v39 = vld [vmem:[%s5889_s17 + $0x1e4] ss:$8 sps:$4 sm:$0xff]  }
  0xb6   : > { %623 = vmatprep.subr.bf16.mxu0 %v4886_v17  ;;  %v4918_v40 = vld [vmem:[%s5889_s17 + $0xf0] ss:$8 sps:$4 sm:$0xff]   ;;  %v4922_v41 = vld [vmem:[%s5889_s17 + $0xe4] ss:$8 sps:$4 sm:$0xff]   ;;  %v4921_v42 = vld [vmem:[%s5889_s17 + $0x1e0] ss:$8 sps:$4 sm:$0xff]  }
  0xb7   : > { %v4925_v43 = vld [vmem:[%s5889_s17 + $0x1d4] ss:$8 sps:$4 sm:$0xff]   ;;  %v4924_v44 = vld [vmem:[%s5889_s17 + $0xe0] ss:$8 sps:$4 sm:$0xff]   ;;  %v4927_v46 = vld [vmem:[%s5889_s17 + $0x1d0] ss:$8 sps:$4 sm:$0xff]  }
  0xb8   : > { %868 = vmatpush1.bf16.msra.mxu1 %v4885_v18  ;;  %v4928_v45 = vld [vmem:[%s5889_s17 + $0xd4] ss:$8 sps:$4 sm:$0xff]   ;;  %v4931_v47 = vld [vmem:[%s5889_s17 + $0x1c4] ss:$8 sps:$4 sm:$0xff]   ;;  %v4930_v48 = vld [vmem:[%s5889_s17 + $0xd0] ss:$8 sps:$4 sm:$0xff]  }
  0xb9   : > { %869 = vmatprep.subr.bf16.mxu1 %v4889_v19  ;;  %624 = vmatpush1.bf16.msra.mxu0 %v4888_v20  ;;  %v4933_v49 = vld [vmem:[%s5889_s17 + $0x1c0] ss:$8 sps:$4 sm:$0xff]   ;;  %v4934_v50 = vld [vmem:[%s5889_s17 + $0xc4] ss:$8 sps:$4 sm:$0xff]   ;;  %v4937_v53 = vld [vmem:[%s5889_s17 + $0x1b4] ss:$8 sps:$4 sm:$0xff]  }
  0xba   : > { %625 = vmatprep.subr.bf16.mxu0 %v4892_v21  ;;  %v405_v51 = vld [vmem:[#allocation2] sm:$0xff]  ;;  %v4936_v52 = vld [vmem:[%s5889_s17 + $0xc0] ss:$8 sps:$4 sm:$0xff]   ;;  %v407_v54 = vld [vmem:[#allocation2 + $0x8] sm:$0xff]  ;;  %v5649_v10 = vmov 0.0   ;;  %vm5650_vm0 = vmmov 0  }
  0xbb   : > { %v4940_v55 = vld [vmem:[%s5889_s17 + $0xb4] ss:$8 sps:$4 sm:$0xff]   ;;  %v416_v56 = vpack.c.bf16 %v407_v54, %v405_v51  ;;  %v4939_v57 = vld [vmem:[%s5889_s17 + $0x1b0] ss:$8 sps:$4 sm:$0xff]   ;;  %v4943_v58 = vld [vmem:[%s5889_s17 + $0x1a4] ss:$8 sps:$4 sm:$0xff]  }
  0xbc   : > { %870 = vmatpush1.bf16.msra.mxu1 %v4891_v22  ;;  %v4942_v59 = vld [vmem:[%s5889_s17 + $0xb0] ss:$8 sps:$4 sm:$0xff]   ;;  %v4946_v60 = vld [vmem:[%s5889_s17 + $0xa4] ss:$8 sps:$4 sm:$0xff]   ;;  %v4945_v61 = vld [vmem:[%s5889_s17 + $0x1a0] ss:$8 sps:$4 sm:$0xff]  }
  0xbd   : > { %871 = vmatprep.subr.bf16.mxu1 %v4895_v23  ;;  %626 = vmatpush1.bf16.msra.mxu0 %v4894_v24  ;;  %v4949_v62 = vld [vmem:[%s5889_s17 + $0x194] ss:$8 sps:$4 sm:$0xff]   ;;  %v4948_v63 = vld [vmem:[%s5889_s17 + $0xa0] ss:$8 sps:$4 sm:$0xff]   ;;  %v4951_v1 = vld [vmem:[%s5889_s17 + $0x190] ss:$8 sps:$4 sm:$0xff]  }
  0xbe   : > { %627 = vmatprep.subr.bf16.mxu0 %v4898_v25  ;;  %893 = vmatprep.mubr.bf16.mxu1 %v416_v56  ;;  %v4952_v0 = vld [vmem:[%s5889_s17 + $0x94] ss:$8 sps:$4 sm:$0xff]   ;;  %v4955_v2 = vld [vmem:[%s5889_s17 + $0x184] ss:$8 sps:$4 sm:$0xff]   ;;  %v4954_v3 = vld [vmem:[%s5889_s17 + $0x90] ss:$8 sps:$4 sm:$0xff]  }
  0xbf   : > { %649 = vmatprep.mubr.bf16.mxu0 %v416_v56  ;;  %v4958_v4 = vld [vmem:[%s5889_s17 + $0x84] ss:$8 sps:$4 sm:$0xff]   ;;  %v4957_v5 = vld [vmem:[%s5889_s17 + $0x180] ss:$8 sps:$4 sm:$0xff]   ;;  %v5974_v12 = vshrl.u32 %v449_v11, 7  ;;  %vm1365_vm1 = vcmask 64512  }
  0xc0   : > { %872 = vmatpush1.bf16.msra.mxu1 %v4897_v26  ;;  %v404_v6 = vld [vmem:[#allocation2 + $0x10] sm:$0xff]  ;;  %v406_v7 = vld [vmem:[#allocation2 + $0x18] sm:$0xff]  ;;  %v4973_v54 = vld [vmem:[%s5889_s17 + $0x230] ss:$8 sps:$4 sm:$0xff]   ;;  %vm1417_vm2 = vcmask 1043456   ;;  %p4576_p12 = scmp.ne.s32.totalorder %s5716_s30, 1 }
  0xc1   : > { %873 = vmatprep.subr.bf16.mxu1 %v4901_v27  ;;  %628 = vmatpush1.bf16.msra.mxu0 %v4900_v28  ;;  %v4960_v8 = vld [vmem:[%s5889_s17 + $0x80] ss:$8 sps:$4 sm:$0xff]   ;;  %v5967_v9 = vpack.c.bf16 %v406_v7, %v404_v6  ;;  %v5977_v13 = vsub.s32 1, %v5974_v12  ;;  %v5983_v15 = vsub.s32 0, %v5974_v12  ;;  %v4972_v51 = vld [vmem:[%s5889_s17 + $0x244] ss:$8 sps:$4 sm:$0xff]  }
  0xc2   : > { %629 = vmatprep.subr.bf16.mxu0 %v4904_v29  ;;  %v5980_v14 = vld [vmem:[%s5895_s20] sm:$0xff]  ;;  %v5991_v27 = vld [vmem:[%s5895_s20 + $0x8] sm:$0xff]  ;;  %v4997_v6 = vld [vmem:[%s5889_s17 + $0x2b0] ss:$8 sps:$4 sm:$0xff]  }
  0xc3   : > { %v696_v16 = vrot.slane %v5980_v14, %v5977_v13  ;;  %v452_v18 = vrot.slane %v5980_v14, %v5983_v15  ;;  %v700_v29 = vrot.slane %v5991_v27, %v5977_v13  ;;  %v5002_v7 = vld [vmem:[%s5889_s17 + $0x2a4] ss:$8 sps:$4 sm:$0xff]   ;;  %v5005_v11 = vld [vmem:[%s5889_s17 + $0x294] ss:$8 sps:$4 sm:$0xff]  }
  0xc4   : > { %874 = vmatpush1.bf16.msra.mxu1 %v4903_v30 }
  0xc5   : > { %875 = vmatprep.subr.bf16.mxu1 %v4907_v31  ;;  %630 = vmatpush1.bf16.msra.mxu0 %v4906_v32 }
  0xc6   : > { %631 = vmatprep.subr.bf16.mxu0 %v4910_v33 }
  0xc8   : > { %876 = vmatpush1.bf16.msra.mxu1 %v4909_v34  ;;  %v456_v34 = vrot.slane %v5991_v27, %v5983_v15 }
  0xc9   : > { %877 = vmatprep.subr.bf16.mxu1 %v4913_v35  ;;  %632 = vmatpush1.bf16.msra.mxu0 %v4912_v36 }
  0xca   : > { %633 = vmatprep.subr.bf16.mxu0 %v4916_v37 }
  0xcc   : > { %878 = vmatpush2.bf16.msra.mxu1 %v4915_v38 }
  0xcd   : > { %879 = vmatprep.subr.bf16.mxu1 %v4919_v39  ;;  %634 = vmatpush2.bf16.msra.mxu0 %v4918_v40 }
  0xce   : > { %635 = vmatprep.subr.bf16.mxu0 %v4922_v41 }
  0xd0   : > { %880 = vmatpush2.bf16.msra.mxu1 %v4921_v42 }
  0xd1   : > { %881 = vmatprep.subr.bf16.mxu1 %v4925_v43  ;;  %636 = vmatpush2.bf16.msra.mxu0 %v4924_v44 }
  0xd2   : > { %637 = vmatprep.subr.bf16.mxu0 %v4928_v45  ;;  %v4961_v45 = vld [vmem:[%s5889_s17 + $0x270] ss:$8 sps:$4 sm:$0xff]  }
  0xd4   : > { %882 = vmatpush2.bf16.msra.mxu1 %v4927_v46  ;;  %v4963_v46 = vld [vmem:[%s5889_s17 + $0x274] ss:$8 sps:$4 sm:$0xff]  }
  0xd5   : > { %883 = vmatprep.subr.bf16.mxu1 %v4931_v47  ;;  %638 = vmatpush2.bf16.msra.mxu0 %v4930_v48  ;;  %v4966_v47 = vld [vmem:[%s5889_s17 + $0x264] ss:$8 sps:$4 sm:$0xff]   ;;  %v4964_v48 = vld [vmem:[%s5889_s17 + $0x260] ss:$8 sps:$4 sm:$0xff]  }
  0xd6   : > { %639 = vmatprep.subr.bf16.mxu0 %v4934_v50  ;;  %v4967_v50 = vld [vmem:[%s5889_s17 + $0x250] ss:$8 sps:$4 sm:$0xff]  }
  0xd8   : > { %884 = vmatpush2.bf16.msra.mxu1 %v4933_v49  ;;  %v4969_v49 = vld [vmem:[%s5889_s17 + $0x254] ss:$8 sps:$4 sm:$0xff]  }
  0xd9   : > { %885 = vmatprep.subr.bf16.mxu1 %v4937_v53  ;;  %640 = vmatpush2.bf16.msra.mxu0 %v4936_v52  ;;  %v4970_v52 = vld [vmem:[%s5889_s17 + $0x240] ss:$8 sps:$4 sm:$0xff]   ;;  %v4975_v53 = vld [vmem:[%s5889_s17 + $0x234] ss:$8 sps:$4 sm:$0xff]  }
  0xda   : > { %641 = vmatprep.subr.bf16.mxu0 %v4940_v55  ;;  %v4978_v55 = vld [vmem:[%s5889_s17 + $0x224] ss:$8 sps:$4 sm:$0xff]  }
  0xdc   : > { %886 = vmatpush2.bf16.msra.mxu1 %v4939_v57  ;;  %v4981_v57 = vld [vmem:[%s5889_s17 + $0x214] ss:$8 sps:$4 sm:$0xff]  }
  0xdd   : > { %887 = vmatprep.subr.bf16.mxu1 %v4943_v58  ;;  %642 = vmatpush2.bf16.msra.mxu0 %v4942_v59  ;;  %v4979_v58 = vld [vmem:[%s5889_s17 + $0x210] ss:$8 sps:$4 sm:$0xff]   ;;  %v4984_v59 = vld [vmem:[%s5889_s17 + $0x204] ss:$8 sps:$4 sm:$0xff]  }
  0xde   : > { %643 = vmatprep.subr.bf16.mxu0 %v4946_v60  ;;  %v4982_v60 = vld [vmem:[%s5889_s17 + $0x200] ss:$8 sps:$4 sm:$0xff]  }
  0xe0   : > { %888 = vmatpush2.bf16.msra.mxu1 %v4945_v61  ;;  %v4987_v61 = vld [vmem:[%s5889_s17 + $0x2f4] ss:$8 sps:$4 sm:$0xff]  }
  0xe1   : > { %889 = vmatprep.subr.bf16.mxu1 %v4949_v62  ;;  %644 = vmatpush2.bf16.msra.mxu0 %v4948_v63  ;;  %v4985_v62 = vld [vmem:[%s5889_s17 + $0x2f0] ss:$8 sps:$4 sm:$0xff]   ;;  %v4990_v63 = vld [vmem:[%s5889_s17 + $0x2e4] ss:$8 sps:$4 sm:$0xff]  }
  0xe2   : > { %645 = vmatprep.subr.bf16.mxu0 %v4952_v0  ;;  %v4988_v0 = vld [vmem:[%s5889_s17 + $0x2e0] ss:$8 sps:$4 sm:$0xff]  }
  0xe4   : > { %890 = vmatpush2.bf16.msra.mxu1 %v4951_v1  ;;  %v4993_v1 = vld [vmem:[%s5889_s17 + $0x2d4] ss:$8 sps:$4 sm:$0xff]  }
  0xe5   : > { %891 = vmatprep.subr.bf16.mxu1 %v4955_v2  ;;  %646 = vmatpush2.bf16.msra.mxu0 %v4954_v3  ;;  %v4991_v2 = vld [vmem:[%s5889_s17 + $0x2d0] ss:$8 sps:$4 sm:$0xff]   ;;  %v4996_v3 = vld [vmem:[%s5889_s17 + $0x2c4] ss:$8 sps:$4 sm:$0xff]  }
  0xe6   : > { %647 = vmatprep.subr.bf16.mxu0 %v4958_v4  ;;  %v4994_v4 = vld [vmem:[%s5889_s17 + $0x2c0] ss:$8 sps:$4 sm:$0xff]  }
  0xe8   : > { %892 = vmatpush2.bf16.msra.mxu1 %v4957_v5  ;;  %v4999_v5 = vld [vmem:[%s5889_s17 + $0x2b4] ss:$8 sps:$4 sm:$0xff]  }
  0xe9   : > { %648 = vmatpush2.bf16.msra.mxu0 %v4960_v8  ;;  %4653 = vmatprep.subr.bf16.mxu1 %v5649_v10  ;;  %v5000_v8 = vld [vmem:[%s5889_s17 + $0x2a0] ss:$8 sps:$4 sm:$0xff]  }
  0xea   : > { %1105 = vmatprep.subr.bf16.mxu0 %v4963_v46 }
  0xeb   : > { %894 = vmatmul.mubr.bf16.vlgmr.msra.gmra.mxu1 %v5967_v9 }
  0xec   : > { %650 = vmatmul.mubr.bf16.vlgmr.msra.gmra.mxu0 %v5967_v9  ;;  %4655 = vmatprep.mubr.msk.bf16.mxu1 %vm5650_vm0, %v5649_v10 }
  0xed   : > { %1137 = vmatprep.mubr.bf16.mxu0 %v416_v56  ;;  %1106 = vmatpush1.bf16.msra.mxu0 %v4961_v45  ;;  %v4976_v56 = vld [vmem:[%s5889_s17 + $0x220] ss:$8 sps:$4 sm:$0xff]  }
  0xee   : > { %1107 = vmatprep.subr.bf16.mxu0 %v4966_v47 }
  0xf1   : > { %1108 = vmatpush1.bf16.msra.mxu0 %v4964_v48 }
  0xf2   : > { %1109 = vmatprep.subr.bf16.mxu0 %v4969_v49 }
  0xf5   : > { %1110 = vmatpush1.bf16.msra.mxu0 %v4967_v50 }
  0xf6   : > { %1111 = vmatprep.subr.bf16.mxu0 %v4972_v51 }
  0xf9   : > { %1112 = vmatpush1.bf16.msra.mxu0 %v4970_v52 }
  0xfa   : > { %1113 = vmatprep.subr.bf16.mxu0 %v4975_v53 }
  0xfd   : > { %1114 = vmatpush1.bf16.msra.mxu0 %v4973_v54 }
  0xfe   : > { %1115 = vmatprep.subr.bf16.mxu0 %v4978_v55 }
 0x101   : > { %1116 = vmatpush1.bf16.msra.mxu0 %v4976_v56 }
 0x102   : > { %1117 = vmatprep.subr.bf16.mxu0 %v4981_v57 }
 0x105   : > { %1118 = vmatpush1.bf16.msra.mxu0 %v4979_v58 }
 0x106   : > { %1119 = vmatprep.subr.bf16.mxu0 %v4984_v59 }
 0x109   : > { %1120 = vmatpush1.bf16.msra.mxu0 %v4982_v60 }
 0x10a   : > { %1121 = vmatprep.subr.bf16.mxu0 %v4987_v61 }
 0x10d   : > { %1122 = vmatpush2.bf16.msra.mxu0 %v4985_v62 }
 0x10e   : > { %1123 = vmatprep.subr.bf16.mxu0 %v4990_v63  ;;  %v6051_v63 = vsub.s32 2, %v5974_v12 }
 0x111   : > { %1124 = vmatpush2.bf16.msra.mxu0 %v4988_v0 }
 0x112   : > { %1125 = vmatprep.subr.bf16.mxu0 %v4993_v1  ;;  %v6055_v1 = vrot.slane %v5980_v14, %v6051_v63 }
 0x115   : > { %1126 = vmatpush2.bf16.msra.mxu0 %v4991_v2 }
 0x116   : > { %1127 = vmatprep.subr.bf16.mxu0 %v4996_v3 }
 0x119   : > { %1128 = vmatpush2.bf16.msra.mxu0 %v4994_v4 }
 0x11a   : > { %1129 = vmatprep.subr.bf16.mxu0 %v4999_v5 }
 0x11d   : > { %1130 = vmatpush2.bf16.msra.mxu0 %v4997_v6 }
 0x11e   : > { %1131 = vmatprep.subr.bf16.mxu0 %v5002_v7 }
 0x121   : > { %1132 = vmatpush2.bf16.msra.mxu0 %v5000_v8 }
 0x122   : > { %1133 = vmatprep.subr.bf16.mxu0 %v5005_v11 }
 0x1ab   : > { %v895_v17 = vpop.f32.mrf.mxu1 }
 0x1ac   : > { %v896_v19 = vadd.f32 %v895_v17, %v696_v16  ;;  %v651_v22 = vpop.f32.mrf.mxu0  ;;  %v5008_v17 = vld [vmem:[%s5889_s17 + $0x284] ss:$8 sps:$4 sm:$0xff]  }
 0x1ad   : > { %v897_v20 = vpop.f32.mrf.mxu1  ;;  %v652_v23 = vadd.f32 %v651_v22, %v452_v18 }
 0x1ae   : > { %v1152_v21 = vpack.c.bf16 %v896_v19, %v896_v19  ;;  %v653_v28 = vpop.f32.mrf.mxu0  ;;  %v898_v33 = vadd.f32 %v897_v20, %v700_v29  ;;  %v5651_v19 = vmov 1966171168  }
 0x1af   : > { %v899_v24 = vpop.f32.mrf.mxu1  ;;  %v1148_v26 = vpack.c.bf16 %v652_v23, %v652_v23  ;;  %v654_v38 = vadd.f32 %v653_v28, %v456_v34  ;;  %v1170_v20 = vunpack.c.l.s4 %v5651_v19  ;;  %v4181_v23 = vld.sshfl [vmem:[#allocation8] sm:$0x33 pattern:$0x75316420] }
 0x1b0   : > { %4654 = vmatpush3.bf16.xpose.msra.mxu1 %v1152_v21  ;;  %v900_v25 = vadd.f32 %v899_v24, %v696_v16  ;;  %v655_v31 = vpop.f32.mrf.mxu0  ;;  %v1154_v36 = vpack.c.bf16 %v898_v33, %v898_v33  ;;  %v5003_v16 = vld [vmem:[%s5889_s17 + $0x290] ss:$8 sps:$4 sm:$0xff]  }
 0x1b1   : > { %4659 = vmatprep.subr.bf16.mxu1 %v5649_v10  ;;  %v656_v32 = vadd.f32 %v655_v31, %v452_v18  ;;  %v901_v37 = vpop.f32.mrf.mxu1  ;;  %v1150_v40 = vpack.c.bf16 %v654_v38, %v654_v38  ;;  %1134 = vmatpush2.bf16.msra.mxu0 %v5003_v16  ;;  %v5006_v18 = vld [vmem:[%s5889_s17 + $0x280] ss:$8 sps:$4 sm:$0xff]   ;;  %v1171_v21 = vunpack.c.0.s8 %v1170_v20 }
 0x1b2   : > { %v1153_v30 = vpack.c.bf16 %v900_v25, %v900_v25  ;;  %v902_v39 = vadd.f32 %v901_v37, %v700_v29  ;;  %v657_v42 = vpop.f32.mrf.mxu0  ;;  %1135 = vmatprep.subr.bf16.mxu0 %v5008_v17 }
 0x1b3   : > { %v1149_v35 = vpack.c.bf16 %v656_v32, %v656_v32  ;;  %v658_v43 = vadd.f32 %v657_v42, %v456_v34  ;;  %v1174_v22 = vsub.s32 %v1171_v21, %v5974_v12 }
 0x1b4   : > { %v1155_v41 = vpack.c.bf16 %v902_v39, %v902_v39 }
 0x1b5   : > { %v1151_v44 = vpack.c.bf16 %v658_v43, %v658_v43  ;;  %1136 = vmatpush2.bf16.msra.mxu0 %v5006_v18  ;;  %v1175_v24 = vrot.slane %v4181_v23, %v1174_v22 }
 0x1b7   : > { %4656 = vmatmul.mubr.bf16.vlgmr.msra.gmra.mxu1 %v1148_v26  ;;  %v1188_v25 = vrot.slane %v1175_v24, %v5983_v15  ;;  %v1168_v26 = vcombine.high %v4181_v23, %v4181_v23  ;;  %v1183_v37 = vcombine.high %v1175_v24, %v1175_v24 }
 0x1b8   : > { %4660 = vmatpush3.bf16.xpose.msra.mxu1 %v1153_v30  ;;  %4661 = vmatprep.mubr.msk.bf16.mxu1 %vm5650_vm0, %v5649_v10 }
 0x1b9   : > { %4665 = vmatprep.subr.bf16.mxu1 %v5649_v10  ;;  %1138 = vmatmul.mubr.bf16.vlgmr.msra.gmra.mxu0 %v5967_v9  ;;  %v1182_v30 = vrot.slane %v1168_v26, %v1174_v22  ;;  %v5011_v26 = vld [vmem:[%s5889_s17 + $0x374] ss:$8 sps:$4 sm:$0xff]  }
 0x1ba   : > { %1802 = vmatprep.subr.bf16.mxu0 %v5011_v26  ;;  %v5053_v26 = vld [vmem:[%s5889_s17 + $0x394] ss:$8 sps:$4 sm:$0xff]  }
 0x1bb   : > { %v1192_v9 = vrot.slane %v1182_v30, %v5983_v15  ;;  %v1184_v45 = vcombine.high %v1182_v30, %v1182_v30  ;;  %v5017_v30 = vld [vmem:[%s5889_s17 + $0x354] ss:$8 sps:$4 sm:$0xff]  }
 0x1bd   : > { %v1200_v49 = vrot.slane %v1184_v45, %v5983_v15 }
 0x1bf   : > { %4662 = vmatmul.mubr.bf16.vlgmr.msra.gmra.mxu1 %v1149_v35 }
 0x1c0   : > { %4666 = vmatpush3.bf16.xpose.msra.mxu1 %v1154_v36  ;;  %4667 = vmatprep.mubr.msk.bf16.mxu1 %vm5650_vm0, %v5649_v10 }
 0x1c1   : > { %4671 = vmatprep.subr.bf16.mxu1 %v5649_v10 }
 0x1c7   : > { %4668 = vmatmul.mubr.bf16.vlgmr.msra.gmra.mxu1 %v1150_v40 }
 0x1c8   : > { %4672 = vmatpush3.bf16.xpose.msra.mxu1 %v1155_v41  ;;  %4673 = vmatprep.mubr.msk.bf16.mxu1 %vm5650_vm0, %v5649_v10  ;;  %v1196_v41 = vrot.slane %v1183_v37, %v5983_v15  ;;  %v5029_v37 = vld [vmem:[%s5889_s17 + $0x314] ss:$8 sps:$4 sm:$0xff]  }
 0x1c9   : > { %4677 = vmatprep.subr.bf16.mxu1 %v5649_v10 }
 0x1cf   : > { %4674 = vmatmul.mubr.bf16.vlgmr.msra.gmra.mxu1 %v1151_v44 }
 0x1d0   : > { %4679 = vmatprep.mubr.msk.bf16.mxu1 %vm5650_vm0, %v5649_v10 }
 0x277   : > { %v1239_v28 = vpop.f32.mrf.mxu1 }
 0x278   : > { %v1240_v29 = vadd.f32 %v1239_v28, %v1188_v25  ;;  %v5009_v25 = vld [vmem:[%s5889_s17 + $0x370] ss:$8 sps:$4 sm:$0xff]   ;;  %v5014_v28 = vld [vmem:[%s5889_s17 + $0x364] ss:$8 sps:$4 sm:$0xff]  }
 0x279   : > { %v4657_v31 = vpop.f32.mrf.mxu1  ;;  %v1139_v6 = vpop.f32.mrf.mxu0  ;;  %1803 = vmatpush1.bf16.msra.mxu0 %v5009_v25  ;;  %v5051_v25 = vld [vmem:[%s5889_s17 + $0x390] ss:$8 sps:$4 sm:$0xff]  }
 0x27a   : > { %v1366_v32 = vsel %vm1365_vm1, %v1240_v29, -inf  ;;  %v1140_v7 = vadd.f32 %v1139_v6, %v6055_v1  ;;  %1804 = vmatprep.subr.bf16.mxu0 %v5014_v28  ;;  %v5015_v31 = vld [vmem:[%s5889_s17 + $0x350] ss:$8 sps:$4 sm:$0xff]   ;;  %v5054_v28 = vld [vmem:[%s5889_s17 + $0x380] ss:$8 sps:$4 sm:$0xff]  }
 0x27b   : > { %1367 = vmax.xlane.f32.xlu0 %v1366_v32  ;;  %v1242_v33 = vpop.f32.mrf.mxu1  ;;  %v5020_v32 = vld [vmem:[%s5889_s17 + $0x344] ss:$8 sps:$4 sm:$0xff]  }
 0x27c   : > { %v1156_v8 = vpack.c.bf16 %v1140_v7, %v1140_v7  ;;  %v5018_v33 = vld [vmem:[%s5889_s17 + $0x340] ss:$8 sps:$4 sm:$0xff]  }
 0x27d   : > { %v4658_v34 = vpop.f32.mrf.mxu1 }
 0x27e   : > { %v1419_v16 = vsel %vm1417_vm2, %v1156_v8, 0  ;;  %v5021_v34 = vld [vmem:[%s5889_s17 + $0x330] ss:$8 sps:$4 sm:$0xff]  }
 0x27f   : > { %v1279_v35 = vpop.f32.mrf.mxu1  ;;  %4678 = vmatpush3.bf16.msra.mxu1 %v1419_v16 }
 0x280   : > { %v1280_v36 = vadd.f32 %v1279_v35, %v1192_v9  ;;  %4683 = vmatprep.subr.bf16.mxu1 %v5649_v10  ;;  %v5023_v9 = vld [vmem:[%s5889_s17 + $0x334] ss:$8 sps:$4 sm:$0xff]   ;;  %v5026_v35 = vld [vmem:[%s5889_s17 + $0x324] ss:$8 sps:$4 sm:$0xff]  }
 0x281   : > { %v4663_v38 = vpop.f32.mrf.mxu1 }
 0x282   : > { %v1369_v39 = vsel %vm1365_vm1, %v1280_v36, -inf  ;;  %v5027_v38 = vld [vmem:[%s5889_s17 + $0x310] ss:$8 sps:$4 sm:$0xff]  }
 0x283   : > { %1370 = vmax.xlane.f32.xlu0 %v1369_v39  ;;  %v1282_v40 = vpop.f32.mrf.mxu1  ;;  %v5032_v39 = vld [vmem:[%s5889_s17 + $0x304] ss:$8 sps:$4 sm:$0xff]  }
 0x284   : > { %v5030_v40 = vld [vmem:[%s5889_s17 + $0x300] ss:$8 sps:$4 sm:$0xff]  }
 0x285   : > { %v4664_v42 = vpop.f32.mrf.mxu1 }
 0x286   : > { %v5033_v42 = vld [vmem:[%s5889_s17 + $0x3f0] ss:$8 sps:$4 sm:$0xff]  }
 0x287   : > { %v1319_v43 = vpop.f32.mrf.mxu1 }
 0x288   : > { %v1320_v44 = vadd.f32 %v1319_v43, %v1196_v41  ;;  %v5035_v41 = vld [vmem:[%s5889_s17 + $0x3f4] ss:$8 sps:$4 sm:$0xff]   ;;  %v5038_v43 = vld [vmem:[%s5889_s17 + $0x3e4] ss:$8 sps:$4 sm:$0xff]  }
 0x289   : > { %v4669_v46 = vpop.f32.mrf.mxu1 }
 0x28a   : > { %v1372_v47 = vsel %vm1365_vm1, %v1320_v44, -inf  ;;  %v1141_v46 = vpop.f32.mrf.mxu0 }
 0x28b   : > { %1373 = vmax.xlane.f32.xlu1 %v1372_v47  ;;  %v1322_v48 = vpop.f32.mrf.mxu1 }
 0x28c   : > { %v1143_v48 = vpop.f32.mrf.mxu0 }
 0x28d   : > { %v4670_v50 = vpop.f32.mrf.mxu1 }
 0x28f   : > { %v1359_v51 = vpop.f32.mrf.mxu1 }
 0x290   : > { %v1360_v52 = vadd.f32 %v1359_v51, %v1200_v49  ;;  %v1144_v49 = vadd.f32 %v1143_v48, %v6055_v1  ;;  %v944_v51 = vrot.slane %v5991_v27, %v6051_v63  ;;  %v5117_v48 = vld [vmem:[%s5889_s17 + $0x4e0] ss:$8 sps:$4 sm:$0xff]  }
 0x291   : > { %v4675_v53 = vpop.f32.mrf.mxu1 }
 0x292   : > { %v1375_v54 = vsel %vm1365_vm1, %v1360_v52, -inf }
 0x293   : > { %1376 = vmax.xlane.f32.xlu1 %v1375_v54  ;;  %v1362_v55 = vpop.f32.mrf.mxu1 }
 0x295   : > { %v4676_v56 = vpop.f32.mrf.mxu1 }
 0x296   : > { %v1142_v56 = vadd.f32 %v1141_v46, %v944_v51  ;;  %v5111_v46 = vld [vmem:[%s5889_s17 + $0x4f0] ss:$8 sps:$4 sm:$0xff]  }
 0x304   : > { %v1368_v57 = vpop.xlane.xlu0 %1367 }
 0x305   : > { %v1378_v58 = vsub.f32 %v1240_v29, %v1368_v57  ;;  %v5012_v29 = vld [vmem:[%s5889_s17 + $0x360] ss:$8 sps:$4 sm:$0xff]  }
 0x306   : > { %1805 = vmatpush1.bf16.msra.mxu0 %v5012_v29  ;;  %v5056_v29 = vld [vmem:[%s5889_s17 + $0x384] ss:$8 sps:$4 sm:$0xff]  }
 0x307   : > { %v1382_v59 = vmul.f32 1.442695, %v1378_v58  ;;  %1806 = vmatprep.subr.bf16.mxu0 %v5017_v30  ;;  %v5059_v30 = vld [vmem:[%s5889_s17 + $0x574] ss:$8 sps:$4 sm:$0xff]  }
 0x309   : > { %5300 = vpow2.f32 %v1382_v59  ;;  %v1158_v59 = vpack.c.bf16 %v1142_v56, %v1142_v56  ;;  %v5141_v56 = vld [vmem:[%s5889_s17 + $0x4a0] ss:$8 sps:$4 sm:$0xff]  }
 0x30a   : > { %1807 = vmatpush1.bf16.msra.mxu0 %v5015_v31  ;;  %v5063_v31 = vld [vmem:[%s5889_s17 + $0x470] ss:$8 sps:$4 sm:$0xff]  }
 0x30b   : > { %1808 = vmatprep.subr.bf16.mxu0 %v5020_v32  ;;  %v1511_v1 = vsel %vm1417_vm2, %v1158_v59, 0  ;;  %v5065_v32 = vld [vmem:[%s5889_s17 + $0x474] ss:$8 sps:$4 sm:$0xff]  }
 0x30c   : > { %v1371_v60 = vpop.xlane.xlu0 %1370  ;;  %v5149_v59 = vld [vmem:[%s5889_s17 + $0x494] ss:$8 sps:$4 sm:$0xff]  }
 0x30d   : > { %v1379_v61 = vsub.f32 %v1280_v36, %v1371_v60  ;;  %v5024_v36 = vld [vmem:[%s5889_s17 + $0x320] ss:$8 sps:$4 sm:$0xff]  }
 0x30e   : > { %1809 = vmatpush1.bf16.msra.mxu0 %v5018_v33  ;;  %v5069_v33 = vld [vmem:[%s5889_s17 + $0x460] ss:$8 sps:$4 sm:$0xff]  }
 0x30f   : > { %v1384_v62 = vmul.f32 1.442695, %v1379_v61  ;;  %1810 = vmatprep.subr.bf16.mxu0 %v5023_v9  ;;  %v1145_v61 = vpop.f32.mrf.mxu0  ;;  %v5071_v9 = vld [vmem:[%s5889_s17 + $0x464] ss:$8 sps:$4 sm:$0xff]  }
 0x311   : > { %5302 = vpow2.f32 %v1384_v62 }
 0x312   : > { %1811 = vmatpush1.bf16.msra.mxu0 %v5021_v34  ;;  %v5075_v34 = vld [vmem:[%s5889_s17 + $0x450] ss:$8 sps:$4 sm:$0xff]  }
 0x313   : > { %1812 = vmatprep.subr.bf16.mxu0 %v5026_v35  ;;  %v5077_v35 = vld [vmem:[%s5889_s17 + $0x454] ss:$8 sps:$4 sm:$0xff]  }
 0x314   : > { %v1374_v0 = vpop.xlane.xlu1 %1373 }
 0x315   : > { %v1380_v2 = vsub.f32 %v1320_v44, %v1374_v0  ;;  %v5036_v44 = vld [vmem:[%s5889_s17 + $0x3e0] ss:$8 sps:$4 sm:$0xff]  }
 0x316   : > { %v6057_v3 = vpop.eup %5300  ;;  %1813 = vmatpush1.bf16.msra.mxu0 %v5024_v36  ;;  %v5081_v36 = vld [vmem:[%s5889_s17 + $0x440] ss:$8 sps:$4 sm:$0xff]  }
 0x317   : > { %v1386_v4 = vmul.f32 1.442695, %v1380_v2  ;;  %v1390_v5 = vsel %vm1365_vm1, %v6057_v3, 0.0  ;;  %1814 = vmatprep.subr.bf16.mxu0 %v5029_v37  ;;  %v1146_v2 = vadd.f32 %v1145_v61, %v944_v51  ;;  %v5083_v37 = vld [vmem:[%s5889_s17 + $0x444] ss:$8 sps:$4 sm:$0xff]  }
 0x318   : > { %1391 = vadd.xlane.f32.xlu0 %v1390_v5  ;;  %v5125_v51 = vld [vmem:[%s5889_s17 + $0x4d4] ss:$8 sps:$4 sm:$0xff]   ;;  %v5153_v61 = vld [vmem:[%s5889_s17 + $0x480] ss:$8 sps:$4 sm:$0xff]  }
 0x319   : > { %5304 = vpow2.f32 %v1386_v4  ;;  %v1159_v4 = vpack.c.bf16 %v1146_v2, %v1146_v2 }
 0x31a   : > { %1815 = vmatpush1.bf16.msra.mxu0 %v5027_v38  ;;  %v5087_v38 = vld [vmem:[%s5889_s17 + $0x430] ss:$8 sps:$4 sm:$0xff]  }
 0x31b   : > { %1816 = vmatprep.subr.bf16.mxu0 %v5032_v39  ;;  %v1557_v7 = vsel %vm1417_vm2, %v1159_v4, 0  ;;  %v5089_v39 = vld [vmem:[%s5889_s17 + $0x434] ss:$8 sps:$4 sm:$0xff]  }
 0x31c   : > { %v1377_v11 = vpop.xlane.xlu1 %1376 }
 0x31d   : > { %v1381_v17 = vsub.f32 %v1360_v52, %v1377_v11  ;;  %v1157_v52 = vpack.c.bf16 %v1144_v49, %v1144_v49  ;;  %v5119_v49 = vld [vmem:[%s5889_s17 + $0x4e4] ss:$8 sps:$4 sm:$0xff]  }
 0x31e   : > { %v6063_v18 = vpop.eup %5302  ;;  %1817 = vmatpush1.bf16.msra.mxu0 %v5030_v40  ;;  %v5093_v40 = vld [vmem:[%s5889_s17 + $0x420] ss:$8 sps:$4 sm:$0xff]  }
 0x31f   : > { %v1388_v19 = vmul.f32 1.442695, %v1381_v17  ;;  %v1393_v20 = vsel %vm1365_vm1, %v6063_v18, 0.0  ;;  %1818 = vmatprep.subr.bf16.mxu0 %v5035_v41  ;;  %v1465_v57 = vsel %vm1417_vm2, %v1157_v52, 0  ;;  %v5039_v17 = vld [vmem:[%s5889_s17 + $0x3d0] ss:$8 sps:$4 sm:$0xff]  }
 0x320   : > { %1394 = vadd.xlane.f32.xlu1 %v1393_v20  ;;  %v5044_v20 = vld [vmem:[%s5889_s17 + $0x3c4] ss:$8 sps:$4 sm:$0xff]   ;;  %v5129_v52 = vld [vmem:[%s5889_s17 + $0x4c0] ss:$8 sps:$4 sm:$0xff]  }
 0x321   : > { %5306 = vpow2.f32 %v1388_v19  ;;  %v5042_v19 = vld [vmem:[%s5889_s17 + $0x3c0] ss:$8 sps:$4 sm:$0xff]   ;;  %v5095_v41 = vld [vmem:[%s5889_s17 + $0x424] ss:$8 sps:$4 sm:$0xff]  }
 0x322   : > { %1819 = vmatpush2.bf16.msra.mxu0 %v5033_v42  ;;  %v5099_v42 = vld [vmem:[%s5889_s17 + $0x410] ss:$8 sps:$4 sm:$0xff]  }
 0x323   : > { %1820 = vmatprep.subr.bf16.mxu0 %v5038_v43  ;;  %v5101_v43 = vld [vmem:[%s5889_s17 + $0x414] ss:$8 sps:$4 sm:$0xff]  }
 0x326   : > { %v6068_v21 = vpop.eup %5304  ;;  %1821 = vmatpush2.bf16.msra.mxu0 %v5036_v44  ;;  %v5105_v44 = vld [vmem:[%s5889_s17 + $0x400] ss:$8 sps:$4 sm:$0xff]  }
 0x327   : > { %v1396_v22 = vsel %vm1365_vm1, %v6068_v21, 0.0 }
 0x328   : > { %1397 = vadd.xlane.f32.xlu0 %v1396_v22  ;;  %v5047_v22 = vld [vmem:[%s5889_s17 + $0x3b4] ss:$8 sps:$4 sm:$0xff]  }
 0x32e   : > { %v6072_v23 = vpop.eup %5306 }
 0x32f   : > { %v1399_v24 = vsel %vm1365_vm1, %v6072_v23, 0.0 }
 0x330   : > { %1400 = vadd.xlane.f32.xlu1 %v1399_v24  ;;  %v5050_v24 = vld [vmem:[%s5889_s17 + $0x3a4] ss:$8 sps:$4 sm:$0xff]  }
 0x3a1   : > { %v1392_v45 = vpop.xlane.xlu0 %1391 }
 0x3a2   : > { %5308 = vrcp.f32 %v1392_v45  ;;  %v5107_v45 = vld [vmem:[%s5889_s17 + $0x404] ss:$8 sps:$4 sm:$0xff]  }
 0x3a9   : > { %v1395_v47 = vpop.xlane.xlu1 %1394 }
 0x3aa   : > { %5310 = vrcp.f32 %v1395_v47  ;;  %v5113_v47 = vld [vmem:[%s5889_s17 + $0x4f4] ss:$8 sps:$4 sm:$0xff]  }
 0x3af   : > { %v5309_v50 = vpop.eup %5308 }
 0x3b0   : > { %v1406_v53 = vmul.f32 %v5309_v50, %v6057_v3  ;;  %v5123_v50 = vld [vmem:[%s5889_s17 + $0x4d0] ss:$8 sps:$4 sm:$0xff]  }
 0x3b1   : > { %v1398_v54 = vpop.xlane.xlu0 %1397 }
 0x3b2   : > { %5312 = vrcp.f32 %v1398_v54  ;;  %v1410_v55 = vpack.c.bf16 %v1406_v53, %v1406_v53  ;;  %v5131_v53 = vld [vmem:[%s5889_s17 + $0x4c4] ss:$8 sps:$4 sm:$0xff]   ;;  %v5135_v54 = vld [vmem:[%s5889_s17 + $0x4b0] ss:$8 sps:$4 sm:$0xff]  }
 0x3b4   : > { %4680 = vmatmul.mubr.msk.bf16.vlgmr.msra.gmra.mxu1 %vm1365_vm1, %v1410_v55  ;;  %v5137_v55 = vld [vmem:[%s5889_s17 + $0x4b4] ss:$8 sps:$4 sm:$0xff]  }
 0x3b5   : > { %4684 = vmatpush3.bf16.msra.mxu1 %v1465_v57  ;;  %4685 = vmatprep.mubr.msk.bf16.mxu1 %vm5650_vm0, %v5649_v10  ;;  %v5143_v57 = vld [vmem:[%s5889_s17 + $0x4a4] ss:$8 sps:$4 sm:$0xff]  }
 0x3b6   : > { %4689 = vmatprep.subr.bf16.mxu1 %v5649_v10 }
 0x3b7   : > { %v5311_v58 = vpop.eup %5310 }
 0x3b8   : > { %v1407_v60 = vmul.f32 %v5311_v58, %v6063_v18  ;;  %v5041_v18 = vld [vmem:[%s5889_s17 + $0x3d4] ss:$8 sps:$4 sm:$0xff]   ;;  %v5147_v58 = vld [vmem:[%s5889_s17 + $0x490] ss:$8 sps:$4 sm:$0xff]  }
 0x3b9   : > { %v1401_v62 = vpop.xlane.xlu1 %1400  ;;  %1822 = vmatprep.subr.bf16.mxu0 %v5041_v18 }
 0x3ba   : > { %5314 = vrcp.f32 %v1401_v62  ;;  %v1411_v0 = vpack.c.bf16 %v1407_v60, %v1407_v60  ;;  %1823 = vmatpush2.bf16.msra.mxu0 %v5039_v17  ;;  %v5152_v60 = vld [vmem:[#allocation6 + $0x4] ss:$8 sps:$4 sm:$0xff]   ;;  %v5155_v62 = vld [vmem:[%s5889_s17 + $0x484] ss:$8 sps:$4 sm:$0xff]  }
 0x3bb   : > { %1824 = vmatprep.subr.bf16.mxu0 %v5044_v20 }
 0x3bc   : > { %4686 = vmatmul.mubr.msk.bf16.vlgmr.msra.gmra.mxu1 %vm1365_vm1, %v1411_v0  ;;  %v6163_v0 = vld [vmem:[#allocation6] ss:$8 sps:$4 sm:$0xff]  }
 0x3bd   : > { %4690 = vmatpush3.bf16.msra.mxu1 %v1511_v1  ;;  %4691 = vmatprep.mubr.msk.bf16.mxu1 %vm5650_vm0, %v5649_v10 }
 0x3be   : > { %4695 = vmatprep.subr.bf16.mxu1 %v5649_v10  ;;  %1825 = vmatpush2.bf16.msra.mxu0 %v5042_v19 }
 0x3bf   : > { %v5313_v3 = vpop.eup %5312  ;;  %1826 = vmatprep.subr.bf16.mxu0 %v5047_v22 }
 0x3c0   : > { %v1408_v5 = vmul.f32 %v5313_v3, %v6068_v21  ;;  %v5045_v21 = vld [vmem:[%s5889_s17 + $0x3b0] ss:$8 sps:$4 sm:$0xff]  }
 0x3c2   : > { %v1412_v6 = vpack.c.bf16 %v1408_v5, %v1408_v5  ;;  %1827 = vmatpush2.bf16.msra.mxu0 %v5045_v21  ;;  %v5057_v21 = vld [vmem:[%s5889_s17 + $0x570] ss:$8 sps:$4 sm:$0xff]  }
 0x3c3   : > { %1828 = vmatprep.subr.bf16.mxu0 %v5050_v24  ;;  %v5062_v24 = vld [vmem:[%s5889_s17 + $0x564] ss:$8 sps:$4 sm:$0xff]  }
 0x3c4   : > { %4692 = vmatmul.mubr.msk.bf16.vlgmr.msra.gmra.mxu1 %vm1365_vm1, %v1412_v6 }
 0x3c5   : > { %4696 = vmatpush3.bf16.msra.mxu1 %v1557_v7  ;;  %4697 = vmatprep.mubr.msk.bf16.mxu1 %vm5650_vm0, %v5649_v10 }
 0x3c6   : > { %2119 = vmatprep.subr.bf16.mxu1 %v5065_v32  ;;  %v5072_v32 = vld [vmem:[%s5889_s17 + $0x540] ss:$8 sps:$4 sm:$0xff]  }
 0x3c7   : > { %v5315_v8 = vpop.eup %5314 }
 0x3c8   : > { %v1409_v11 = vmul.f32 %v5315_v8, %v6072_v23  ;;  %v5048_v23 = vld [vmem:[%s5889_s17 + $0x3a0] ss:$8 sps:$4 sm:$0xff]  }
 0x3c9   : > { %1829 = vmatpush2.bf16.msra.mxu0 %v5048_v23 }
 0x3ca   : > { %v1413_v16 = vpack.c.bf16 %v1409_v11, %v1409_v11  ;;  %1830 = vmatprep.subr.bf16.mxu0 %v5053_v26  ;;  %v5060_v26 = vld [vmem:[%s5889_s17 + $0x560] ss:$8 sps:$4 sm:$0xff]  }
 0x3cc   : > { %4698 = vmatmul.mubr.msk.bf16.vlgmr.msra.gmra.mxu1 %vm1365_vm1, %v1413_v16 }
 0x3cd   : > { %1831 = vmatpush2.bf16.msra.mxu0 %v5051_v25  ;;  %2120 = vmatpush1.bf16.msra.mxu1 %v5063_v31  ;;  %v5074_v31 = vld [vmem:[%s5889_s17 + $0x544] ss:$8 sps:$4 sm:$0xff]  }
 0x3ce   : > { %1832 = vmatprep.subr.bf16.mxu0 %v5056_v29  ;;  %2121 = vmatprep.subr.bf16.mxu1 %v5071_v9  ;;  %v5068_v29 = vld [vmem:[%s5889_s17 + $0x554] ss:$8 sps:$4 sm:$0xff]   ;;  %v5078_v9 = vld [vmem:[%s5889_s17 + $0x530] ss:$8 sps:$4 sm:$0xff]  }
 0x3cf   : > { %2151 = vmatprep.mubr.bf16.mxu1 %v5152_v60 }
 0x3d1   : > { %1833 = vmatpush2.bf16.msra.mxu0 %v5054_v28  ;;  %2122 = vmatpush1.bf16.msra.mxu1 %v5069_v33  ;;  %v5080_v33 = vld [vmem:[%s5889_s17 + $0x534] ss:$8 sps:$4 sm:$0xff]  }
 0x3d2   : > { %2363 = vmatprep.subr.bf16.mxu0 %v5059_v30  ;;  %2123 = vmatprep.subr.bf16.mxu1 %v5077_v35  ;;  %v5066_v30 = vld [vmem:[%s5889_s17 + $0x550] ss:$8 sps:$4 sm:$0xff]   ;;  %v5084_v35 = vld [vmem:[%s5889_s17 + $0x520] ss:$8 sps:$4 sm:$0xff]  }
 0x3d5   : > { %2124 = vmatpush1.bf16.msra.mxu1 %v5075_v34  ;;  %v5086_v34 = vld [vmem:[%s5889_s17 + $0x524] ss:$8 sps:$4 sm:$0xff]  }
 0x3d6   : > { %2125 = vmatprep.subr.bf16.mxu1 %v5083_v37  ;;  %v5090_v37 = vld [vmem:[%s5889_s17 + $0x510] ss:$8 sps:$4 sm:$0xff]  }
 0x3d9   : > { %2126 = vmatpush1.bf16.msra.mxu1 %v5081_v36  ;;  %v5092_v36 = vld [vmem:[%s5889_s17 + $0x514] ss:$8 sps:$4 sm:$0xff]  }
 0x3da   : > { %2127 = vmatprep.subr.bf16.mxu1 %v5089_v39  ;;  %v5096_v39 = vld [vmem:[%s5889_s17 + $0x500] ss:$8 sps:$4 sm:$0xff]  }
 0x3dd   : > { %2128 = vmatpush1.bf16.msra.mxu1 %v5087_v38  ;;  %v5098_v38 = vld [vmem:[%s5889_s17 + $0x504] ss:$8 sps:$4 sm:$0xff]  }
 0x3de   : > { %2129 = vmatprep.subr.bf16.mxu1 %v5095_v41  ;;  %v5102_v41 = vld [vmem:[%s5889_s17 + $0x5f0] ss:$8 sps:$4 sm:$0xff]  }
 0x3e1   : > { %2130 = vmatpush1.bf16.msra.mxu1 %v5093_v40  ;;  %v5104_v40 = vld [vmem:[%s5889_s17 + $0x5f4] ss:$8 sps:$4 sm:$0xff]  }
 0x3e2   : > { %2131 = vmatprep.subr.bf16.mxu1 %v5101_v43  ;;  %v5108_v43 = vld [vmem:[%s5889_s17 + $0x5e0] ss:$8 sps:$4 sm:$0xff]  }
 0x3e5   : > { %2132 = vmatpush1.bf16.msra.mxu1 %v5099_v42  ;;  %v5110_v42 = vld [vmem:[%s5889_s17 + $0x5e4] ss:$8 sps:$4 sm:$0xff]  }
 0x3e6   : > { %2133 = vmatprep.subr.bf16.mxu1 %v5107_v45  ;;  %v5114_v45 = vld [vmem:[%s5889_s17 + $0x5d0] ss:$8 sps:$4 sm:$0xff]  }
 0x3e9   : > { %2134 = vmatpush1.bf16.msra.mxu1 %v5105_v44  ;;  %v5116_v44 = vld [vmem:[%s5889_s17 + $0x5d4] ss:$8 sps:$4 sm:$0xff]  }
 0x3ea   : > { %2135 = vmatprep.subr.bf16.mxu1 %v5113_v47  ;;  %v5120_v47 = vld [vmem:[%s5889_s17 + $0x5c0] ss:$8 sps:$4 sm:$0xff]  }
 0x3ed   : > { %2136 = vmatpush2.bf16.msra.mxu1 %v5111_v46  ;;  %v5122_v46 = vld [vmem:[%s5889_s17 + $0x5c4] ss:$8 sps:$4 sm:$0xff]  }
 0x3ee   : > { %2137 = vmatprep.subr.bf16.mxu1 %v5119_v49  ;;  %v5126_v49 = vld [vmem:[%s5889_s17 + $0x5b0] ss:$8 sps:$4 sm:$0xff]  }
 0x3f1   : > { %2138 = vmatpush2.bf16.msra.mxu1 %v5117_v48  ;;  %v5128_v48 = vld [vmem:[%s5889_s17 + $0x5b4] ss:$8 sps:$4 sm:$0xff]  }
 0x3f2   : > { %2139 = vmatprep.subr.bf16.mxu1 %v5125_v51  ;;  %v5132_v51 = vld [vmem:[%s5889_s17 + $0x5a0] ss:$8 sps:$4 sm:$0xff]  }
 0x3f5   : > { %2140 = vmatpush2.bf16.msra.mxu1 %v5123_v50  ;;  %v5134_v50 = vld [vmem:[%s5889_s17 + $0x5a4] ss:$8 sps:$4 sm:$0xff]  }
 0x3f6   : > { %2141 = vmatprep.subr.bf16.mxu1 %v5131_v53  ;;  %v5138_v53 = vld [vmem:[%s5889_s17 + $0x590] ss:$8 sps:$4 sm:$0xff]  }
 0x3f9   : > { %2142 = vmatpush2.bf16.msra.mxu1 %v5129_v52  ;;  %v5140_v52 = vld [vmem:[%s5889_s17 + $0x594] ss:$8 sps:$4 sm:$0xff]  }
 0x3fa   : > { %2143 = vmatprep.subr.bf16.mxu1 %v5137_v55  ;;  %v5144_v55 = vld [vmem:[%s5889_s17 + $0x580] ss:$8 sps:$4 sm:$0xff]  }
 0x3fd   : > { %2144 = vmatpush2.bf16.msra.mxu1 %v5135_v54  ;;  %v5146_v54 = vld [vmem:[%s5889_s17 + $0x584] ss:$8 sps:$4 sm:$0xff]  }
 0x3fe   : > { %2145 = vmatprep.subr.bf16.mxu1 %v5143_v57 }
 0x401   : > { %2146 = vmatpush2.bf16.msra.mxu1 %v5141_v56  ;;  %v6202_v56 = vsub.s32 3, %v5974_v12 }
 0x402   : > { %2147 = vmatprep.subr.bf16.mxu1 %v5149_v59 }
 0x403   : > { %v1637_v57 = vrot.slane %v5980_v14, %v6202_v56 }
 0x405   : > { %2148 = vmatpush2.bf16.msra.mxu1 %v5147_v58  ;;  %v1641_v58 = vrot.slane %v5991_v27, %v6202_v56 }
 0x406   : > { %2149 = vmatprep.subr.bf16.mxu1 %v5155_v62 }
 0x409   : > { %2150 = vmatpush2.bf16.msra.mxu1 %v5153_v61 }
 0x40c   : > { %2152 = vmatmul.mubr.bf16.vlgmr.msra.gmra.mxu1 %v6163_v0 }
 0x474   : > { %v1455_v1 = vpop.f32.mrf.mxu1 }
 0x476   : > { %v4681_v2 = vpop.f32.mrf.mxu1 }
 0x477   : > { %v5344_v2 = vld [vmem:[#allocation2 + $0x10] sm:$0xff] }
 0x478   : > { %v1458_v3 = vpop.f32.mrf.mxu1 }
 0x479   : > { %v5345_v3 = vld [vmem:[#allocation2] sm:$0xff] }
 0x47a   : > { %v4682_v4 = vpop.f32.mrf.mxu1 }
 0x47c   : > { %v1501_v5 = vpop.f32.mrf.mxu1 }
 0x47d   : > { %v1599_v22 = vpack.c.bf16 %v1501_v5, %v1455_v1 }
 0x47e   : > { %v4687_v6 = vpop.f32.mrf.mxu1 }
 0x480   : > { %v1504_v7 = vpop.f32.mrf.mxu1 }
 0x482   : > { %v4688_v8 = vpop.f32.mrf.mxu1 }
 0x484   : > { %v1547_v11 = vpop.f32.mrf.mxu1 }
 0x486   : > { %v4693_v16 = vpop.f32.mrf.mxu1 }
 0x488   : > { %v1550_v17 = vpop.f32.mrf.mxu1 }
 0x489   : > { %v5347_v17 = vld [vmem:[#allocation2 + $0x8] sm:$0xff] }
 0x48a   : > { %v4694_v18 = vpop.f32.mrf.mxu1 }
 0x48c   : > { %v1593_v19 = vpop.f32.mrf.mxu1 }
 0x48d   : > { %v1600_v20 = vpack.c.bf16 %v1593_v19, %v1547_v11  ;;  %v5346_v11 = vld [vmem:[#allocation2 + $0x18] sm:$0xff] }
 0x48e   : > { %v4699_v23 = vpop.f32.mrf.mxu1 }
 0x48f   : > { %1834 = vmatprep.mubr.bf16.mxu0 %v1600_v20  ;;  %v5156_v20 = vld [vmem:[%s5889_s17 + $0x670] ss:$8 sps:$4 sm:$0xff]   ;;  %v5159_v23 = vld [vmem:[%s5889_s17 + $0x660] ss:$8 sps:$4 sm:$0xff]  }
 0x490   : > { %v1596_v25 = vpop.f32.mrf.mxu1  ;;  %1835 = vmatmul.mubr.bf16.vlgmr.msra.gmra.mxu0 %v1599_v22  ;;  %v5161_v22 = vld [vmem:[%s5889_s17 + $0x664] ss:$8 sps:$4 sm:$0xff]  }
 0x491   : > { %2364 = vmatpush1.bf16.msra.mxu0 %v5057_v21  ;;  %2395 = vmatprep.mubr.bf16.mxu0 %v5152_v60  ;;  %v5158_v21 = vld [vmem:[%s5889_s17 + $0x674] ss:$8 sps:$4 sm:$0xff]   ;;  %v5162_v25 = vld [vmem:[%s5889_s17 + $0x650] ss:$8 sps:$4 sm:$0xff]  }
 0x492   : > { %v4700_v28 = vpop.f32.mrf.mxu1  ;;  %2365 = vmatprep.subr.bf16.mxu0 %v5062_v24  ;;  %2607 = vmatprep.subr.bf16.mxu1 %v5158_v21  ;;  %v5164_v24 = vld [vmem:[%s5889_s17 + $0x654] ss:$8 sps:$4 sm:$0xff]   ;;  %v5195_v21 = vld [vmem:[%s5889_s17 + $0x6a0] ss:$8 sps:$4 sm:$0xff]  }
 0x493   : > { %2608 = vmatpush1.bf16.msra.mxu1 %v5156_v20  ;;  %v6224_v28 = vsub.s32 4, %v5974_v12  ;;  %v5197_v20 = vld [vmem:[%s5889_s17 + $0x6a4] ss:$8 sps:$4 sm:$0xff]  }
 0x494   : > { %2609 = vmatprep.subr.bf16.mxu1 %v5161_v22  ;;  %v5200_v22 = vld [vmem:[%s5889_s17 + $0x694] ss:$8 sps:$4 sm:$0xff]  }
 0x495   : > { %2366 = vmatpush1.bf16.msra.mxu0 %v5060_v26  ;;  %v6221_v26 = vsub.s32 5, %v5974_v12 }
 0x496   : > { %2367 = vmatprep.subr.bf16.mxu0 %v5068_v29 }
 0x497   : > { %2610 = vmatpush1.bf16.msra.mxu1 %v5159_v23  ;;  %v6228_v29 = vrot.slane %v5980_v14, %v6221_v26  ;;  %v5198_v23 = vld [vmem:[%s5889_s17 + $0x690] ss:$8 sps:$4 sm:$0xff]  }
 0x498   : > { %2611 = vmatprep.subr.bf16.mxu1 %v5164_v24  ;;  %v5203_v24 = vld [vmem:[%s5889_s17 + $0x684] ss:$8 sps:$4 sm:$0xff]  }
 0x499   : > { %2368 = vmatpush1.bf16.msra.mxu0 %v5066_v30 }
 0x49a   : > { %2369 = vmatprep.subr.bf16.mxu0 %v5074_v31  ;;  %v6232_v31 = vrot.slane %v5980_v14, %v6224_v28 }
 0x49b   : > { %2612 = vmatpush1.bf16.msra.mxu1 %v5162_v25  ;;  %v5201_v25 = vld [vmem:[%s5889_s17 + $0x680] ss:$8 sps:$4 sm:$0xff]  }
 0x49d   : > { %2370 = vmatpush1.bf16.msra.mxu0 %v5072_v32 }
 0x49e   : > { %2371 = vmatprep.subr.bf16.mxu0 %v5080_v33 }
 0x4a1   : > { %2372 = vmatpush1.bf16.msra.mxu0 %v5078_v9  ;;  %v6237_v9 = vrot.slane %v5991_v27, %v6221_v26 }
 0x4a2   : > { %2373 = vmatprep.subr.bf16.mxu0 %v5086_v34 }
 0x4a5   : > { %2374 = vmatpush1.bf16.msra.mxu0 %v5084_v35 }
 0x4a6   : > { %2375 = vmatprep.subr.bf16.mxu0 %v5092_v36 }
 0x4a9   : > { %2376 = vmatpush1.bf16.msra.mxu0 %v5090_v37 }
 0x4aa   : > { %2377 = vmatprep.subr.bf16.mxu0 %v5098_v38  ;;  %v6244_v38 = vrot.slane %v5991_v27, %v6224_v28  ;;  %v5165_v27 = vld [vmem:[%s5889_s17 + $0x640] ss:$8 sps:$4 sm:$0xff]  }
 0x4ad   : > { %2378 = vmatpush1.bf16.msra.mxu0 %v5096_v39 }
 0x4ae   : > { %2379 = vmatprep.subr.bf16.mxu0 %v5104_v40 }
 0x4b1   : > { %2380 = vmatpush2.bf16.msra.mxu0 %v5102_v41 }
 0x4b2   : > { %2381 = vmatprep.subr.bf16.mxu0 %v5110_v42 }
 0x4b5   : > { %2382 = vmatpush2.bf16.msra.mxu0 %v5108_v43  ;;  %v5167_v43 = vld [vmem:[%s5889_s17 + $0x644] ss:$8 sps:$4 sm:$0xff]  }
 0x4b6   : > { %2383 = vmatprep.subr.bf16.mxu0 %v5116_v44  ;;  %2613 = vmatprep.subr.bf16.mxu1 %v5167_v43 }
 0x4b7   : > { %2614 = vmatpush1.bf16.msra.mxu1 %v5165_v27 }
 0x4b9   : > { %2384 = vmatpush2.bf16.msra.mxu0 %v5114_v45  ;;  %v5168_v45 = vld [vmem:[%s5889_s17 + $0x630] ss:$8 sps:$4 sm:$0xff]  }
 0x4ba   : > { %2385 = vmatprep.subr.bf16.mxu0 %v5122_v46  ;;  %v5170_v46 = vld [vmem:[%s5889_s17 + $0x634] ss:$8 sps:$4 sm:$0xff]  }
 0x4bb   : > { %2615 = vmatprep.subr.bf16.mxu1 %v5170_v46 }
 0x4bc   : > { %2616 = vmatpush1.bf16.msra.mxu1 %v5168_v45 }
 0x4bd   : > { %2386 = vmatpush2.bf16.msra.mxu0 %v5120_v47 }
 0x4be   : > { %2387 = vmatprep.subr.bf16.mxu0 %v5128_v48 }
 0x4c1   : > { %2388 = vmatpush2.bf16.msra.mxu0 %v5126_v49 }
 0x4c2   : > { %2389 = vmatprep.subr.bf16.mxu0 %v5134_v50 }
 0x4c5   : > { %2390 = vmatpush2.bf16.msra.mxu0 %v5132_v51  ;;  %v5171_v51 = vld [vmem:[%s5889_s17 + $0x620] ss:$8 sps:$4 sm:$0xff]  }
 0x4c6   : > { %2391 = vmatprep.subr.bf16.mxu0 %v5140_v52  ;;  %v5173_v52 = vld [vmem:[%s5889_s17 + $0x624] ss:$8 sps:$4 sm:$0xff]  }
 0x4c7   : > { %2617 = vmatprep.subr.bf16.mxu1 %v5173_v52 }
 0x4c8   : > { %2618 = vmatpush1.bf16.msra.mxu1 %v5171_v51  ;;  %v6309_v51 = vld [vmem:[%s5895_s20 + $0x18] sm:$0xff] }
 0x4c9   : > { %2392 = vmatpush2.bf16.msra.mxu0 %v5138_v53 }
 0x4ca   : > { %2393 = vmatprep.subr.bf16.mxu0 %v5146_v54 }
 0x4cc   : > { %v2153_v33 = vpop.f32.mrf.mxu1 }
 0x4cd   : > { %2394 = vmatpush2.bf16.msra.mxu0 %v5144_v55  ;;  %v2154_v36 = vadd.f32 %v2153_v33, %v6232_v31 }
 0x4ce   : > { %4701 = vmatprep.subr.bf16.mxu0 %v5649_v10  ;;  %v2155_v40 = vpop.f32.mrf.mxu1 }
 0x4cf   : > { %v2650_v14 = vpack.c.bf16 %v2154_v36, %v2154_v36  ;;  %v2156_v41 = vadd.f32 %v2155_v40, %v6244_v38 }
 0x4d0   : > { %2396 = vmatmul.mubr.bf16.vlgmr.msra.gmra.mxu0 %v6163_v0 }
 0x4d1   : > { %4703 = vmatprep.mubr.msk.bf16.mxu0 %vm5650_vm0, %v5649_v10  ;;  %v2652_v42 = vpack.c.bf16 %v2156_v41, %v2156_v41 }
 0x550   : > { %v1836_v59 = vpop.f32.mrf.mxu0 }
 0x551   : > { %v1837_v60 = vadd.f32 %v1836_v59, %v1637_v57 }
 0x552   : > { %v1838_v61 = vpop.f32.mrf.mxu0 }
 0x553   : > { %v1839_v62 = vadd.f32 %v1838_v61, %v1641_v58  ;;  %v1845_v0 = vadd.f32 %v5344_v2, %v1837_v60  ;;  %v5174_v61 = vld [vmem:[%s5889_s17 + $0x610] ss:$8 sps:$4 sm:$0xff]  }
 0x554   : > { %v1840_v1 = vpop.f32.mrf.mxu0 }
 0x555   : > { %v1846_v4 = vadd.f32 %v5345_v3, %v1839_v62  ;;  %v1841_v5 = vadd.f32 %v1840_v1, %v1637_v57  ;;  %v5176_v57 = vld [vmem:[%s5889_s17 + $0x614] ss:$8 sps:$4 sm:$0xff]   ;;  %v5179_v62 = vld [vmem:[%s5889_s17 + $0x604] ss:$8 sps:$4 sm:$0xff]   ;;  %v5177_v3 = vld [vmem:[%s5889_s17 + $0x600] ss:$8 sps:$4 sm:$0xff]  }
 0x556   : > { %v1842_v6 = vpop.f32.mrf.mxu0  ;;  %2619 = vmatprep.subr.bf16.mxu1 %v5176_v57 }
 0x557   : > { %v1843_v7 = vadd.f32 %v1842_v6, %v1641_v58  ;;  %v1849_v8 = vadd.f32 %v1846_v4, %v1845_v0  ;;  %v6208_v16 = vadd.f32 %v5346_v11, %v1841_v5  ;;  %2620 = vmatpush1.bf16.msra.mxu1 %v5174_v61  ;;  %v5180_v5 = vld [vmem:[%s5889_s17 + $0x6f0] ss:$8 sps:$4 sm:$0xff]   ;;  %v5185_v6 = vld [vmem:[%s5889_s17 + $0x6e4] ss:$8 sps:$4 sm:$0xff]   ;;  %v1901_v61 = vrot.slane %v6309_v51, %v6051_v63 }
 0x558   : > { %2621 = vmatprep.subr.bf16.mxu1 %v5179_v62  ;;  %v5186_v11 = vld [vmem:[%s5889_s17 + $0x6d0] ss:$8 sps:$4 sm:$0xff]  }
 0x559   : > { %v6210_v18 = vadd.f32 %v5347_v17, %v1843_v7  ;;  %1850 = vadd.xlane.f32.xlu0 %v1849_v8  ;;  %v5183_v7 = vld [vmem:[%s5889_s17 + $0x6e0] ss:$8 sps:$4 sm:$0xff]   ;;  %v5188_v8 = vld [vmem:[%s5889_s17 + $0x6d4] ss:$8 sps:$4 sm:$0xff]   ;;  %v5191_v17 = vld [vmem:[%s5889_s17 + $0x6c4] ss:$8 sps:$4 sm:$0xff]  }
 0x55b   : > { %v1852_v19 = vadd.f32 %v6210_v18, %v6208_v16  ;;  %2622 = vmatpush1.bf16.msra.mxu1 %v5177_v3 }
 0x55d   : > { %1853 = vadd.xlane.f32.xlu1 %v1852_v19  ;;  %v5192_v19 = vld [vmem:[%s5889_s17 + $0x6b0] ss:$8 sps:$4 sm:$0xff]  }
 0x590   : > { %v2397_v30 = vpop.f32.mrf.mxu0 }
 0x591   : > { %v2398_v32 = vadd.f32 %v2397_v30, %v6228_v29 }
 0x592   : > { %v2399_v34 = vpop.f32.mrf.mxu0 }
 0x593   : > { %v2654_v35 = vpack.c.bf16 %v2398_v32, %v2398_v32  ;;  %v2400_v37 = vadd.f32 %v2399_v34, %v6237_v9 }
 0x594   : > { %v2401_v30 = vpop.f32.mrf.mxu0 }
 0x595   : > { %4702 = vmatpush3.bf16.xpose.msra.mxu0 %v2654_v35  ;;  %v2656_v39 = vpack.c.bf16 %v2400_v37, %v2400_v37 }
 0x596   : > { %4713 = vmatprep.subr.bf16.mxu0 %v5649_v10  ;;  %v2403_v32 = vpop.f32.mrf.mxu0 }
 0x59c   : > { %4704 = vmatmul.mubr.bf16.vlgmr.msra.gmra.mxu0 %v2650_v14 }
 0x59d   : > { %4714 = vmatpush3.bf16.xpose.msra.mxu0 %v2656_v39  ;;  %4715 = vmatprep.mubr.msk.bf16.mxu0 %vm5650_vm0, %v5649_v10 }
 0x59e   : > { %4725 = vmatprep.subr.bf16.mxu0 %v5649_v10 }
 0x5a4   : > { %4716 = vmatmul.mubr.bf16.vlgmr.msra.gmra.mxu0 %v2652_v42 }
 0x5a5   : > { %4727 = vmatprep.mubr.msk.bf16.mxu0 %vm5650_vm0, %v5649_v10 }
 0x5e2   : > { %v1851_v44 = vpop.xlane.xlu0 %1850 }
 0x5e3   : > { %v1856_v47 = vmul.f32 0.00390625, %v1851_v44 }
 0x5e5   : > { %v6256_v48 = vsub.f32 %v1845_v0, %v1856_v47  ;;  %v6258_v49 = vsub.f32 %v1846_v4, %v1856_v47  ;;  %v5182_v4 = vld [vmem:[%s5889_s17 + $0x6f4] ss:$8 sps:$4 sm:$0xff]  }
 0x5e6   : > { %v1854_v50 = vpop.xlane.xlu1 %1853  ;;  %2623 = vmatprep.subr.bf16.mxu1 %v5182_v4 }
 0x5e7   : > { %v1857_v53 = vmul.f32 0.00390625, %v1854_v50  ;;  %v1862_v54 = vmul.f32 %v6256_v48, %v6256_v48  ;;  %v1863_v55 = vmul.f32 %v6258_v49, %v6258_v49  ;;  %2624 = vmatpush2.bf16.msra.mxu1 %v5180_v5  ;;  %v6306_v50 = vld [vmem:[%s5895_s20 + $0x10] sm:$0xff] }
 0x5e8   : > { %2625 = vmatprep.subr.bf16.mxu1 %v5185_v6  ;;  %v1885_v57 = vrot.slane %v6306_v50, %v5977_v13  ;;  %v1897_v62 = vrot.slane %v6306_v50, %v6051_v63 }
 0x5e9   : > { %v6268_v58 = vsub.f32 %v6208_v16, %v1857_v53  ;;  %v6271_v59 = vsub.f32 %v6210_v18, %v1857_v53  ;;  %v1866_v60 = vadd.f32 %v1863_v55, %v1862_v54  ;;  %v5189_v16 = vld [vmem:[%s5889_s17 + $0x6c0] ss:$8 sps:$4 sm:$0xff]   ;;  %v5194_v18 = vld [vmem:[%s5889_s17 + $0x6b4] ss:$8 sps:$4 sm:$0xff]   ;;  %v1889_v54 = vrot.slane %v6309_v51, %v5977_v13 }
 0x5eb   : > { %1867 = vadd.xlane.f32.xlu0 %v1866_v60  ;;  %v1864_v1 = vmul.f32 %v6268_v58, %v6268_v58  ;;  %v1865_v2 = vmul.f32 %v6271_v59, %v6271_v59  ;;  %2626 = vmatpush2.bf16.msra.mxu1 %v5183_v7 }
 0x5ec   : > { %2627 = vmatprep.subr.bf16.mxu1 %v5188_v8  ;;  %v2157_v8 = vpop.f32.mrf.mxu1 }
 0x5ed   : > { %v1869_v0 = vadd.f32 %v1865_v2, %v1864_v1 }
 0x5ef   : > { %1870 = vadd.xlane.f32.xlu1 %v1869_v0  ;;  %2628 = vmatpush2.bf16.msra.mxu1 %v5186_v11  ;;  %v2404_v11 = vadd.f32 %v2403_v32, %v6237_v9 }
 0x5f0   : > { %2629 = vmatprep.subr.bf16.mxu1 %v5191_v17 }
 0x5f1   : > { %v2657_v17 = vpack.c.bf16 %v2404_v11, %v2404_v11 }
 0x5f3   : > { %2630 = vmatpush2.bf16.msra.mxu1 %v5189_v16 }
 0x5f4   : > { %2631 = vmatprep.subr.bf16.mxu1 %v5194_v18  ;;  %v2159_v18 = vpop.f32.mrf.mxu1 }
 0x5f7   : > { %2632 = vmatpush2.bf16.msra.mxu1 %v5192_v19  ;;  %v2160_v19 = vadd.f32 %v2159_v18, %v6244_v38 }
 0x5f8   : > { %2633 = vmatprep.subr.bf16.mxu1 %v5197_v20 }
 0x5f9   : > { %v2653_v20 = vpack.c.bf16 %v2160_v19, %v2160_v19 }
 0x5fb   : > { %2634 = vmatpush2.bf16.msra.mxu1 %v5195_v21 }
 0x5fc   : > { %2635 = vmatprep.subr.bf16.mxu1 %v5200_v22 }
 0x5ff   : > { %2636 = vmatpush2.bf16.msra.mxu1 %v5198_v23 }
 0x600   : > { %2637 = vmatprep.subr.bf16.mxu1 %v5203_v24 }
 0x603   : > { %2638 = vmatpush2.bf16.msra.mxu1 %v5201_v25 }
 0x604   : > { %4707 = vmatprep.subr.bf16.mxu1 %v5649_v10 }
 0x65c   : > { %v6297_v33 = vpop.f32.mrf.mxu0 }
 0x65d   : > { %v2822_v34 = vsel %vm1365_vm1, %v6297_v33, -inf }
 0x65e   : > { %2823 = vmax.xlane.f32.xlu0 %v2822_v34  ;;  %v4705_v35 = vpop.f32.mrf.mxu0  ;;  %v6352_v34 = vsub.s32 6, %v5974_v12 }
 0x660   : > { %v2699_v36 = vpop.f32.mrf.mxu0 }
 0x662   : > { %v4706_v37 = vpop.f32.mrf.mxu0 }
 0x664   : > { %v6301_v14 = vpop.f32.mrf.mxu0 }
 0x665   : > { %v2828_v39 = vsel %vm1365_vm1, %v6301_v14, -inf }
 0x666   : > { %2829 = vmax.xlane.f32.xlu0 %v2828_v39  ;;  %v4717_v40 = vpop.f32.mrf.mxu0 }
 0x668   : > { %v2779_v41 = vpop.f32.mrf.mxu0 }
 0x66a   : > { %v4718_v42 = vpop.f32.mrf.mxu0 }
 0x66b   : > { %v6361_v42 = vld [vmem:[%s5895_s20 + $0x8] sm:$0xff] }
 0x674   : > { %v1868_v27 = vpop.xlane.xlu0 %1867 }
 0x675   : > { %v1872_v43 = vmul.f32 0.00390625, %v1868_v27  ;;  %v2446_v27 = vrot.slane %v6361_v42, %v6352_v34 }
 0x677   : > { %v1874_v44 = vadd.f32 1e-05, %v1872_v43 }
 0x678   : > { %v1871_v45 = vpop.xlane.xlu1 %1870 }
 0x679   : > { %5316 = vrsqrt.f32 %v1874_v44  ;;  %v1873_v46 = vmul.f32 0.00390625, %v1871_v45 }
 0x67b   : > { %v1875_v47 = vadd.f32 1e-05, %v1873_v46 }
 0x67d   : > { %5318 = vrsqrt.f32 %v1875_v47 }
 0x686   : > { %v5317_v52 = vpop.eup %5316 }
 0x687   : > { %v1879_v53 = vmul.f32 %v5317_v52, %v6258_v49  ;;  %v1878_v55 = vmul.f32 %v5317_v52, %v6256_v48  ;;  %v2402_v48 = vadd.f32 %v2401_v30, %v6228_v29  ;;  %v2158_v29 = vadd.f32 %v2157_v8, %v6232_v31 }
 0x689   : > { %v1891_v2 = vmul.f32 %v1889_v54, %v1879_v53  ;;  %v1890_v0 = vmul.f32 %v1885_v57, %v1878_v55  ;;  %v2651_v16 = vpack.c.bf16 %v2158_v29, %v2158_v29 }
 0x68a   : > { %v5319_v60 = vpop.eup %5318 }
 0x68b   : > { %v1881_v1 = vmul.f32 %v5319_v60, %v6271_v59  ;;  %v1880_v49 = vmul.f32 %v5319_v60, %v6268_v58  ;;  %v6324_v5 = vadd.f32 %v1901_v61, %v1891_v2  ;;  %v6328_v6 = vadd.f32 %v1897_v62, %v1890_v0 }
 0x68c   : > { %v2655_v58 = vpack.c.bf16 %v2402_v48, %v2402_v48 }
 0x68d   : > { %v1893_v3 = vmul.f32 %v1889_v54, %v1881_v1  ;;  %v1892_v4 = vmul.f32 %v1885_v57, %v1880_v49 }
 0x68f   : > { %v6326_v13 = vadd.f32 %v1901_v61, %v1893_v3  ;;  %v6330_v7 = vadd.f32 %v1897_v62, %v1892_v4 }
 0x691   : > { %v1907_v63 = vpack.c.bf16 %v6326_v13, %v6324_v5  ;;  %v1906_v59 = vpack.c.bf16 %v6330_v7, %v6328_v6 }
 0x693   : > { %2639 = vmatprep.mubr.bf16.mxu1 %v1907_v63 }
 0x694   : > { %2640 = vmatmul.mubr.bf16.vlgmr.msra.gmra.mxu1 %v1906_v59 }
 0x695   : > { %4708 = vmatpush3.bf16.xpose.msra.mxu1 %v2655_v58  ;;  %4709 = vmatprep.mubr.msk.bf16.mxu1 %vm5650_vm0, %v5649_v10 }
 0x696   : > { %4719 = vmatprep.subr.bf16.mxu1 %v5649_v10 }
 0x69c   : > { %4710 = vmatmul.mubr.bf16.vlgmr.msra.gmra.mxu1 %v2651_v16 }
 0x69d   : > { %4720 = vmatpush3.bf16.xpose.msra.mxu1 %v2657_v17  ;;  %4721 = vmatprep.mubr.msk.bf16.mxu1 %vm5650_vm0, %v5649_v10 }
 0x69e   : > { %4731 = vmatprep.subr.bf16.mxu1 %v5649_v10 }
 0x6a4   : > { %4722 = vmatmul.mubr.bf16.vlgmr.msra.gmra.mxu1 %v2653_v20 }
 0x6a5   : > { %4733 = vmatprep.mubr.msk.bf16.mxu1 %vm5650_vm0, %v5649_v10 }
 0x6e7   : > { %v2824_v31 = vpop.xlane.xlu0 %2823 }
 0x6e8   : > { %v2834_v9 = vsub.f32 %v6297_v33, %v2824_v31  ;;  %v6355_v33 = vld [vmem:[%s5895_s20] sm:$0xff] }
 0x6e9   : > { %v2442_v35 = vrot.slane %v6355_v33, %v6352_v34 }
 0x6ea   : > { %v2838_v21 = vmul.f32 1.442695, %v2834_v9 }
 0x6ec   : > { %5320 = vpow2.f32 %v2838_v21 }
 0x6ef   : > { %v2830_v22 = vpop.xlane.xlu0 %2829 }
 0x6f0   : > { %v2836_v23 = vsub.f32 %v6301_v14, %v2830_v22 }
 0x6f2   : > { %v2842_v24 = vmul.f32 1.442695, %v2836_v23 }
 0x6f4   : > { %5322 = vpow2.f32 %v2842_v24  ;;  %v5204_v24 = vld [vmem:[%s5889_s17 + $0x770] ss:$8 sps:$4 sm:$0xff]  }
 0x6f9   : > { %v5321_v38 = vpop.eup %5320 }
 0x6fa   : > { %v2846_v25 = vsel %vm1365_vm1, %v5321_v38, 0.0 }
 0x6fb   : > { %2847 = vadd.xlane.f32.xlu0 %v2846_v25  ;;  %v5209_v25 = vld [vmem:[%s5889_s17 + $0x764] ss:$8 sps:$4 sm:$0xff]  }
 0x701   : > { %v5323_v30 = vpop.eup %5322 }
 0x702   : > { %v2852_v32 = vsel %vm1365_vm1, %v5323_v30, 0.0 }
 0x703   : > { %2853 = vadd.xlane.f32.xlu0 %v2852_v32  ;;  %v5212_v32 = vld [vmem:[%s5889_s17 + $0x754] ss:$8 sps:$4 sm:$0xff]  }
 0x754   : > { %v2641_v36 = vpop.f32.mrf.mxu1 }
 0x755   : > { %v2642_v37 = vadd.f32 %v2641_v36, %v2442_v35  ;;  %v5215_v36 = vld [vmem:[%s5889_s17 + $0x744] ss:$8 sps:$4 sm:$0xff]  }
 0x756   : > { %v2643_v14 = vpop.f32.mrf.mxu1 }
 0x757   : > { %v2658_v39 = vpack.c.bf16 %v2642_v37, %v2642_v37  ;;  %v2644_v3 = vadd.f32 %v2643_v14, %v2446_v27  ;;  %v5213_v37 = vld [vmem:[%s5889_s17 + $0x740] ss:$8 sps:$4 sm:$0xff]   ;;  %v5218_v14 = vld [vmem:[%s5889_s17 + $0x734] ss:$8 sps:$4 sm:$0xff]  }
 0x758   : > { %v2645_v40 = vpop.f32.mrf.mxu1 }
 0x759   : > { %v2874_v41 = vsel %vm1417_vm2, %v2658_v39, 0  ;;  %v2646_v43 = vadd.f32 %v2645_v40, %v2442_v35  ;;  %v2660_v48 = vpack.c.bf16 %v2644_v3, %v2644_v3  ;;  %v5210_v35 = vld [vmem:[%s5889_s17 + $0x750] ss:$8 sps:$4 sm:$0xff]   ;;  %v5221_v40 = vld [vmem:[%s5889_s17 + $0x724] ss:$8 sps:$4 sm:$0xff]  }
 0x75a   : > { %v2647_v44 = vpop.f32.mrf.mxu1  ;;  %4726 = vmatpush3.bf16.msra.mxu0 %v2874_v41  ;;  %v5216_v39 = vld [vmem:[%s5889_s17 + $0x730] ss:$8 sps:$4 sm:$0xff]   ;;  %v5219_v41 = vld [vmem:[%s5889_s17 + $0x720] ss:$8 sps:$4 sm:$0xff]  }
 0x75b   : > { %v2659_v45 = vpack.c.bf16 %v2646_v43, %v2646_v43  ;;  %v6365_v46 = vadd.f32 %v2647_v44, %v2446_v27  ;;  %4737 = vmatprep.subr.bf16.mxu0 %v5649_v10  ;;  %v2966_v58 = vsel %vm1417_vm2, %v2660_v48, 0  ;;  %v5224_v27 = vld [vmem:[%s5889_s17 + $0x714] ss:$8 sps:$4 sm:$0xff]   ;;  %v5222_v43 = vld [vmem:[%s5889_s17 + $0x710] ss:$8 sps:$4 sm:$0xff]  }
 0x75c   : > { %v2736_v47 = vpop.f32.mrf.mxu1  ;;  %v5227_v44 = vld [vmem:[%s5889_s17 + $0x704] ss:$8 sps:$4 sm:$0xff]  }
 0x75d   : > { %v2920_v52 = vsel %vm1417_vm2, %v2659_v45, 0  ;;  %v2825_v53 = vsel %vm1365_vm1, %v2736_v47, -inf  ;;  %v5225_v45 = vld [vmem:[%s5889_s17 + $0x700] ss:$8 sps:$4 sm:$0xff]  }
 0x75e   : > { %4732 = vmatpush3.bf16.msra.mxu1 %v2920_v52  ;;  %2826 = vmax.xlane.f32.xlu1 %v2825_v53  ;;  %v4711_v54 = vpop.f32.mrf.mxu1  ;;  %v5228_v52 = vld [vmem:[%s5889_s17 + $0x7f0] ss:$8 sps:$4 sm:$0xff]   ;;  %v5233_v53 = vld [vmem:[%s5889_s17 + $0x7e4] ss:$8 sps:$4 sm:$0xff]  }
 0x75f   : > { %4743 = vmatprep.subr.bf16.mxu1 %v5649_v10  ;;  %v5231_v54 = vld [vmem:[%s5889_s17 + $0x7e0] ss:$8 sps:$4 sm:$0xff]  }
 0x760   : > { %v2739_v55 = vpop.f32.mrf.mxu1 }
 0x761   : > { %v5236_v55 = vld [vmem:[%s5889_s17 + $0x7d4] ss:$8 sps:$4 sm:$0xff]  }
 0x762   : > { %v4712_v57 = vpop.f32.mrf.mxu1 }
 0x763   : > { %v5234_v57 = vld [vmem:[%s5889_s17 + $0x7d0] ss:$8 sps:$4 sm:$0xff]  }
 0x764   : > { %v2816_v60 = vpop.f32.mrf.mxu1 }
 0x765   : > { %v2831_v61 = vsel %vm1365_vm1, %v2816_v60, -inf }
 0x766   : > { %2832 = vmax.xlane.f32.xlu1 %v2831_v61  ;;  %v4723_v62 = vpop.f32.mrf.mxu1  ;;  %v5237_v61 = vld [vmem:[%s5889_s17 + $0x7c0] ss:$8 sps:$4 sm:$0xff]  }
 0x767   : > { %v5242_v62 = vld [vmem:[%s5889_s17 + $0x7b4] ss:$8 sps:$4 sm:$0xff]  }
 0x768   : > { %v2819_v1 = vpop.f32.mrf.mxu1 }
 0x769   : > { %v5240_v1 = vld [vmem:[%s5889_s17 + $0x7b0] ss:$8 sps:$4 sm:$0xff]  }
 0x76a   : > { %v4724_v2 = vpop.f32.mrf.mxu1 }
 0x784   : > { %v2848_v49 = vpop.xlane.xlu0 %2847 }
 0x785   : > { %5324 = vrcp.f32 %v2848_v49 }
 0x78c   : > { %v2854_v0 = vpop.xlane.xlu0 %2853 }
 0x78d   : > { %5326 = vrcp.f32 %v2854_v0 }
 0x792   : > { %v5325_v4 = vpop.eup %5324 }
 0x793   : > { %v2862_v63 = vmul.f32 %v5325_v4, %v5321_v38  ;;  %v5206_v38 = vld [vmem:[%s5889_s17 + $0x774] ss:$8 sps:$4 sm:$0xff]  }
 0x795   : > { %v2866_v59 = vpack.c.bf16 %v2862_v63, %v2862_v63 }
 0x797   : > { %4728 = vmatmul.mubr.msk.bf16.vlgmr.msra.gmra.mxu0 %vm1365_vm1, %v2866_v59 }
 0x798   : > { %4738 = vmatpush3.bf16.msra.mxu0 %v2966_v58  ;;  %4739 = vmatprep.mubr.msk.bf16.mxu0 %vm5650_vm0, %v5649_v10 }
 0x799   : > { %3257 = vmatprep.subr.bf16.mxu0 %v5206_v38  ;;  %v5249_v38 = vld [vmem:[%s5889_s17 + $0x780] ss:$8 sps:$4 sm:$0xff]  }
 0x79a   : > { %v5327_v8 = vpop.eup %5326 }
 0x79b   : > { %v2864_v29 = vmul.f32 %v5327_v8, %v5323_v30  ;;  %v5207_v30 = vld [vmem:[%s5889_s17 + $0x760] ss:$8 sps:$4 sm:$0xff]  }
 0x79d   : > { %v2868_v11 = vpack.c.bf16 %v2864_v29, %v2864_v29 }
 0x79f   : > { %4740 = vmatmul.mubr.msk.bf16.vlgmr.msra.gmra.mxu0 %vm1365_vm1, %v2868_v11  ;;  %v2661_v11 = vpack.c.bf16 %v6365_v46, %v6365_v46  ;;  %v5245_v46 = vld [vmem:[%s5889_s17 + $0x7a4] ss:$8 sps:$4 sm:$0xff]  }
 0x7a0   : > { %3258 = vmatpush1.bf16.msra.mxu0 %v5204_v24  ;;  %v5251_v24 = vld [vmem:[%s5889_s17 + $0x784] ss:$8 sps:$4 sm:$0xff]  }
 0x7a1   : > { %3259 = vmatprep.subr.bf16.mxu0 %v5209_v25 }
 0x7a4   : > { %3260 = vmatpush1.bf16.msra.mxu0 %v5207_v30 }
 0x7a5   : > { %3261 = vmatprep.subr.bf16.mxu0 %v5212_v32 }
 0x7a8   : > { %3262 = vmatpush1.bf16.msra.mxu0 %v5210_v35 }
 0x7a9   : > { %3263 = vmatprep.subr.bf16.mxu0 %v5215_v36 }
 0x7ac   : > { %3264 = vmatpush1.bf16.msra.mxu0 %v5213_v37 }
 0x7ad   : > { %3265 = vmatprep.subr.bf16.mxu0 %v5218_v14 }
 0x7b0   : > { %3266 = vmatpush1.bf16.msra.mxu0 %v5216_v39 }
 0x7b1   : > { %3267 = vmatprep.subr.bf16.mxu0 %v5221_v40  ;;  %v3091_v40 = vsub.s32 7, %v5974_v12 }
 0x7b4   : > { %3268 = vmatpush1.bf16.msra.mxu0 %v5219_v41  ;;  %v3092_v41 = vrot.slane %v6355_v33, %v3091_v40 }
 0x7b5   : > { %3269 = vmatprep.subr.bf16.mxu0 %v5224_v27  ;;  %v3096_v27 = vrot.slane %v6361_v42, %v3091_v40  ;;  %v5293_v40 = vld [vmem:[%s5889_s17 + $0x8a4] ss:$8 sps:$4 sm:$0xff]  }
 0x7b8   : > { %3270 = vmatpush1.bf16.msra.mxu0 %v5222_v43 }
 0x7b9   : > { %3271 = vmatprep.subr.bf16.mxu0 %v5227_v44 }
 0x7bc   : > { %3272 = vmatpush1.bf16.msra.mxu0 %v5225_v45 }
 0x7e7   : > { %v2827_v16 = vpop.xlane.xlu1 %2826 }
 0x7e8   : > { %v2835_v17 = vsub.f32 %v2736_v47, %v2827_v16  ;;  %v5230_v47 = vld [vmem:[%s5889_s17 + $0x7f4] ss:$8 sps:$4 sm:$0xff]  }
 0x7e9   : > { %3273 = vmatprep.subr.bf16.mxu0 %v5230_v47 }
 0x7ea   : > { %v2840_v18 = vmul.f32 1.442695, %v2835_v17  ;;  %3274 = vmatpush2.bf16.msra.mxu0 %v5228_v52 }
 0x7eb   : > { %3275 = vmatprep.subr.bf16.mxu0 %v5233_v53 }
 0x7ec   : > { %5328 = vpow2.f32 %v2840_v18  ;;  %v3012_v18 = vsel %vm1417_vm2, %v2661_v11, 0  ;;  %v5276_v11 = vld [vmem:[%s5889_s17 + $0x8f0] ss:$8 sps:$4 sm:$0xff]  }
 0x7ee   : > { %3276 = vmatpush2.bf16.msra.mxu0 %v5231_v54 }
 0x7ef   : > { %v2833_v19 = vpop.xlane.xlu1 %2832  ;;  %3277 = vmatprep.subr.bf16.mxu0 %v5236_v55 }
 0x7f0   : > { %v2837_v20 = vsub.f32 %v2816_v60, %v2833_v19  ;;  %v5239_v60 = vld [vmem:[%s5889_s17 + $0x7c4] ss:$8 sps:$4 sm:$0xff]  }
 0x7f2   : > { %v2844_v31 = vmul.f32 1.442695, %v2837_v20  ;;  %3278 = vmatpush2.bf16.msra.mxu0 %v5234_v57 }
 0x7f3   : > { %3279 = vmatprep.subr.bf16.mxu0 %v5239_v60 }
 0x7f4   : > { %5330 = vpow2.f32 %v2844_v31 }
 0x7f6   : > { %3280 = vmatpush2.bf16.msra.mxu0 %v5237_v61 }
 0x7f7   : > { %3281 = vmatprep.subr.bf16.mxu0 %v5242_v62  ;;  %v5254_v62 = vld [vmem:[%s5889_s17 + $0x874] ss:$8 sps:$4 sm:$0xff]  }
 0x7f9   : > { %v6377_v9 = vpop.eup %5328 }
 0x7fa   : > { %v2849_v21 = vsel %vm1365_vm1, %v6377_v9, 0.0  ;;  %3282 = vmatpush2.bf16.msra.mxu0 %v5240_v1  ;;  %v5255_v1 = vld [vmem:[%s5889_s17 + $0x860] ss:$8 sps:$4 sm:$0xff]  }
 0x7fb   : > { %2850 = vadd.xlane.f32.xlu1 %v2849_v21  ;;  %v5243_v21 = vld [vmem:[%s5889_s17 + $0x7a0] ss:$8 sps:$4 sm:$0xff]   ;;  %3283 = vmatprep.subr.bf16.mxu0 %v5245_v46 }
 0x7fe   : > { %3284 = vmatpush2.bf16.msra.mxu0 %v5243_v21 }
 0x801   : > { %v6381_v22 = vpop.eup %5330 }
 0x802   : > { %v2855_v23 = vsel %vm1365_vm1, %v6381_v22, 0.0 }
 0x803   : > { %2856 = vadd.xlane.f32.xlu1 %v2855_v23  ;;  %v5248_v23 = vld [vmem:[%s5889_s17 + $0x794] ss:$8 sps:$4 sm:$0xff]  }
 0x804   : > { %3285 = vmatprep.subr.bf16.mxu0 %v5248_v23 }
 0x857   : > { %v2910_v2 = vpop.f32.mrf.mxu0 }
 0x859   : > { %v4729_v49 = vpop.f32.mrf.mxu0 }
 0x85a   : > { %v5261_v49 = vld [vmem:[%s5889_s17 + $0x840] ss:$8 sps:$4 sm:$0xff]  }
 0x85b   : > { %v2913_v0 = vpop.f32.mrf.mxu0 }
 0x85c   : > { %v5266_v0 = vld [vmem:[%s5889_s17 + $0x834] ss:$8 sps:$4 sm:$0xff]  }
 0x85d   : > { %v4730_v3 = vpop.f32.mrf.mxu0 }
 0x85e   : > { %v5264_v3 = vld [vmem:[%s5889_s17 + $0x830] ss:$8 sps:$4 sm:$0xff]  }
 0x85f   : > { %v3002_v4 = vpop.f32.mrf.mxu0 }
 0x861   : > { %v4741_v48 = vpop.f32.mrf.mxu0 }
 0x862   : > { %v5267_v48 = vld [vmem:[%s5889_s17 + $0x820] ss:$8 sps:$4 sm:$0xff]  }
 0x863   : > { %v3005_v63 = vpop.f32.mrf.mxu0 }
 0x864   : > { %v5272_v63 = vld [vmem:[%s5889_s17 + $0x814] ss:$8 sps:$4 sm:$0xff]  }
 0x865   : > { %v4742_v59 = vpop.f32.mrf.mxu0 }
 0x866   : > { %v5270_v59 = vld [vmem:[%s5889_s17 + $0x810] ss:$8 sps:$4 sm:$0xff]  }
 0x884   : > { %v2851_v58 = vpop.xlane.xlu1 %2850 }
 0x885   : > { %5332 = vrcp.f32 %v2851_v58  ;;  %v5275_v58 = vld [vmem:[%s5889_s17 + $0x804] ss:$8 sps:$4 sm:$0xff]  }
 0x88c   : > { %v2857_v8 = vpop.xlane.xlu1 %2856 }
 0x88d   : > { %5334 = vrcp.f32 %v2857_v8  ;;  %v5273_v8 = vld [vmem:[%s5889_s17 + $0x800] ss:$8 sps:$4 sm:$0xff]  }
 0x892   : > { %v5333_v29 = vpop.eup %5332 }
 0x893   : > { %v2863_v16 = vmul.f32 %v5333_v29, %v6377_v9  ;;  %v5246_v9 = vld [vmem:[%s5889_s17 + $0x790] ss:$8 sps:$4 sm:$0xff]   ;;  %v5278_v29 = vld [vmem:[%s5889_s17 + $0x8f4] ss:$8 sps:$4 sm:$0xff]  }
 0x894   : > { %3286 = vmatpush2.bf16.msra.mxu0 %v5246_v9 }
 0x895   : > { %v2867_v17 = vpack.c.bf16 %v2863_v16, %v2863_v16  ;;  %3287 = vmatprep.subr.bf16.mxu0 %v5251_v24 }
 0x897   : > { %4734 = vmatmul.mubr.msk.bf16.vlgmr.msra.gmra.mxu1 %vm1365_vm1, %v2867_v17 }
 0x898   : > { %4744 = vmatpush3.bf16.msra.mxu1 %v3012_v18  ;;  %4745 = vmatprep.mubr.msk.bf16.mxu1 %vm5650_vm0, %v5649_v10 }
 0x899   : > { %3288 = vmatpush2.bf16.msra.mxu0 %v5249_v38  ;;  %3563 = vmatprep.subr.bf16.mxu1 %v5254_v62  ;;  %v3355_v62 = vrot.slane %v6309_v51, %v6224_v28 }
 0x89a   : > { %v5335_v19 = vpop.eup %5334 }
 0x89b   : > { %v2865_v20 = vmul.f32 %v5335_v19, %v6381_v22 }
 0x89d   : > { %v2869_v31 = vpack.c.bf16 %v2865_v20, %v2865_v20 }
 0x89f   : > { %4746 = vmatmul.mubr.msk.bf16.vlgmr.msra.gmra.mxu1 %vm1365_vm1, %v2869_v31 }
 0x957   : > { %v2956_v25 = vpop.f32.mrf.mxu1 }
 0x958   : > { %v3054_v36 = vpack.c.bf16 %v2956_v25, %v2910_v2  ;;  %v5260_v2 = vld [vmem:[%s5889_s17 + $0x854] ss:$8 sps:$4 sm:$0xff]  }
 0x959   : > { %v4735_v10 = vpop.f32.mrf.mxu1 }
 0x95b   : > { %v2959_v30 = vpop.f32.mrf.mxu1 }
 0x95c   : > { %v5281_v30 = vld [vmem:[%s5889_s17 + $0x8e4] ss:$8 sps:$4 sm:$0xff]  }
 0x95d   : > { %v4736_v32 = vpop.f32.mrf.mxu1 }
 0x95e   : > { %v5279_v32 = vld [vmem:[%s5889_s17 + $0x8e0] ss:$8 sps:$4 sm:$0xff]  }
 0x95f   : > { %v3048_v22 = vpop.f32.mrf.mxu1 }
 0x960   : > { %v3055_v35 = vpack.c.bf16 %v3048_v22, %v3002_v4  ;;  %v5269_v4 = vld [vmem:[%s5889_s17 + $0x824] ss:$8 sps:$4 sm:$0xff]   ;;  %v5284_v22 = vld [vmem:[%s5889_s17 + $0x8d4] ss:$8 sps:$4 sm:$0xff]  }
 0x961   : > { %v4747_v37 = vpop.f32.mrf.mxu1 }
 0x962   : > { %3289 = vmatprep.mubr.bf16.mxu0 %v3055_v35  ;;  %v5282_v35 = vld [vmem:[%s5889_s17 + $0x8d0] ss:$8 sps:$4 sm:$0xff]   ;;  %v5285_v37 = vld [vmem:[%s5889_s17 + $0x8c0] ss:$8 sps:$4 sm:$0xff]  }
 0x963   : > { %v3051_v14 = vpop.f32.mrf.mxu1  ;;  %3290 = vmatmul.mubr.bf16.vlgmr.msra.gmra.mxu0 %v3054_v36  ;;  %v5287_v36 = vld [vmem:[%s5889_s17 + $0x8c4] ss:$8 sps:$4 sm:$0xff]  }
 0x964   : > { %v5290_v14 = vld [vmem:[%s5889_s17 + $0x8b4] ss:$8 sps:$4 sm:$0xff]  }
 0x965   : > { %v4748_v39 = vpop.f32.mrf.mxu1 }
 0x966   : > { %v5288_v39 = vld [vmem:[%s5889_s17 + $0x8b0] ss:$8 sps:$4 sm:$0xff]  }
 0xa23   : > { %v3291_v43 = vpop.f32.mrf.mxu0 }
 0xa24   : > { %v3292_v44 = vadd.f32 %v3291_v43, %v3092_v41  ;;  %v5294_v43 = vld [vmem:[%s5889_s17 + $0x890] ss:$8 sps:$4 sm:$0xff]  }
 0xa25   : > { %v3293_v45 = vpop.f32.mrf.mxu0 }
 0xa26   : > { %v3294_v47 = vadd.f32 %v3293_v45, %v3096_v27  ;;  %v3300_v53 = vadd.f32 %v3292_v44, %v6328_v6  ;;  %v5252_v6 = vld [vmem:[%s5889_s17 + $0x870] ss:$8 sps:$4 sm:$0xff]   ;;  %v5299_v44 = vld [vmem:[%s5889_s17 + $0x884] ss:$8 sps:$4 sm:$0xff]   ;;  %v5297_v45 = vld [vmem:[%s5889_s17 + $0x880] ss:$8 sps:$4 sm:$0xff]  }
 0xa27   : > { %v3295_v52 = vpop.f32.mrf.mxu0  ;;  %3564 = vmatpush1.bf16.msra.mxu1 %v5252_v6 }
 0xa28   : > { %v3301_v54 = vadd.f32 %v3294_v47, %v6324_v5  ;;  %v3296_v55 = vadd.f32 %v3295_v52, %v3092_v41  ;;  %v5257_v5 = vld [vmem:[%s5889_s17 + $0x864] ss:$8 sps:$4 sm:$0xff]   ;;  %v5291_v41 = vld [vmem:[%s5889_s17 + $0x8a0] ss:$8 sps:$4 sm:$0xff]  }
 0xa29   : > { %v3297_v12 = vpop.f32.mrf.mxu0  ;;  %3565 = vmatprep.subr.bf16.mxu1 %v5257_v5  ;;  %v3351_v5 = vrot.slane %v6306_v50, %v6224_v28  ;;  %v3402_v28 = vrot.slane %v6309_v51, %v5983_v15 }
 0xa2a   : > { %v3298_v57 = vadd.f32 %v3297_v12, %v3096_v27  ;;  %v3304_v33 = vadd.f32 %v3301_v54, %v3300_v53  ;;  %v3302_v42 = vadd.f32 %v3296_v55, %v6330_v7  ;;  %v5258_v7 = vld [vmem:[%s5889_s17 + $0x850] ss:$8 sps:$4 sm:$0xff]   ;;  %v5296_v27 = vld [vmem:[%s5889_s17 + $0x894] ss:$8 sps:$4 sm:$0xff]  }
 0xa2b   : > { %3566 = vmatpush1.bf16.msra.mxu1 %v5255_v1 }
 0xa2c   : > { %v3303_v60 = vadd.f32 %v3298_v57, %v6326_v13  ;;  %3305 = vadd.xlane.f32.xlu0 %v3304_v33  ;;  %3567 = vmatprep.subr.bf16.mxu1 %v5260_v2  ;;  %v5263_v13 = vld [vmem:[%s5889_s17 + $0x844] ss:$8 sps:$4 sm:$0xff]  }
 0xa2e   : > { %v3307_v61 = vadd.f32 %v3303_v60, %v3302_v42 }
 0xa2f   : > { %3568 = vmatpush1.bf16.msra.mxu1 %v5258_v7 }
 0xa30   : > { %3308 = vadd.xlane.f32.xlu1 %v3307_v61  ;;  %3569 = vmatprep.subr.bf16.mxu1 %v5263_v13  ;;  %v3339_v61 = vrot.slane %v6306_v50, %v6202_v56 }
 0xa33   : > { %3570 = vmatpush1.bf16.msra.mxu1 %v5261_v49 }
 0xa34   : > { %3571 = vmatprep.subr.bf16.mxu1 %v5266_v0 }
 0xa37   : > { %3572 = vmatpush1.bf16.msra.mxu1 %v5264_v3 }
 0xa38   : > { %3573 = vmatprep.subr.bf16.mxu1 %v5269_v4 }
 0xa3b   : > { %3574 = vmatpush1.bf16.msra.mxu1 %v5267_v48 }
 0xa3c   : > { %3575 = vmatprep.subr.bf16.mxu1 %v5272_v63 }
 0xa3f   : > { %3576 = vmatpush1.bf16.msra.mxu1 %v5270_v59 }
 0xa40   : > { %3577 = vmatprep.subr.bf16.mxu1 %v5275_v58 }
 0xa43   : > { %3578 = vmatpush1.bf16.msra.mxu1 %v5273_v8 }
 0xa44   : > { %3579 = vmatprep.subr.bf16.mxu1 %v5278_v29 }
 0xa47   : > { %3580 = vmatpush2.bf16.msra.mxu1 %v5276_v11 }
 0xa48   : > { %3581 = vmatprep.subr.bf16.mxu1 %v5281_v30 }
 0xa4b   : > { %3582 = vmatpush2.bf16.msra.mxu1 %v5279_v32 }
 0xa4c   : > { %3583 = vmatprep.subr.bf16.mxu1 %v5284_v22 }
 0xa4f   : > { %3584 = vmatpush2.bf16.msra.mxu1 %v5282_v35 }
 0xa50   : > { %3585 = vmatprep.subr.bf16.mxu1 %v5287_v36 }
 0xa53   : > { %3586 = vmatpush2.bf16.msra.mxu1 %v5285_v37 }
 0xa54   : > { %3587 = vmatprep.subr.bf16.mxu1 %v5290_v14 }
 0xa57   : > { %3588 = vmatpush2.bf16.msra.mxu1 %v5288_v39 }
 0xa58   : > { %3589 = vmatprep.subr.bf16.mxu1 %v5293_v40 }
 0xa5b   : > { %3590 = vmatpush2.bf16.msra.mxu1 %v5291_v41 }
 0xa5c   : > { %3591 = vmatprep.subr.bf16.mxu1 %v5296_v27 }
 0xa5f   : > { %3592 = vmatpush2.bf16.msra.mxu1 %v5294_v43 }
 0xa60   : > { %3593 = vmatprep.subr.bf16.mxu1 %v5299_v44 }
 0xa63   : > { %3594 = vmatpush2.bf16.msra.mxu1 %v5297_v45 }
 0xab5   : > { %v3306_v16 = vpop.xlane.xlu0 %3305 }
 0xab6   : > { %v3310_v17 = vmul.f32 0.00390625, %v3306_v16 }
 0xab8   : > { %v3312_v18 = vsub.f32 %v3300_v53, %v3310_v17  ;;  %v3313_v19 = vsub.f32 %v3301_v54, %v3310_v17 }
 0xab9   : > { %v3309_v20 = vpop.xlane.xlu1 %3308 }
 0xaba   : > { %v3311_v31 = vmul.f32 0.00390625, %v3309_v20  ;;  %v3316_v46 = vmul.f32 %v3312_v18, %v3312_v18  ;;  %v3317_v21 = vmul.f32 %v3313_v19, %v3313_v19 }
 0xabc   : > { %v3314_v9 = vsub.f32 %v3302_v42, %v3311_v31  ;;  %v3315_v23 = vsub.f32 %v3303_v60, %v3311_v31  ;;  %v3320_v24 = vadd.f32 %v3317_v21, %v3316_v46  ;;  %v3343_v42 = vrot.slane %v6309_v51, %v6202_v56 }
 0xabd   : > { %v3398_v56 = vrot.slane %v6306_v50, %v5983_v15 }
 0xabe   : > { %3321 = vadd.xlane.f32.xlu0 %v3320_v24  ;;  %v3318_v38 = vmul.f32 %v3314_v9, %v3314_v9  ;;  %v3319_v25 = vmul.f32 %v3315_v23, %v3315_v23 }
 0xac0   : > { %v3323_v10 = vadd.f32 %v3319_v25, %v3318_v38 }
 0xac2   : > { %3324 = vadd.xlane.f32.xlu1 %v3323_v10 }
 0xb47   : > { %v3322_v47 = vpop.xlane.xlu0 %3321 }
 0xb48   : > { %v3326_v52 = vmul.f32 0.00390625, %v3322_v47 }
 0xb4a   : > { %v3328_v53 = vadd.f32 1e-05, %v3326_v52 }
 0xb4b   : > { %v3325_v54 = vpop.xlane.xlu1 %3324 }
 0xb4c   : > { %5336 = vrsqrt.f32 %v3328_v53  ;;  %v3327_v55 = vmul.f32 0.00390625, %v3325_v54  ;;  %v3645_v53 = vrot.slane %v6306_v50, %v6221_v26  ;;  %v3649_v54 = vrot.slane %v6309_v51, %v6221_v26 }
 0xb4e   : > { %v3329_v12 = vadd.f32 1e-05, %v3327_v55 }
 0xb50   : > { %5338 = vrsqrt.f32 %v3329_v12  ;;  %v3657_v12 = vrot.slane %v6306_v50, %v6352_v34 }
 0xb59   : > { %v5337_v57 = vpop.eup %5336 }
 0xb5a   : > { %v3333_v33 = vmul.f32 %v5337_v57, %v3313_v19  ;;  %v3332_v60 = vmul.f32 %v5337_v57, %v3312_v18  ;;  %v3661_v57 = vrot.slane %v6309_v51, %v6352_v34 }
 0xb5c   : > { %v3345_v2 = vmul.f32 %v3343_v42, %v3333_v33  ;;  %v3344_v13 = vmul.f32 %v3339_v61, %v3332_v60 }
 0xb5d   : > { %v5339_v6 = vpop.eup %5338 }
 0xb5e   : > { %v3335_v1 = vmul.f32 %v5339_v6, %v3315_v23  ;;  %v3334_v7 = vmul.f32 %v5339_v6, %v3314_v9  ;;  %v3357_v3 = vadd.f32 %v3355_v62, %v3345_v2  ;;  %v3356_v48 = vadd.f32 %v3351_v5, %v3344_v13 }
 0xb60   : > { %v3347_v49 = vmul.f32 %v3343_v42, %v3335_v1  ;;  %v3346_v0 = vmul.f32 %v3339_v61, %v3334_v7 }
 0xb62   : > { %v3359_v4 = vadd.f32 %v3355_v62, %v3347_v49  ;;  %v3358_v63 = vadd.f32 %v3351_v5, %v3346_v0 }
 0xb64   : > { %v3361_v59 = vpack.c.bf16 %v3359_v4, %v3357_v3  ;;  %v3360_v58 = vpack.c.bf16 %v3358_v63, %v3356_v48 }
 0xb66   : > { %3595 = vmatprep.mubr.bf16.mxu1 %v3361_v59 }
 0xb67   : > { %3596 = vmatmul.mubr.bf16.vlgmr.msra.gmra.mxu1 %v3360_v58 }
 0xc27   : > { %v3597_v8 = vpop.f32.mrf.mxu1 }
 0xc28   : > { %v3598_v29 = vadd.f32 %v3597_v8, %v3398_v56 }
 0xc29   : > { %v3599_v11 = vpop.f32.mrf.mxu1 }
 0xc2a   : > { %v3600_v16 = vadd.f32 %v3599_v11, %v3402_v28  ;;  %v3606_v18 = vadd.f32 %v3598_v29, %v3356_v48 }
 0xc2b   : > { %v3601_v17 = vpop.f32.mrf.mxu1 }
 0xc2c   : > { %v3607_v19 = vadd.f32 %v3600_v16, %v3357_v3  ;;  %v3602_v20 = vadd.f32 %v3601_v17, %v3398_v56 }
 0xc2d   : > { %v3603_v31 = vpop.f32.mrf.mxu1 }
 0xc2e   : > { %v3604_v46 = vadd.f32 %v3603_v31, %v3402_v28  ;;  %v3610_v21 = vadd.f32 %v3607_v19, %v3606_v18  ;;  %v3608_v9 = vadd.f32 %v3602_v20, %v3358_v63 }
 0xc30   : > { %v3609_v23 = vadd.f32 %v3604_v46, %v3359_v4  ;;  %3611 = vadd.xlane.f32.xlu0 %v3610_v21 }
 0xc32   : > { %v3613_v24 = vadd.f32 %v3609_v23, %v3608_v9 }
 0xc34   : > { %3614 = vadd.xlane.f32.xlu1 %v3613_v24 }
 0xcb9   : > { %v3612_v38 = vpop.xlane.xlu0 %3611 }
 0xcba   : > { %v3616_v25 = vmul.f32 0.00390625, %v3612_v38 }
 0xcbc   : > { %v3618_v10 = vsub.f32 %v3606_v18, %v3616_v25  ;;  %v3619_v15 = vsub.f32 %v3607_v19, %v3616_v25 }
 0xcbd   : > { %v3615_v30 = vpop.xlane.xlu1 %3614 }
 0xcbe   : > { %v3617_v32 = vmul.f32 0.00390625, %v3615_v30  ;;  %v3622_v22 = vmul.f32 %v3618_v10, %v3618_v10  ;;  %v3623_v35 = vmul.f32 %v3619_v15, %v3619_v15 }
 0xcc0   : > { %v3620_v36 = vsub.f32 %v3608_v9, %v3617_v32  ;;  %v3621_v37 = vsub.f32 %v3609_v23, %v3617_v32  ;;  %v3626_v14 = vadd.f32 %v3623_v35, %v3622_v22 }
 0xcc2   : > { %3627 = vadd.xlane.f32.xlu0 %v3626_v14  ;;  %v3624_v39 = vmul.f32 %v3620_v36, %v3620_v36  ;;  %v3625_v40 = vmul.f32 %v3621_v37, %v3621_v37 }
 0xcc4   : > { %v3629_v41 = vadd.f32 %v3625_v40, %v3624_v39 }
 0xcc6   : > { %3630 = vadd.xlane.f32.xlu1 %v3629_v41 }
 0xd4b   : > { %v3628_v27 = vpop.xlane.xlu0 %3627 }
 0xd4c   : > { %v3632_v43 = vmul.f32 0.00390625, %v3628_v27 }
 0xd4e   : > { %v3634_v44 = vadd.f32 1e-05, %v3632_v43 }
 0xd4f   : > { %v3631_v45 = vpop.xlane.xlu1 %3630 }
 0xd50   : > { %5340 = vrsqrt.f32 %v3634_v44  ;;  %v3633_v47 = vmul.f32 0.00390625, %v3631_v45 }
 0xd52   : > { %v3635_v52 = vadd.f32 1e-05, %v3633_v47 }
 0xd54   : > { %5342 = vrsqrt.f32 %v3635_v52 }
 0xd5d   : > { %v5341_v55 = vpop.eup %5340 }
 0xd5e   : > { %v3638_v33 = vmul.f32 %v5341_v55, %v3618_v10  ;;  %v3639_v42 = vmul.f32 %v5341_v55, %v3619_v15 }
 0xd60   : > { %v3650_v60 = vmul.f32 %v3645_v53, %v3638_v33  ;;  %v3651_v61 = vmul.f32 %v3649_v54, %v3639_v42 }
 0xd61   : > { %v5343_v6 = vpop.eup %5342 }
 0xd62   : > { %v3662_v62 = vadd.f32 %v3657_v12, %v3650_v60  ;;  %v3663_v5 = vadd.f32 %v3661_v57, %v3651_v61  ;;  %v3640_v1 = vmul.f32 %v5343_v6, %v3620_v36  ;;  %v3641_v2 = vmul.f32 %v5343_v6, %v3621_v37 }
 0xd64   : > { %3666 = vst [vmem:[#allocation2 + $0x10] sm:$0xff] %v3662_v62  ;;  %3667 = vst [vmem:[#allocation2] sm:$0xff] %v3663_v5  ;;  %v3652_v7 = vmul.f32 %v3645_v53, %v3640_v1  ;;  %v3653_v26 = vmul.f32 %v3649_v54, %v3641_v2  ;;  %3673 = sbr.rel (%p4576_p12) target bundleno = 3980 (0xf8c), region = 84 }
 0xd66   : > { %v3664_v13 = vadd.f32 %v3657_v12, %v3652_v7  ;;  %v3665_v49 = vadd.f32 %v3661_v57, %v3653_v26 }
 0xd68   : > { %3668 = vst [vmem:[#allocation2 + $0x18] sm:$0xff] %v3664_v13  ;;  %3669 = vst [vmem:[#allocation2 + $0x8] sm:$0xff] %v3665_v49 }
 0xd69   : > { %v5350_v50 = vld [vmem:[#allocation12 + $0x78] sm:$0xff]   ;;  %v3675_v51 = vpack.c.bf16 %v3665_v49, %v3663_v5  ;;  %v5352_v0 = vld [vmem:[#allocation12 + $0x70] sm:$0xff]   ;;  %v5354_v4 = vld [vmem:[#allocation12 + $0x68] sm:$0xff]   ;;  %v3674_v18 = vpack.c.bf16 %v3664_v13, %v3662_v62 }
 0xd6a   : > { %v5351_v34 = vld [vmem:[#allocation12 + $0x38] sm:$0xff]   ;;  %4631 = vmatprep.subr.bf16.mxu0 %v5350_v50  ;;  %v5353_v3 = vld [vmem:[#allocation12 + $0x30] sm:$0xff]   ;;  %v5355_v48 = vld [vmem:[#allocation12 + $0x28] sm:$0xff]  }
 0xd6b   : > { %3843 = vmatprep.mubr.bf16.mxu0 %v3675_v51  ;;  %4632 = vmatpush3.bf16.msra.mxu0 %v5351_v34  ;;  %v5356_v63 = vld [vmem:[#allocation12 + $0x60] sm:$0xff]   ;;  %v5358_v58 = vld [vmem:[#allocation12 + $0x58] sm:$0xff]   ;;  %v5360_v28 = vld [vmem:[#allocation12 + $0x50] sm:$0xff]  }
 0xd6c   : > { %4633 = vmatprep.subr.bf16.mxu0 %v5352_v0  ;;  %v5357_v59 = vld [vmem:[#allocation12 + $0x20] sm:$0xff]   ;;  %v5359_v56 = vld [vmem:[#allocation12 + $0x18] sm:$0xff]   ;;  %v5361_v8 = vld [vmem:[#allocation12 + $0x10] sm:$0xff]  }
 0xd6d   : > { %v5362_v29 = vld [vmem:[#allocation12 + $0x48] sm:$0xff]   ;;  %v5364_v16 = vld [vmem:[#allocation12 + $0x40] sm:$0xff]  }
 0xd6e   : > { %v5363_v11 = vld [vmem:[#allocation12 + $0x8] sm:$0xff]   ;;  %v5365_v17 = vld [vmem:[#allocation12] sm:$0xff]  }
 0xd6f   : > { %4634 = vmatpush3.bf16.msra.mxu0 %v5353_v3  ;;  %v4577_v31 = vld [vmem:[#allocation14] ss:$0 sm:$0xff] }
 0xd70   : > { %4635 = vmatprep.subr.bf16.mxu0 %v5354_v4 }
 0xd73   : > { %4636 = vmatpush3.bf16.msra.mxu0 %v5355_v48 }
 0xd74   : > { %4637 = vmatprep.subr.bf16.mxu0 %v5356_v63 }
 0xd77   : > { %4638 = vmatpush3.bf16.msra.mxu0 %v5357_v59 }
 0xd78   : > { %4639 = vmatprep.subr.bf16.mxu0 %v5358_v58 }
 0xd7b   : > { %4640 = vmatpush3.bf16.msra.mxu0 %v5359_v56 }
 0xd7c   : > { %4641 = vmatprep.subr.bf16.mxu0 %v5360_v28 }
 0xd7f   : > { %4642 = vmatpush3.bf16.msra.mxu0 %v5361_v8 }
 0xd80   : > { %4643 = vmatprep.subr.bf16.mxu0 %v5362_v29 }
 0xd83   : > { %4644 = vmatpush3.bf16.msra.mxu0 %v5363_v11 }
 0xd84   : > { %4645 = vmatprep.subr.bf16.mxu0 %v5364_v16 }
 0xd87   : > { %4646 = vmatpush3.bf16.msra.mxu0 %v5365_v17 }
 0xd8a   : > { %3844 = vmatmul.mubr.bf16.vlgmr.msra.gmra.mxu0 %v3674_v18 }
 0xe4a   : > { %v4647_v19 = vpop.f32.mrf.mxu0 }
 0xe4c   : > { %v4648_v20 = vpop.f32.mrf.mxu0 }
 0xe4d   : > { %v4649_v46 = vadd.f32 %v4648_v20, %v4647_v19 }
 0xe4e   : > { %v4650_v21 = vpop.f32.mrf.mxu0 }
 0xe4f   : > { %v3846_v9 = vadd.f32 %v4649_v46, %v4577_v31 }
 0xe50   : > { %v4651_v23 = vpop.f32.mrf.mxu0 }
 0xe51   : > { %v4652_v24 = vadd.f32 %v4651_v23, %v4650_v21  ;;  %3852 = vmax.xlane.f32.xlu0 %v3846_v9 }
 0xe53   : > { %v3849_v38 = vadd.f32 %v4652_v24, %v4577_v31 }
 0xe55   : > { %3854 = vmax.xlane.f32.xlu0 %v3849_v38 }
 0xeda   : > { %v3853_v25 = vpop.xlane.xlu0 %3852 }
 0xedb   : > { %v3856_v10 = vsub.f32 %v3846_v9, %v3853_v25 }
 0xedd   : > { %v3858_v15 = vmul.f32 1.442695, %v3856_v10 }
 0xede   : > { %v3855_v30 = vpop.xlane.xlu0 %3854 }
 0xedf   : > { %5366 = vpow2.f32 %v3858_v15  ;;  %v3857_v32 = vsub.f32 %v3849_v38, %v3855_v30 }
 0xee1   : > { %v3860_v22 = vmul.f32 1.442695, %v3857_v32 }
 0xee3   : > { %5368 = vpow2.f32 %v3860_v22 }
 0xeec   : > { %v5367_v35 = vpop.eup %5366 }
 0xeed   : > { %3862 = vadd.xlane.f32.xlu1 %v5367_v35 }
 0xef0   : > { %v5369_v36 = vpop.eup %5368 }
 0xef1   : > { %3864 = vadd.xlane.f32.xlu1 %v5369_v36 }
 0xf76   : > { %v3863_v37 = vpop.xlane.xlu1 %3862 }
 0xf77   : > { %5370 = vrcp.f32 %v3863_v37 }
 0xf7a   : > { %v3865_v14 = vpop.xlane.xlu1 %3864 }
 0xf7b   : > { %5372 = vrcp.f32 %v3865_v14 }
 0xf84   : > { %v5371_v39 = vpop.eup %5370 }
 0xf85   : > { %v3867_v40 = vmul.f32 %v5371_v39, %v5367_v35 }
 0xf87   : > { %3870 = vst [vmem:[#allocation15] sm:$0xff] %v3867_v40 }
 0xf88   : > { %v5373_v41 = vpop.eup %5372 }
 0xf89   : > { %v3869_v27 = vmul.f32 %v5373_v41, %v5369_v36 }
 0xf8b   : > { %3871 = vst [vmem:[#allocation15 + $0x8] sm:$0xff] %v3869_v27 }
 0xf8c PF: > { %p4814_p0 = scmp.eq.s32.totalorder %s5716_s30, 1  ;;  %s5652_s13 = smov [#allocation15]  }
 0xf8d   : > { %s3878_s11 = sshll.u32 %s5652_s13, 4  ;;  %s3879_s11 = int_to_ptr.vmem [resolvable:$true] %s3878_s11 }
 0xf8e   : > { %s5560_s22 = scalar_lea.vmem %s3879_s11, 256  ;;  %p5567_p1 = scmp.lt.s32.totalorder %s3879_s11, %s3879_s11 }
 0xf8f   : > { %p5561_p7 = scmp.ne.s32.totalorder %s3879_s11, %s5560_s22  ;;  %p5568_p9 = scmp.lt.s32.totalorder %s5560_s22, %s5560_s22 }
 0xf91   : > { %p5562_p13 = pnand %p5561_p7, %p4814_p0  ;;  %p5569_p3 = por %p5568_p9, %p5567_p1 }
 0xf93   : > { %p5563_p5 = pneg %p5562_p13 }
 0xf95   : > { %p5570_p4 = pnand %p5569_p3, %p5563_p5 }
 0xf97   : > { %5573 = shalt.err (!%p5570_p4)
}
 0xf98   : > { %s5653_s15 = smov 128   ;;  %s5654_s27 = smov 8  }
 0xf99   : > { %4777 = dma.vmem_to_hbm [thread:$0]  (%p4814_p0), %s3879_s11, 256, %s6518_s7, [#allocation5], %s5653_s15, %s5653_s15, %s5654_s27  }
 0xf9a   : > { %5617 = dma.done.wait (%p4814_p0), [#allocation5], 256  }
 0xf9b   : > { %5619 = vsyncadd (%p4814_p0), [#allocation5], 4294967040 }
 0xf9c PF: > { %p21_p6 = scmp.ge.s32.totalorder %s5758_s23, 4   ;;  %s6553_s24 = smov %s5626_s25 }
 0xf9d   : > { %s6554_s25 = smov %s5630_s26  ;;  %s6555_s26 = smov %s5770_s9 }
 0xf9e   : > { %s6556_s27 = smov %s5758_s23  ;;  %23 = sbr.rel (!%p21_p6) target bundleno = 9 (0x9), region = 133 }
 0xfa3   :  { %3894 = vsyncpa [#allocation4], 1 }
 0xfa4   :  { %3896 = vsyncpa [#allocation4 + $0x1], 1 }
 0xfa5   :  { %3897 = vsyncpa [#allocation7], 1 }
 0xfa6   :  { %3898 = vsyncpa [#allocation10], 1 }
 0xfa7   :  { %3900 = vsyncpa [#allocation10 + $0x1], 1 }
 0xfa8   :  { %3901 = vsyncpa [#allocation13], 1 }
 0xfa9   :  { %3902 = vsyncpa [#allocation5], 1 }
 0xfaa   :  { %3904 = vsyncpa [#allocation5 + $0x1], 1 }

</bundles_post_ra>
